<compile_context>
chip_gen: v7x
topology: tpu7x:2x2x1
jax: 0.10.0
libtpu: 0.0.40
codegen_flags: <defaults>
</compile_context>

<pallas_src>
import functools
import math

import jax
import jax.numpy as jnp
from jax import lax
from jax.experimental import pallas as pl
from jax.experimental.pallas import tpu as pltpu

HP = 128  # padded per-gate hidden width (= one vreg lane span)


# ----------------------------------------------------------------------------
# Pallas kernel: wavefront 2-layer LSTM + lane-dense Linear, all VMEM-resident.
# ----------------------------------------------------------------------------
def ohlcv_lstm_kernel(x_ref,      # (T*B, Cin)    f32   time-major input
                      wih1_ref,   # (Cin, 4*HP)   f32   W_ih layer1 (gate-padded)
                      whh1_ref,   # (HP, 4*HP)    bf16  W_hh layer1
                      b1_ref,     # (1, 4*HP)     f32   b_ih1 + b_hh1
                      w2_ref,     # (2*HP, 4*HP)  bf16  stacked [W_ih2; W_hh2]
                      b2_ref,     # (1, 4*HP)     f32   b_ih2 + b_hh2
                      wfc_ref,    # (HP, 128)     f32   W_fc^T (lane-padded)
                      bfc_ref,    # (1, 128)      f32
                      out_ref,    # (B, 128)      f32   padded output block
                      *, T, B):
    def cell(gates, c):
        # gate blocks [i | f | o | g], each HP lanes -> vreg-aligned slices.
        sg = jax.nn.sigmoid(gates[:, :3 * HP])      # one EUP pass: i, f, o
        g = jnp.tanh(gates[:, 3 * HP:])             # one EUP pass: g
        i_g = sg[:, 0:HP]
        f_g = sg[:, HP:2 * HP]
        o_g = sg[:, 2 * HP:3 * HP]
        c_new = f_g * c + i_g * g
        h_new = o_g * jnp.tanh(c_new)
        return h_new, c_new

    # Hoisted layer-1 x-side projection: one (T*B, Cin) @ (Cin, 4*HP) matmul,
    # off the serial chain.  Kept f32 (tiny, one-time).  Result = 8 vregs.
    gx1 = (jnp.dot(x_ref[...], wih1_ref[...], preferred_element_type=jnp.float32)
           + b1_ref[...])                            # (T*B, 4*HP) f32

    h1 = jnp.zeros((B, HP), jnp.float32)
    c1 = jnp.zeros((B, HP), jnp.float32)
    h2 = jnp.zeros((B, HP), jnp.float32)
    c2 = jnp.zeros((B, HP), jnp.float32)

    # Wavefront: outer step s runs the layer-1 cell for t=s and the layer-2
    # cell for t=s-1.  Both read only state from step s-1, so they are
    # independent within a step.  Loop fully unrolled (T static & small);
    # weight refs are read at each dot call site (no long-lived weight vregs).
    for s in range(T + 1):
        h1_prev = h1                                 # layer-1 hidden at t=s-1
        if s < T:
            gates1 = (gx1[s * B:(s + 1) * B, :]
                      + jnp.dot(h1_prev.astype(jnp.bfloat16), whh1_ref[...],
                                preferred_element_type=jnp.float32))
            h1, c1 = cell(gates1, c1)
        if s >= 1:
            xh = jnp.concatenate([h1_prev, h2], axis=-1).astype(jnp.bfloat16)
            gates2 = (jnp.dot(xh, w2_ref[...],
                              preferred_element_type=jnp.float32)
                      + b2_ref[...])
            h2, c2 = cell(gates2, c2)

    # Lane-dense FC on the last top-layer hidden state (f32, done once).
    out_ref[...] = (jnp.dot(h2, wfc_ref[...], preferred_element_type=jnp.float32)
                    + bfc_ref[...])


# ----------------------------------------------------------------------------
# One-time weight packing (call at model-load time, NOT per inference call).
# ----------------------------------------------------------------------------
def pack_params(params):
    """Gate permute [i,f,g,o]->[i,f,o,g], zero-pad each gate block to HP=128
    lanes, transpose, pre-sum biases, bf16-cast the recurrent matmul weights,
    stack layer-2 x/h weights, lane-pad the FC weight/bias."""
    wih1, whh1, bih1, bhh1, wih2, whh2, bih2, bhh2, wfc, bfc = params
    H = whh1.shape[1]
    Cin = wih1.shape[1]

    def gate_pad_t(w, k_pad):
        # w: (4H, K) PyTorch layout -> (k_pad, 4*HP) with gate blocks
        # [i, f, o, g], each zero-padded to HP lanes; rows zero-padded K->k_pad.
        K = w.shape[1]
        i, f, g, o = jnp.split(w.T, 4, axis=1)                   # each (K, H)
        blocks = [jnp.pad(blk, ((0, k_pad - K), (0, HP - H)))
                  for blk in (i, f, o, g)]
        return jnp.concatenate(blocks, axis=1)                   # (k_pad, 4*HP)

    def gate_pad_bias(b):
        i, f, g, o = jnp.split(b, 4)
        blocks = [jnp.pad(blk, (0, HP - H)) for blk in (i, f, o, g)]
        return jnp.concatenate(blocks).reshape(1, 4 * HP)

    wih1_p = gate_pad_t(wih1, Cin)                               # (Cin, 4HP) f32
    whh1_p = gate_pad_t(whh1, HP).astype(jnp.bfloat16)           # (HP, 4HP)
    b1_p = gate_pad_bias(bih1 + bhh1)                            # (1, 4HP) f32
    w2_p = jnp.concatenate([gate_pad_t(wih2, HP), gate_pad_t(whh2, HP)],
                           axis=0).astype(jnp.bfloat16)          # (2HP, 4HP)
    b2_p = gate_pad_bias(bih2 + bhh2)                            # (1, 4HP) f32
    wfc_p = jnp.pad(wfc.T, ((0, HP - H), (0, 128 - wfc.shape[0])))  # (HP,128)
    bfc_p = jnp.pad(bfc, (0, 128 - bfc.shape[0])).reshape(1, 128)   # (1,128)
    return (wih1_p, whh1_p, b1_p, w2_p, b2_p, wfc_p, bfc_p)


# ----------------------------------------------------------------------------
# Jitted forward: per-call plumbing is only the time-major transpose of x.
# ----------------------------------------------------------------------------
@jax.jit
def ohlcv_lstm_pallas(x, packed):
    """x: (B, T, Cin) float32 -> (B, 3) float32."""
    wih1_p, whh1_p, b1_p, w2_p, b2_p, wfc_p, bfc_p = packed
    B, T, Cin = x.shape
    x_tm = jnp.transpose(x, (1, 0, 2)).reshape(T * B, Cin)       # time-major

    vmem = pl.BlockSpec(memory_space=pltpu.MemorySpace.VMEM)
    kernel = functools.partial(ohlcv_lstm_kernel, T=T, B=B)
    out_p = pl.pallas_call(
        kernel,
        out_shape=jax.ShapeDtypeStruct((B, 128), jnp.float32),
        in_specs=[vmem] * 8,
        out_specs=vmem,
    )(x_tm, wih1_p, whh1_p, b1_p, w2_p, b2_p, wfc_p, bfc_p)
    return out_p[:, :3]


# ----------------------------------------------------------------------------
# Pure-JAX f32 reference (mirrors the PyTorch forward) for correctness check.
# ----------------------------------------------------------------------------
def ohlcv_lstm_ref(x, params):
    wih1, whh1, bih1, bhh1, wih2, whh2, bih2, bhh2, wfc, bfc = params
    B, T, _ = x.shape
    H = whh1.shape[1]

    def run_layer(seq, wih, whh, bih, bhh):
        def step(carry, x_t):
            h, c = carry
            g = x_t @ wih.T + h @ whh.T + bih + bhh
            i, f, gg, o = jnp.split(g, 4, axis=-1)
            i, f, o = jax.nn.sigmoid(i), jax.nn.sigmoid(f), jax.nn.sigmoid(o)
            c = f * c + i * jnp.tanh(gg)
            h = o * jnp.tanh(c)
            return (h, c), h

        h0 = jnp.zeros((B, H), jnp.float32)
        c0 = jnp.zeros((B, H), jnp.float32)
        (_, _), hs = lax.scan(step, (h0, c0), jnp.transpose(seq, (1, 0, 2)))
        return jnp.transpose(hs, (1, 0, 2))       # (B, T, H)

    y1 = run_layer(x, wih1, whh1, bih1, bhh1)
    y2 = run_layer(y1, wih2, whh2, bih2, bhh2)
    return y2[:, -1, :] @ wfc.T + bfc


# ----------------------------------------------------------------------------
# Deterministic parameter init (PyTorch-default-style uniform bounds).
# ----------------------------------------------------------------------------
def init_params(key, input_size, hidden=64, n_out=3):
    ks = jax.random.split(key, 10)
    u = lambda k, shape, bound: jax.random.uniform(
        k, shape, jnp.float32, minval=-bound, maxval=bound)
    b = 1.0 / math.sqrt(float(hidden))
    wih1 = u(ks[0], (4 * hidden, input_size), b)
    whh1 = u(ks[1], (4 * hidden, hidden), b)
    bih1 = u(ks[2], (4 * hidden,), b)
    bhh1 = u(ks[3], (4 * hidden,), b)
    wih2 = u(ks[4], (4 * hidden, hidden), b)
    whh2 = u(ks[5], (4 * hidden, hidden), b)
    bih2 = u(ks[6], (4 * hidden,), b)
    bhh2 = u(ks[7], (4 * hidden,), b)
    wfc = u(ks[8], (n_out, hidden), b)
    bfc = u(ks[9], (n_out,), b)
    return (wih1, whh1, bih1, bhh1, wih2, whh2, bih2, bhh2, wfc, bfc)


if __name__ == "__main__":
    B, T, INPUT_SIZE = 2, 8, 5          # OHLCV -> 5 input features
    key = jax.random.PRNGKey(0)
    k_x, k_p = jax.random.split(key)
    x = jax.random.normal(k_x, (B, T, INPUT_SIZE), jnp.float32)
    params = init_params(k_p, INPUT_SIZE)
    packed = pack_params(params)        # one-time packing, outside the jit

    out = jax.block_until_ready(ohlcv_lstm_pallas(x, packed))
    ref = jax.block_until_ready(ohlcv_lstm_ref(x, params))

    assert out.shape == (B, 3), out.shape
    # Recurrent matmuls use bf16 operands (f32 accumulation / f32 state), so the
    # tolerance vs the pure-f32 reference is loosened accordingly.
    assert jnp.allclose(out, ref, rtol=2e-2, atol=2e-2), \
        f"max abs diff = {jnp.max(jnp.abs(out - ref))}"

    print("KERNEL_OK")
</pallas_src>

<mosaic_0001>
module attributes {stable_mosaic.version = 11 : i64} {
  func.func @ohlcv_lstm_kernel(%arg0: memref<16x5xf32, #tpu.memory_space<vmem>>, %arg1: memref<5x512xf32, #tpu.memory_space<vmem>>, %arg2: memref<128x512xbf16, #tpu.memory_space<vmem>>, %arg3: memref<1x512xf32, #tpu.memory_space<vmem>>, %arg4: memref<256x512xbf16, #tpu.memory_space<vmem>>, %arg5: memref<1x512xf32, #tpu.memory_space<vmem>>, %arg6: memref<128x128xf32, #tpu.memory_space<vmem>>, %arg7: memref<1x128xf32, #tpu.memory_space<vmem>>, %arg8: memref<2x128xf32, #tpu.memory_space<vmem>>) attributes {dimension_semantics = [], scalar_prefetch = 0 : i64, scratch_operands = 0 : i64, tpu.core_type = #tpu.core_type<tc>} {
    %c0 = arith.constant 0 : index
    %c0_0 = arith.constant 0 : index
    %0 = vector.load %arg0[%c0, %c0_0] : memref<16x5xf32, #tpu.memory_space<vmem>>, vector<16x5xf32>
    %c0_1 = arith.constant 0 : index
    %c0_2 = arith.constant 0 : index
    %1 = vector.load %arg1[%c0_1, %c0_2] : memref<5x512xf32, #tpu.memory_space<vmem>>, vector<5x512xf32>
    %cst = arith.constant dense<0.000000e+00> : vector<16x512xf32>
    %2 = tpu.matmul %0, %1, %cst {dimension_numbers = #tpu.dot_dimension_numbers<[1], [0], [0], [1], [0, 0, 1, 1], [], []>} : vector<16x5xf32>, vector<5x512xf32>, vector<16x512xf32> -> vector<16x512xf32>
    %c0_3 = arith.constant 0 : index
    %c0_4 = arith.constant 0 : index
    %3 = vector.load %arg3[%c0_3, %c0_4] : memref<1x512xf32, #tpu.memory_space<vmem>>, vector<1x512xf32>
    %4 = vector.broadcast %3 : vector<1x512xf32> to vector<16x512xf32>
    %5 = arith.addf %2, %4 : vector<16x512xf32>
    %cst_5 = arith.constant 0.000000e+00 : f32
    %6 = vector.broadcast %cst_5 : f32 to vector<2x128xf32>
    %cst_6 = arith.constant 0.000000e+00 : f32
    %7 = vector.broadcast %cst_6 : f32 to vector<2x128xf32>
    %cst_7 = arith.constant 0.000000e+00 : f32
    %8 = vector.broadcast %cst_7 : f32 to vector<2x128xf32>
    %cst_8 = arith.constant 0.000000e+00 : f32
    %9 = vector.broadcast %cst_8 : f32 to vector<2x128xf32>
    %10 = vector.extract_strided_slice %5 {offsets = [0, 0], sizes = [2, 512], strides = [1, 1]} : vector<16x512xf32> to vector<2x512xf32>
    %11 = arith.truncf %6 : vector<2x128xf32> to vector<2x128xbf16>
    %c0_9 = arith.constant 0 : index
    %c0_10 = arith.constant 0 : index
    %12 = vector.load %arg2[%c0_9, %c0_10] : memref<128x512xbf16, #tpu.memory_space<vmem>>, vector<128x512xbf16>
    %cst_11 = arith.constant dense<0.000000e+00> : vector<2x512xf32>
    %13 = tpu.matmul %11, %12, %cst_11 {dimension_numbers = #tpu.dot_dimension_numbers<[1], [0], [0], [1], [0, 0, 1, 1], [], []>} : vector<2x128xbf16>, vector<128x512xbf16>, vector<2x512xf32> -> vector<2x512xf32>
    %14 = arith.addf %10, %13 : vector<2x512xf32>
    %15 = vector.extract_strided_slice %14 {offsets = [0, 0], sizes = [2, 384], strides = [1, 1]} : vector<2x512xf32> to vector<2x384xf32>
    %16 = arith.negf %15 : vector<2x384xf32>
    %17 = math.exp %16 : vector<2x384xf32>
    %cst_12 = arith.constant 1.000000e+00 : f32
    %18 = vector.broadcast %cst_12 : f32 to vector<2x384xf32>
    %19 = arith.addf %18, %17 : vector<2x384xf32>
    %20 = arith.divf %18, %19 : vector<2x384xf32>
    %21 = vector.extract_strided_slice %14 {offsets = [0, 384], sizes = [2, 128], strides = [1, 1]} : vector<2x512xf32> to vector<2x128xf32>
    %22 = math.tanh %21 : vector<2x128xf32>
    %23 = vector.extract_strided_slice %20 {offsets = [0, 0], sizes = [2, 128], strides = [1, 1]} : vector<2x384xf32> to vector<2x128xf32>
    %24 = vector.extract_strided_slice %20 {offsets = [0, 128], sizes = [2, 128], strides = [1, 1]} : vector<2x384xf32> to vector<2x128xf32>
    %25 = vector.extract_strided_slice %20 {offsets = [0, 256], sizes = [2, 128], strides = [1, 1]} : vector<2x384xf32> to vector<2x128xf32>
    %26 = arith.mulf %24, %7 : vector<2x128xf32>
    %27 = arith.mulf %23, %22 : vector<2x128xf32>
    %28 = arith.addf %26, %27 : vector<2x128xf32>
    %29 = math.tanh %28 : vector<2x128xf32>
    %30 = arith.mulf %25, %29 : vector<2x128xf32>
    %31 = vector.extract_strided_slice %5 {offsets = [2, 0], sizes = [2, 512], strides = [1, 1]} : vector<16x512xf32> to vector<2x512xf32>
    %32 = arith.truncf %30 : vector<2x128xf32> to vector<2x128xbf16>
    %c0_13 = arith.constant 0 : index
    %c0_14 = arith.constant 0 : index
    %33 = vector.load %arg2[%c0_13, %c0_14] : memref<128x512xbf16, #tpu.memory_space<vmem>>, vector<128x512xbf16>
    %cst_15 = arith.constant dense<0.000000e+00> : vector<2x512xf32>
    %34 = tpu.matmul %32, %33, %cst_15 {dimension_numbers = #tpu.dot_dimension_numbers<[1], [0], [0], [1], [0, 0, 1, 1], [], []>} : vector<2x128xbf16>, vector<128x512xbf16>, vector<2x512xf32> -> vector<2x512xf32>
    %35 = arith.addf %31, %34 : vector<2x512xf32>
    %36 = vector.extract_strided_slice %35 {offsets = [0, 0], sizes = [2, 384], strides = [1, 1]} : vector<2x512xf32> to vector<2x384xf32>
    %37 = arith.negf %36 : vector<2x384xf32>
    %38 = math.exp %37 : vector<2x384xf32>
    %cst_16 = arith.constant 1.000000e+00 : f32
    %39 = vector.broadcast %cst_16 : f32 to vector<2x384xf32>
    %40 = arith.addf %39, %38 : vector<2x384xf32>
    %41 = arith.divf %39, %40 : vector<2x384xf32>
    %42 = vector.extract_strided_slice %35 {offsets = [0, 384], sizes = [2, 128], strides = [1, 1]} : vector<2x512xf32> to vector<2x128xf32>
    %43 = math.tanh %42 : vector<2x128xf32>
    %44 = vector.extract_strided_slice %41 {offsets = [0, 0], sizes = [2, 128], strides = [1, 1]} : vector<2x384xf32> to vector<2x128xf32>
    %45 = vector.extract_strided_slice %41 {offsets = [0, 128], sizes = [2, 128], strides = [1, 1]} : vector<2x384xf32> to vector<2x128xf32>
    %46 = vector.extract_strided_slice %41 {offsets = [0, 256], sizes = [2, 128], strides = [1, 1]} : vector<2x384xf32> to vector<2x128xf32>
    %47 = arith.mulf %45, %28 : vector<2x128xf32>
    %48 = arith.mulf %44, %43 : vector<2x128xf32>
    %49 = arith.addf %47, %48 : vector<2x128xf32>
    %50 = math.tanh %49 : vector<2x128xf32>
    %51 = arith.mulf %46, %50 : vector<2x128xf32>
    %52 = tpu.concatenate %30, %8 in 1 : vector<2x128xf32>, vector<2x128xf32> -> vector<2x256xf32>
    %53 = arith.truncf %52 : vector<2x256xf32> to vector<2x256xbf16>
    %c0_17 = arith.constant 0 : index
    %c0_18 = arith.constant 0 : index
    %54 = vector.load %arg4[%c0_17, %c0_18] : memref<256x512xbf16, #tpu.memory_space<vmem>>, vector<256x512xbf16>
    %cst_19 = arith.constant dense<0.000000e+00> : vector<2x512xf32>
    %55 = tpu.matmul %53, %54, %cst_19 {dimension_numbers = #tpu.dot_dimension_numbers<[1], [0], [0], [1], [0, 0, 1, 1], [], []>} : vector<2x256xbf16>, vector<256x512xbf16>, vector<2x512xf32> -> vector<2x512xf32>
    %c0_20 = arith.constant 0 : index
    %c0_21 = arith.constant 0 : index
    %56 = vector.load %arg5[%c0_20, %c0_21] : memref<1x512xf32, #tpu.memory_space<vmem>>, vector<1x512xf32>
    %57 = vector.broadcast %56 : vector<1x512xf32> to vector<2x512xf32>
    %58 = arith.addf %55, %57 : vector<2x512xf32>
    %59 = vector.extract_strided_slice %58 {offsets = [0, 0], sizes = [2, 384], strides = [1, 1]} : vector<2x512xf32> to vector<2x384xf32>
    %60 = arith.negf %59 : vector<2x384xf32>
    %61 = math.exp %60 : vector<2x384xf32>
    %cst_22 = arith.constant 1.000000e+00 : f32
    %62 = vector.broadcast %cst_22 : f32 to vector<2x384xf32>
    %63 = arith.addf %62, %61 : vector<2x384xf32>
    %64 = arith.divf %62, %63 : vector<2x384xf32>
    %65 = vector.extract_strided_slice %58 {offsets = [0, 384], sizes = [2, 128], strides = [1, 1]} : vector<2x512xf32> to vector<2x128xf32>
    %66 = math.tanh %65 : vector<2x128xf32>
    %67 = vector.extract_strided_slice %64 {offsets = [0, 0], sizes = [2, 128], strides = [1, 1]} : vector<2x384xf32> to vector<2x128xf32>
    %68 = vector.extract_strided_slice %64 {offsets = [0, 128], sizes = [2, 128], strides = [1, 1]} : vector<2x384xf32> to vector<2x128xf32>
    %69 = vector.extract_strided_slice %64 {offsets = [0, 256], sizes = [2, 128], strides = [1, 1]} : vector<2x384xf32> to vector<2x128xf32>
    %70 = arith.mulf %68, %9 : vector<2x128xf32>
    %71 = arith.mulf %67, %66 : vector<2x128xf32>
    %72 = arith.addf %70, %71 : vector<2x128xf32>
    %73 = math.tanh %72 : vector<2x128xf32>
    %74 = arith.mulf %69, %73 : vector<2x128xf32>
    %75 = vector.extract_strided_slice %5 {offsets = [4, 0], sizes = [2, 512], strides = [1, 1]} : vector<16x512xf32> to vector<2x512xf32>
    %76 = arith.truncf %51 : vector<2x128xf32> to vector<2x128xbf16>
    %c0_23 = arith.constant 0 : index
    %c0_24 = arith.constant 0 : index
    %77 = vector.load %arg2[%c0_23, %c0_24] : memref<128x512xbf16, #tpu.memory_space<vmem>>, vector<128x512xbf16>
    %cst_25 = arith.constant dense<0.000000e+00> : vector<2x512xf32>
    %78 = tpu.matmul %76, %77, %cst_25 {dimension_numbers = #tpu.dot_dimension_numbers<[1], [0], [0], [1], [0, 0, 1, 1], [], []>} : vector<2x128xbf16>, vector<128x512xbf16>, vector<2x512xf32> -> vector<2x512xf32>
    %79 = arith.addf %75, %78 : vector<2x512xf32>
    %80 = vector.extract_strided_slice %79 {offsets = [0, 0], sizes = [2, 384], strides = [1, 1]} : vector<2x512xf32> to vector<2x384xf32>
    %81 = arith.negf %80 : vector<2x384xf32>
    %82 = math.exp %81 : vector<2x384xf32>
    %cst_26 = arith.constant 1.000000e+00 : f32
    %83 = vector.broadcast %cst_26 : f32 to vector<2x384xf32>
    %84 = arith.addf %83, %82 : vector<2x384xf32>
    %85 = arith.divf %83, %84 : vector<2x384xf32>
    %86 = vector.extract_strided_slice %79 {offsets = [0, 384], sizes = [2, 128], strides = [1, 1]} : vector<2x512xf32> to vector<2x128xf32>
    %87 = math.tanh %86 : vector<2x128xf32>
    %88 = vector.extract_strided_slice %85 {offsets = [0, 0], sizes = [2, 128], strides = [1, 1]} : vector<2x384xf32> to vector<2x128xf32>
    %89 = vector.extract_strided_slice %85 {offsets = [0, 128], sizes = [2, 128], strides = [1, 1]} : vector<2x384xf32> to vector<2x128xf32>
    %90 = vector.extract_strided_slice %85 {offsets = [0, 256], sizes = [2, 128], strides = [1, 1]} : vector<2x384xf32> to vector<2x128xf32>
    %91 = arith.mulf %89, %49 : vector<2x128xf32>
    %92 = arith.mulf %88, %87 : vector<2x128xf32>
    %93 = arith.addf %91, %92 : vector<2x128xf32>
    %94 = math.tanh %93 : vector<2x128xf32>
    %95 = arith.mulf %90, %94 : vector<2x128xf32>
    %96 = tpu.concatenate %51, %74 in 1 : vector<2x128xf32>, vector<2x128xf32> -> vector<2x256xf32>
    %97 = arith.truncf %96 : vector<2x256xf32> to vector<2x256xbf16>
    %c0_27 = arith.constant 0 : index
    %c0_28 = arith.constant 0 : index
    %98 = vector.load %arg4[%c0_27, %c0_28] : memref<256x512xbf16, #tpu.memory_space<vmem>>, vector<256x512xbf16>
    %cst_29 = arith.constant dense<0.000000e+00> : vector<2x512xf32>
    %99 = tpu.matmul %97, %98, %cst_29 {dimension_numbers = #tpu.dot_dimension_numbers<[1], [0], [0], [1], [0, 0, 1, 1], [], []>} : vector<2x256xbf16>, vector<256x512xbf16>, vector<2x512xf32> -> vector<2x512xf32>
    %c0_30 = arith.constant 0 : index
    %c0_31 = arith.constant 0 : index
    %100 = vector.load %arg5[%c0_30, %c0_31] : memref<1x512xf32, #tpu.memory_space<vmem>>, vector<1x512xf32>
    %101 = vector.broadcast %100 : vector<1x512xf32> to vector<2x512xf32>
    %102 = arith.addf %99, %101 : vector<2x512xf32>
    %103 = vector.extract_strided_slice %102 {offsets = [0, 0], sizes = [2, 384], strides = [1, 1]} : vector<2x512xf32> to vector<2x384xf32>
    %104 = arith.negf %103 : vector<2x384xf32>
    %105 = math.exp %104 : vector<2x384xf32>
    %cst_32 = arith.constant 1.000000e+00 : f32
    %106 = vector.broadcast %cst_32 : f32 to vector<2x384xf32>
    %107 = arith.addf %106, %105 : vector<2x384xf32>
    %108 = arith.divf %106, %107 : vector<2x384xf32>
    %109 = vector.extract_strided_slice %102 {offsets = [0, 384], sizes = [2, 128], strides = [1, 1]} : vector<2x512xf32> to vector<2x128xf32>
    %110 = math.tanh %109 : vector<2x128xf32>
    %111 = vector.extract_strided_slice %108 {offsets = [0, 0], sizes = [2, 128], strides = [1, 1]} : vector<2x384xf32> to vector<2x128xf32>
    %112 = vector.extract_strided_slice %108 {offsets = [0, 128], sizes = [2, 128], strides = [1, 1]} : vector<2x384xf32> to vector<2x128xf32>
    %113 = vector.extract_strided_slice %108 {offsets = [0, 256], sizes = [2, 128], strides = [1, 1]} : vector<2x384xf32> to vector<2x128xf32>
    %114 = arith.mulf %112, %72 : vector<2x128xf32>
    %115 = arith.mulf %111, %110 : vector<2x128xf32>
    %116 = arith.addf %114, %115 : vector<2x128xf32>
    %117 = math.tanh %116 : vector<2x128xf32>
    %118 = arith.mulf %113, %117 : vector<2x128xf32>
    %119 = vector.extract_strided_slice %5 {offsets = [6, 0], sizes = [2, 512], strides = [1, 1]} : vector<16x512xf32> to vector<2x512xf32>
    %120 = arith.truncf %95 : vector<2x128xf32> to vector<2x128xbf16>
    %c0_33 = arith.constant 0 : index
    %c0_34 = arith.constant 0 : index
    %121 = vector.load %arg2[%c0_33, %c0_34] : memref<128x512xbf16, #tpu.memory_space<vmem>>, vector<128x512xbf16>
    %cst_35 = arith.constant dense<0.000000e+00> : vector<2x512xf32>
    %122 = tpu.matmul %120, %121, %cst_35 {dimension_numbers = #tpu.dot_dimension_numbers<[1], [0], [0], [1], [0, 0, 1, 1], [], []>} : vector<2x128xbf16>, vector<128x512xbf16>, vector<2x512xf32> -> vector<2x512xf32>
    %123 = arith.addf %119, %122 : vector<2x512xf32>
    %124 = vector.extract_strided_slice %123 {offsets = [0, 0], sizes = [2, 384], strides = [1, 1]} : vector<2x512xf32> to vector<2x384xf32>
    %125 = arith.negf %124 : vector<2x384xf32>
    %126 = math.exp %125 : vector<2x384xf32>
    %cst_36 = arith.constant 1.000000e+00 : f32
    %127 = vector.broadcast %cst_36 : f32 to vector<2x384xf32>
    %128 = arith.addf %127, %126 : vector<2x384xf32>
    %129 = arith.divf %127, %128 : vector<2x384xf32>
    %130 = vector.extract_strided_slice %123 {offsets = [0, 384], sizes = [2, 128], strides = [1, 1]} : vector<2x512xf32> to vector<2x128xf32>
    %131 = math.tanh %130 : vector<2x128xf32>
    %132 = vector.extract_strided_slice %129 {offsets = [0, 0], sizes = [2, 128], strides = [1, 1]} : vector<2x384xf32> to vector<2x128xf32>
    %133 = vector.extract_strided_slice %129 {offsets = [0, 128], sizes = [2, 128], strides = [1, 1]} : vector<2x384xf32> to vector<2x128xf32>
    %134 = vector.extract_strided_slice %129 {offsets = [0, 256], sizes = [2, 128], strides = [1, 1]} : vector<2x384xf32> to vector<2x128xf32>
    %135 = arith.mulf %133, %93 : vector<2x128xf32>
    %136 = arith.mulf %132, %131 : vector<2x128xf32>
    %137 = arith.addf %135, %136 : vector<2x128xf32>
    %138 = math.tanh %137 : vector<2x128xf32>
    %139 = arith.mulf %134, %138 : vector<2x128xf32>
    %140 = tpu.concatenate %95, %118 in 1 : vector<2x128xf32>, vector<2x128xf32> -> vector<2x256xf32>
    %141 = arith.truncf %140 : vector<2x256xf32> to vector<2x256xbf16>
    %c0_37 = arith.constant 0 : index
    %c0_38 = arith.constant 0 : index
    %142 = vector.load %arg4[%c0_37, %c0_38] : memref<256x512xbf16, #tpu.memory_space<vmem>>, vector<256x512xbf16>
    %cst_39 = arith.constant dense<0.000000e+00> : vector<2x512xf32>
    %143 = tpu.matmul %141, %142, %cst_39 {dimension_numbers = #tpu.dot_dimension_numbers<[1], [0], [0], [1], [0, 0, 1, 1], [], []>} : vector<2x256xbf16>, vector<256x512xbf16>, vector<2x512xf32> -> vector<2x512xf32>
    %c0_40 = arith.constant 0 : index
    %c0_41 = arith.constant 0 : index
    %144 = vector.load %arg5[%c0_40, %c0_41] : memref<1x512xf32, #tpu.memory_space<vmem>>, vector<1x512xf32>
    %145 = vector.broadcast %144 : vector<1x512xf32> to vector<2x512xf32>
    %146 = arith.addf %143, %145 : vector<2x512xf32>
    %147 = vector.extract_strided_slice %146 {offsets = [0, 0], sizes = [2, 384], strides = [1, 1]} : vector<2x512xf32> to vector<2x384xf32>
    %148 = arith.negf %147 : vector<2x384xf32>
    %149 = math.exp %148 : vector<2x384xf32>
    %cst_42 = arith.constant 1.000000e+00 : f32
    %150 = vector.broadcast %cst_42 : f32 to vector<2x384xf32>
    %151 = arith.addf %150, %149 : vector<2x384xf32>
    %152 = arith.divf %150, %151 : vector<2x384xf32>
    %153 = vector.extract_strided_slice %146 {offsets = [0, 384], sizes = [2, 128], strides = [1, 1]} : vector<2x512xf32> to vector<2x128xf32>
    %154 = math.tanh %153 : vector<2x128xf32>
    %155 = vector.extract_strided_slice %152 {offsets = [0, 0], sizes = [2, 128], strides = [1, 1]} : vector<2x384xf32> to vector<2x128xf32>
    %156 = vector.extract_strided_slice %152 {offsets = [0, 128], sizes = [2, 128], strides = [1, 1]} : vector<2x384xf32> to vector<2x128xf32>
    %157 = vector.extract_strided_slice %152 {offsets = [0, 256], sizes = [2, 128], strides = [1, 1]} : vector<2x384xf32> to vector<2x128xf32>
    %158 = arith.mulf %156, %116 : vector<2x128xf32>
    %159 = arith.mulf %155, %154 : vector<2x128xf32>
    %160 = arith.addf %158, %159 : vector<2x128xf32>
    %161 = math.tanh %160 : vector<2x128xf32>
    %162 = arith.mulf %157, %161 : vector<2x128xf32>
    %163 = vector.extract_strided_slice %5 {offsets = [8, 0], sizes = [2, 512], strides = [1, 1]} : vector<16x512xf32> to vector<2x512xf32>
    %164 = arith.truncf %139 : vector<2x128xf32> to vector<2x128xbf16>
    %c0_43 = arith.constant 0 : index
    %c0_44 = arith.constant 0 : index
    %165 = vector.load %arg2[%c0_43, %c0_44] : memref<128x512xbf16, #tpu.memory_space<vmem>>, vector<128x512xbf16>
    %cst_45 = arith.constant dense<0.000000e+00> : vector<2x512xf32>
    %166 = tpu.matmul %164, %165, %cst_45 {dimension_numbers = #tpu.dot_dimension_numbers<[1], [0], [0], [1], [0, 0, 1, 1], [], []>} : vector<2x128xbf16>, vector<128x512xbf16>, vector<2x512xf32> -> vector<2x512xf32>
    %167 = arith.addf %163, %166 : vector<2x512xf32>
    %168 = vector.extract_strided_slice %167 {offsets = [0, 0], sizes = [2, 384], strides = [1, 1]} : vector<2x512xf32> to vector<2x384xf32>
    %169 = arith.negf %168 : vector<2x384xf32>
    %170 = math.exp %169 : vector<2x384xf32>
    %cst_46 = arith.constant 1.000000e+00 : f32
    %171 = vector.broadcast %cst_46 : f32 to vector<2x384xf32>
    %172 = arith.addf %171, %170 : vector<2x384xf32>
    %173 = arith.divf %171, %172 : vector<2x384xf32>
    %174 = vector.extract_strided_slice %167 {offsets = [0, 384], sizes = [2, 128], strides = [1, 1]} : vector<2x512xf32> to vector<2x128xf32>
    %175 = math.tanh %174 : vector<2x128xf32>
    %176 = vector.extract_strided_slice %173 {offsets = [0, 0], sizes = [2, 128], strides = [1, 1]} : vector<2x384xf32> to vector<2x128xf32>
    %177 = vector.extract_strided_slice %173 {offsets = [0, 128], sizes = [2, 128], strides = [1, 1]} : vector<2x384xf32> to vector<2x128xf32>
    %178 = vector.extract_strided_slice %173 {offsets = [0, 256], sizes = [2, 128], strides = [1, 1]} : vector<2x384xf32> to vector<2x128xf32>
    %179 = arith.mulf %177, %137 : vector<2x128xf32>
    %180 = arith.mulf %176, %175 : vector<2x128xf32>
    %181 = arith.addf %179, %180 : vector<2x128xf32>
    %182 = math.tanh %181 : vector<2x128xf32>
    %183 = arith.mulf %178, %182 : vector<2x128xf32>
    %184 = tpu.concatenate %139, %162 in 1 : vector<2x128xf32>, vector<2x128xf32> -> vector<2x256xf32>
    %185 = arith.truncf %184 : vector<2x256xf32> to vector<2x256xbf16>
    %c0_47 = arith.constant 0 : index
    %c0_48 = arith.constant 0 : index
    %186 = vector.load %arg4[%c0_47, %c0_48] : memref<256x512xbf16, #tpu.memory_space<vmem>>, vector<256x512xbf16>
    %cst_49 = arith.constant dense<0.000000e+00> : vector<2x512xf32>
    %187 = tpu.matmul %185, %186, %cst_49 {dimension_numbers = #tpu.dot_dimension_numbers<[1], [0], [0], [1], [0, 0, 1, 1], [], []>} : vector<2x256xbf16>, vector<256x512xbf16>, vector<2x512xf32> -> vector<2x512xf32>
    %c0_50 = arith.constant 0 : index
    %c0_51 = arith.constant 0 : index
    %188 = vector.load %arg5[%c0_50, %c0_51] : memref<1x512xf32, #tpu.memory_space<vmem>>, vector<1x512xf32>
    %189 = vector.broadcast %188 : vector<1x512xf32> to vector<2x512xf32>
    %190 = arith.addf %187, %189 : vector<2x512xf32>
    %191 = vector.extract_strided_slice %190 {offsets = [0, 0], sizes = [2, 384], strides = [1, 1]} : vector<2x512xf32> to vector<2x384xf32>
    %192 = arith.negf %191 : vector<2x384xf32>
    %193 = math.exp %192 : vector<2x384xf32>
    %cst_52 = arith.constant 1.000000e+00 : f32
    %194 = vector.broadcast %cst_52 : f32 to vector<2x384xf32>
    %195 = arith.addf %194, %193 : vector<2x384xf32>
    %196 = arith.divf %194, %195 : vector<2x384xf32>
    %197 = vector.extract_strided_slice %190 {offsets = [0, 384], sizes = [2, 128], strides = [1, 1]} : vector<2x512xf32> to vector<2x128xf32>
    %198 = math.tanh %197 : vector<2x128xf32>
    %199 = vector.extract_strided_slice %196 {offsets = [0, 0], sizes = [2, 128], strides = [1, 1]} : vector<2x384xf32> to vector<2x128xf32>
    %200 = vector.extract_strided_slice %196 {offsets = [0, 128], sizes = [2, 128], strides = [1, 1]} : vector<2x384xf32> to vector<2x128xf32>
    %201 = vector.extract_strided_slice %196 {offsets = [0, 256], sizes = [2, 128], strides = [1, 1]} : vector<2x384xf32> to vector<2x128xf32>
    %202 = arith.mulf %200, %160 : vector<2x128xf32>
    %203 = arith.mulf %199, %198 : vector<2x128xf32>
    %204 = arith.addf %202, %203 : vector<2x128xf32>
    %205 = math.tanh %204 : vector<2x128xf32>
    %206 = arith.mulf %201, %205 : vector<2x128xf32>
    %207 = vector.extract_strided_slice %5 {offsets = [10, 0], sizes = [2, 512], strides = [1, 1]} : vector<16x512xf32> to vector<2x512xf32>
    %208 = arith.truncf %183 : vector<2x128xf32> to vector<2x128xbf16>
    %c0_53 = arith.constant 0 : index
    %c0_54 = arith.constant 0 : index
    %209 = vector.load %arg2[%c0_53, %c0_54] : memref<128x512xbf16, #tpu.memory_space<vmem>>, vector<128x512xbf16>
    %cst_55 = arith.constant dense<0.000000e+00> : vector<2x512xf32>
    %210 = tpu.matmul %208, %209, %cst_55 {dimension_numbers = #tpu.dot_dimension_numbers<[1], [0], [0], [1], [0, 0, 1, 1], [], []>} : vector<2x128xbf16>, vector<128x512xbf16>, vector<2x512xf32> -> vector<2x512xf32>
    %211 = arith.addf %207, %210 : vector<2x512xf32>
    %212 = vector.extract_strided_slice %211 {offsets = [0, 0], sizes = [2, 384], strides = [1, 1]} : vector<2x512xf32> to vector<2x384xf32>
    %213 = arith.negf %212 : vector<2x384xf32>
    %214 = math.exp %213 : vector<2x384xf32>
    %cst_56 = arith.constant 1.000000e+00 : f32
    %215 = vector.broadcast %cst_56 : f32 to vector<2x384xf32>
    %216 = arith.addf %215, %214 : vector<2x384xf32>
    %217 = arith.divf %215, %216 : vector<2x384xf32>
    %218 = vector.extract_strided_slice %211 {offsets = [0, 384], sizes = [2, 128], strides = [1, 1]} : vector<2x512xf32> to vector<2x128xf32>
    %219 = math.tanh %218 : vector<2x128xf32>
    %220 = vector.extract_strided_slice %217 {offsets = [0, 0], sizes = [2, 128], strides = [1, 1]} : vector<2x384xf32> to vector<2x128xf32>
    %221 = vector.extract_strided_slice %217 {offsets = [0, 128], sizes = [2, 128], strides = [1, 1]} : vector<2x384xf32> to vector<2x128xf32>
    %222 = vector.extract_strided_slice %217 {offsets = [0, 256], sizes = [2, 128], strides = [1, 1]} : vector<2x384xf32> to vector<2x128xf32>
    %223 = arith.mulf %221, %181 : vector<2x128xf32>
    %224 = arith.mulf %220, %219 : vector<2x128xf32>
    %225 = arith.addf %223, %224 : vector<2x128xf32>
    %226 = math.tanh %225 : vector<2x128xf32>
    %227 = arith.mulf %222, %226 : vector<2x128xf32>
    %228 = tpu.concatenate %183, %206 in 1 : vector<2x128xf32>, vector<2x128xf32> -> vector<2x256xf32>
    %229 = arith.truncf %228 : vector<2x256xf32> to vector<2x256xbf16>
    %c0_57 = arith.constant 0 : index
    %c0_58 = arith.constant 0 : index
    %230 = vector.load %arg4[%c0_57, %c0_58] : memref<256x512xbf16, #tpu.memory_space<vmem>>, vector<256x512xbf16>
    %cst_59 = arith.constant dense<0.000000e+00> : vector<2x512xf32>
    %231 = tpu.matmul %229, %230, %cst_59 {dimension_numbers = #tpu.dot_dimension_numbers<[1], [0], [0], [1], [0, 0, 1, 1], [], []>} : vector<2x256xbf16>, vector<256x512xbf16>, vector<2x512xf32> -> vector<2x512xf32>
    %c0_60 = arith.constant 0 : index
    %c0_61 = arith.constant 0 : index
    %232 = vector.load %arg5[%c0_60, %c0_61] : memref<1x512xf32, #tpu.memory_space<vmem>>, vector<1x512xf32>
    %233 = vector.broadcast %232 : vector<1x512xf32> to vector<2x512xf32>
    %234 = arith.addf %231, %233 : vector<2x512xf32>
    %235 = vector.extract_strided_slice %234 {offsets = [0, 0], sizes = [2, 384], strides = [1, 1]} : vector<2x512xf32> to vector<2x384xf32>
    %236 = arith.negf %235 : vector<2x384xf32>
    %237 = math.exp %236 : vector<2x384xf32>
    %cst_62 = arith.constant 1.000000e+00 : f32
    %238 = vector.broadcast %cst_62 : f32 to vector<2x384xf32>
    %239 = arith.addf %238, %237 : vector<2x384xf32>
    %240 = arith.divf %238, %239 : vector<2x384xf32>
    %241 = vector.extract_strided_slice %234 {offsets = [0, 384], sizes = [2, 128], strides = [1, 1]} : vector<2x512xf32> to vector<2x128xf32>
    %242 = math.tanh %241 : vector<2x128xf32>
    %243 = vector.extract_strided_slice %240 {offsets = [0, 0], sizes = [2, 128], strides = [1, 1]} : vector<2x384xf32> to vector<2x128xf32>
    %244 = vector.extract_strided_slice %240 {offsets = [0, 128], sizes = [2, 128], strides = [1, 1]} : vector<2x384xf32> to vector<2x128xf32>
    %245 = vector.extract_strided_slice %240 {offsets = [0, 256], sizes = [2, 128], strides = [1, 1]} : vector<2x384xf32> to vector<2x128xf32>
    %246 = arith.mulf %244, %204 : vector<2x128xf32>
    %247 = arith.mulf %243, %242 : vector<2x128xf32>
    %248 = arith.addf %246, %247 : vector<2x128xf32>
    %249 = math.tanh %248 : vector<2x128xf32>
    %250 = arith.mulf %245, %249 : vector<2x128xf32>
    %251 = vector.extract_strided_slice %5 {offsets = [12, 0], sizes = [2, 512], strides = [1, 1]} : vector<16x512xf32> to vector<2x512xf32>
    %252 = arith.truncf %227 : vector<2x128xf32> to vector<2x128xbf16>
    %c0_63 = arith.constant 0 : index
    %c0_64 = arith.constant 0 : index
    %253 = vector.load %arg2[%c0_63, %c0_64] : memref<128x512xbf16, #tpu.memory_space<vmem>>, vector<128x512xbf16>
    %cst_65 = arith.constant dense<0.000000e+00> : vector<2x512xf32>
    %254 = tpu.matmul %252, %253, %cst_65 {dimension_numbers = #tpu.dot_dimension_numbers<[1], [0], [0], [1], [0, 0, 1, 1], [], []>} : vector<2x128xbf16>, vector<128x512xbf16>, vector<2x512xf32> -> vector<2x512xf32>
    %255 = arith.addf %251, %254 : vector<2x512xf32>
    %256 = vector.extract_strided_slice %255 {offsets = [0, 0], sizes = [2, 384], strides = [1, 1]} : vector<2x512xf32> to vector<2x384xf32>
    %257 = arith.negf %256 : vector<2x384xf32>
    %258 = math.exp %257 : vector<2x384xf32>
    %cst_66 = arith.constant 1.000000e+00 : f32
    %259 = vector.broadcast %cst_66 : f32 to vector<2x384xf32>
    %260 = arith.addf %259, %258 : vector<2x384xf32>
    %261 = arith.divf %259, %260 : vector<2x384xf32>
    %262 = vector.extract_strided_slice %255 {offsets = [0, 384], sizes = [2, 128], strides = [1, 1]} : vector<2x512xf32> to vector<2x128xf32>
    %263 = math.tanh %262 : vector<2x128xf32>
    %264 = vector.extract_strided_slice %261 {offsets = [0, 0], sizes = [2, 128], strides = [1, 1]} : vector<2x384xf32> to vector<2x128xf32>
    %265 = vector.extract_strided_slice %261 {offsets = [0, 128], sizes = [2, 128], strides = [1, 1]} : vector<2x384xf32> to vector<2x128xf32>
    %266 = vector.extract_strided_slice %261 {offsets = [0, 256], sizes = [2, 128], strides = [1, 1]} : vector<2x384xf32> to vector<2x128xf32>
    %267 = arith.mulf %265, %225 : vector<2x128xf32>
    %268 = arith.mulf %264, %263 : vector<2x128xf32>
    %269 = arith.addf %267, %268 : vector<2x128xf32>
    %270 = math.tanh %269 : vector<2x128xf32>
    %271 = arith.mulf %266, %270 : vector<2x128xf32>
    %272 = tpu.concatenate %227, %250 in 1 : vector<2x128xf32>, vector<2x128xf32> -> vector<2x256xf32>
    %273 = arith.truncf %272 : vector<2x256xf32> to vector<2x256xbf16>
    %c0_67 = arith.constant 0 : index
    %c0_68 = arith.constant 0 : index
    %274 = vector.load %arg4[%c0_67, %c0_68] : memref<256x512xbf16, #tpu.memory_space<vmem>>, vector<256x512xbf16>
    %cst_69 = arith.constant dense<0.000000e+00> : vector<2x512xf32>
    %275 = tpu.matmul %273, %274, %cst_69 {dimension_numbers = #tpu.dot_dimension_numbers<[1], [0], [0], [1], [0, 0, 1, 1], [], []>} : vector<2x256xbf16>, vector<256x512xbf16>, vector<2x512xf32> -> vector<2x512xf32>
    %c0_70 = arith.constant 0 : index
    %c0_71 = arith.constant 0 : index
    %276 = vector.load %arg5[%c0_70, %c0_71] : memref<1x512xf32, #tpu.memory_space<vmem>>, vector<1x512xf32>
    %277 = vector.broadcast %276 : vector<1x512xf32> to vector<2x512xf32>
    %278 = arith.addf %275, %277 : vector<2x512xf32>
    %279 = vector.extract_strided_slice %278 {offsets = [0, 0], sizes = [2, 384], strides = [1, 1]} : vector<2x512xf32> to vector<2x384xf32>
    %280 = arith.negf %279 : vector<2x384xf32>
    %281 = math.exp %280 : vector<2x384xf32>
    %cst_72 = arith.constant 1.000000e+00 : f32
    %282 = vector.broadcast %cst_72 : f32 to vector<2x384xf32>
    %283 = arith.addf %282, %281 : vector<2x384xf32>
    %284 = arith.divf %282, %283 : vector<2x384xf32>
    %285 = vector.extract_strided_slice %278 {offsets = [0, 384], sizes = [2, 128], strides = [1, 1]} : vector<2x512xf32> to vector<2x128xf32>
    %286 = math.tanh %285 : vector<2x128xf32>
    %287 = vector.extract_strided_slice %284 {offsets = [0, 0], sizes = [2, 128], strides = [1, 1]} : vector<2x384xf32> to vector<2x128xf32>
    %288 = vector.extract_strided_slice %284 {offsets = [0, 128], sizes = [2, 128], strides = [1, 1]} : vector<2x384xf32> to vector<2x128xf32>
    %289 = vector.extract_strided_slice %284 {offsets = [0, 256], sizes = [2, 128], strides = [1, 1]} : vector<2x384xf32> to vector<2x128xf32>
    %290 = arith.mulf %288, %248 : vector<2x128xf32>
    %291 = arith.mulf %287, %286 : vector<2x128xf32>
    %292 = arith.addf %290, %291 : vector<2x128xf32>
    %293 = math.tanh %292 : vector<2x128xf32>
    %294 = arith.mulf %289, %293 : vector<2x128xf32>
    %295 = vector.extract_strided_slice %5 {offsets = [14, 0], sizes = [2, 512], strides = [1, 1]} : vector<16x512xf32> to vector<2x512xf32>
    %296 = arith.truncf %271 : vector<2x128xf32> to vector<2x128xbf16>
    %c0_73 = arith.constant 0 : index
    %c0_74 = arith.constant 0 : index
    %297 = vector.load %arg2[%c0_73, %c0_74] : memref<128x512xbf16, #tpu.memory_space<vmem>>, vector<128x512xbf16>
    %cst_75 = arith.constant dense<0.000000e+00> : vector<2x512xf32>
    %298 = tpu.matmul %296, %297, %cst_75 {dimension_numbers = #tpu.dot_dimension_numbers<[1], [0], [0], [1], [0, 0, 1, 1], [], []>} : vector<2x128xbf16>, vector<128x512xbf16>, vector<2x512xf32> -> vector<2x512xf32>
    %299 = arith.addf %295, %298 : vector<2x512xf32>
    %300 = vector.extract_strided_slice %299 {offsets = [0, 0], sizes = [2, 384], strides = [1, 1]} : vector<2x512xf32> to vector<2x384xf32>
    %301 = arith.negf %300 : vector<2x384xf32>
    %302 = math.exp %301 : vector<2x384xf32>
    %cst_76 = arith.constant 1.000000e+00 : f32
    %303 = vector.broadcast %cst_76 : f32 to vector<2x384xf32>
    %304 = arith.addf %303, %302 : vector<2x384xf32>
    %305 = arith.divf %303, %304 : vector<2x384xf32>
    %306 = vector.extract_strided_slice %299 {offsets = [0, 384], sizes = [2, 128], strides = [1, 1]} : vector<2x512xf32> to vector<2x128xf32>
    %307 = math.tanh %306 : vector<2x128xf32>
    %308 = vector.extract_strided_slice %305 {offsets = [0, 0], sizes = [2, 128], strides = [1, 1]} : vector<2x384xf32> to vector<2x128xf32>
    %309 = vector.extract_strided_slice %305 {offsets = [0, 128], sizes = [2, 128], strides = [1, 1]} : vector<2x384xf32> to vector<2x128xf32>
    %310 = vector.extract_strided_slice %305 {offsets = [0, 256], sizes = [2, 128], strides = [1, 1]} : vector<2x384xf32> to vector<2x128xf32>
    %311 = arith.mulf %309, %269 : vector<2x128xf32>
    %312 = arith.mulf %308, %307 : vector<2x128xf32>
    %313 = arith.addf %311, %312 : vector<2x128xf32>
    %314 = math.tanh %313 : vector<2x128xf32>
    %315 = arith.mulf %310, %314 : vector<2x128xf32>
    %316 = tpu.concatenate %271, %294 in 1 : vector<2x128xf32>, vector<2x128xf32> -> vector<2x256xf32>
    %317 = arith.truncf %316 : vector<2x256xf32> to vector<2x256xbf16>
    %c0_77 = arith.constant 0 : index
    %c0_78 = arith.constant 0 : index
    %318 = vector.load %arg4[%c0_77, %c0_78] : memref<256x512xbf16, #tpu.memory_space<vmem>>, vector<256x512xbf16>
    %cst_79 = arith.constant dense<0.000000e+00> : vector<2x512xf32>
    %319 = tpu.matmul %317, %318, %cst_79 {dimension_numbers = #tpu.dot_dimension_numbers<[1], [0], [0], [1], [0, 0, 1, 1], [], []>} : vector<2x256xbf16>, vector<256x512xbf16>, vector<2x512xf32> -> vector<2x512xf32>
    %c0_80 = arith.constant 0 : index
    %c0_81 = arith.constant 0 : index
    %320 = vector.load %arg5[%c0_80, %c0_81] : memref<1x512xf32, #tpu.memory_space<vmem>>, vector<1x512xf32>
    %321 = vector.broadcast %320 : vector<1x512xf32> to vector<2x512xf32>
    %322 = arith.addf %319, %321 : vector<2x512xf32>
    %323 = vector.extract_strided_slice %322 {offsets = [0, 0], sizes = [2, 384], strides = [1, 1]} : vector<2x512xf32> to vector<2x384xf32>
    %324 = arith.negf %323 : vector<2x384xf32>
    %325 = math.exp %324 : vector<2x384xf32>
    %cst_82 = arith.constant 1.000000e+00 : f32
    %326 = vector.broadcast %cst_82 : f32 to vector<2x384xf32>
    %327 = arith.addf %326, %325 : vector<2x384xf32>
    %328 = arith.divf %326, %327 : vector<2x384xf32>
    %329 = vector.extract_strided_slice %322 {offsets = [0, 384], sizes = [2, 128], strides = [1, 1]} : vector<2x512xf32> to vector<2x128xf32>
    %330 = math.tanh %329 : vector<2x128xf32>
    %331 = vector.extract_strided_slice %328 {offsets = [0, 0], sizes = [2, 128], strides = [1, 1]} : vector<2x384xf32> to vector<2x128xf32>
    %332 = vector.extract_strided_slice %328 {offsets = [0, 128], sizes = [2, 128], strides = [1, 1]} : vector<2x384xf32> to vector<2x128xf32>
    %333 = vector.extract_strided_slice %328 {offsets = [0, 256], sizes = [2, 128], strides = [1, 1]} : vector<2x384xf32> to vector<2x128xf32>
    %334 = arith.mulf %332, %292 : vector<2x128xf32>
    %335 = arith.mulf %331, %330 : vector<2x128xf32>
    %336 = arith.addf %334, %335 : vector<2x128xf32>
    %337 = math.tanh %336 : vector<2x128xf32>
    %338 = arith.mulf %333, %337 : vector<2x128xf32>
    %339 = tpu.concatenate %315, %338 in 1 : vector<2x128xf32>, vector<2x128xf32> -> vector<2x256xf32>
    %340 = arith.truncf %339 : vector<2x256xf32> to vector<2x256xbf16>
    %c0_83 = arith.constant 0 : index
    %c0_84 = arith.constant 0 : index
    %341 = vector.load %arg4[%c0_83, %c0_84] : memref<256x512xbf16, #tpu.memory_space<vmem>>, vector<256x512xbf16>
    %cst_85 = arith.constant dense<0.000000e+00> : vector<2x512xf32>
    %342 = tpu.matmul %340, %341, %cst_85 {dimension_numbers = #tpu.dot_dimension_numbers<[1], [0], [0], [1], [0, 0, 1, 1], [], []>} : vector<2x256xbf16>, vector<256x512xbf16>, vector<2x512xf32> -> vector<2x512xf32>
    %c0_86 = arith.constant 0 : index
    %c0_87 = arith.constant 0 : index
    %343 = vector.load %arg5[%c0_86, %c0_87] : memref<1x512xf32, #tpu.memory_space<vmem>>, vector<1x512xf32>
    %344 = vector.broadcast %343 : vector<1x512xf32> to vector<2x512xf32>
    %345 = arith.addf %342, %344 : vector<2x512xf32>
    %346 = vector.extract_strided_slice %345 {offsets = [0, 0], sizes = [2, 384], strides = [1, 1]} : vector<2x512xf32> to vector<2x384xf32>
    %347 = arith.negf %346 : vector<2x384xf32>
    %348 = math.exp %347 : vector<2x384xf32>
    %cst_88 = arith.constant 1.000000e+00 : f32
    %349 = vector.broadcast %cst_88 : f32 to vector<2x384xf32>
    %350 = arith.addf %349, %348 : vector<2x384xf32>
    %351 = arith.divf %349, %350 : vector<2x384xf32>
    %352 = vector.extract_strided_slice %345 {offsets = [0, 384], sizes = [2, 128], strides = [1, 1]} : vector<2x512xf32> to vector<2x128xf32>
    %353 = math.tanh %352 : vector<2x128xf32>
    %354 = vector.extract_strided_slice %351 {offsets = [0, 0], sizes = [2, 128], strides = [1, 1]} : vector<2x384xf32> to vector<2x128xf32>
    %355 = vector.extract_strided_slice %351 {offsets = [0, 128], sizes = [2, 128], strides = [1, 1]} : vector<2x384xf32> to vector<2x128xf32>
    %356 = vector.extract_strided_slice %351 {offsets = [0, 256], sizes = [2, 128], strides = [1, 1]} : vector<2x384xf32> to vector<2x128xf32>
    %357 = arith.mulf %355, %336 : vector<2x128xf32>
    %358 = arith.mulf %354, %353 : vector<2x128xf32>
    %359 = arith.addf %357, %358 : vector<2x128xf32>
    %360 = math.tanh %359 : vector<2x128xf32>
    %361 = arith.mulf %356, %360 : vector<2x128xf32>
    %c0_89 = arith.constant 0 : index
    %c0_90 = arith.constant 0 : index
    %362 = vector.load %arg6[%c0_89, %c0_90] : memref<128x128xf32, #tpu.memory_space<vmem>>, vector<128x128xf32>
    %cst_91 = arith.constant dense<0.000000e+00> : vector<2x128xf32>
    %363 = tpu.matmul %361, %362, %cst_91 {dimension_numbers = #tpu.dot_dimension_numbers<[1], [0], [0], [1], [0, 0, 1, 1], [], []>} : vector<2x128xf32>, vector<128x128xf32>, vector<2x128xf32> -> vector<2x128xf32>
    %c0_92 = arith.constant 0 : index
    %c0_93 = arith.constant 0 : index
    %364 = vector.load %arg7[%c0_92, %c0_93] : memref<1x128xf32, #tpu.memory_space<vmem>>, vector<1x128xf32>
    %365 = vector.broadcast %364 : vector<1x128xf32> to vector<2x128xf32>
    %366 = arith.addf %363, %365 : vector<2x128xf32>
    %c0_94 = arith.constant 0 : index
    %c0_95 = arith.constant 0 : index
    %367 = vector.load %arg8[%c0_94, %c0_95] : memref<2x128xf32, #tpu.memory_space<vmem>>, vector<2x128xf32>
    tpu.vector_store %arg8[%c0_94, %c0_95], %366 {strides = array<i32>} : memref<2x128xf32, #tpu.memory_space<vmem>>, vector<2x128xf32>,
    return
  }
}

</mosaic_0001>

<bundles_post_ra>
// kernel: ohlcv_lstm_pallas.1
= control target key start
LH: loop header
LB: loop body
LE: loop exit
PB: predicated region body
PF: predicated region fallthrough
CT: control target
= control target key end

     0   :  { %13 = vsyncpa [#allocation3], 0  ;;  %s5529_s0 = inlined_call_operand.vmem [shape: f32[16,5], index: 0, kind: input, shape index: {}]   ;;  %s5530_s1 = inlined_call_operand.vmem [shape: f32[5,512], index: 1, kind: input, shape index: {}]   ;;  %s5531_s2 = inlined_call_operand.hbm [shape: bf16[128,512], index: 2, kind: input, shape index: {}]   ;;  %s5532_s3 = inlined_call_operand.vmem [shape: f32[1,512], index: 3, kind: input, shape index: {}]   ;;  %s5533_s4 = inlined_call_operand.hbm [shape: bf16[256,512], index: 4, kind: input, shape index: {}]   ;;  %s5534_s5 = inlined_call_operand.vmem [shape: f32[1,512], index: 5, kind: input, shape index: {}]   ;;  %s5535_s6 = inlined_call_operand.hbm [shape: f32[128,128], index: 6, kind: input, shape index: {}]   ;;  %s5536_s7 = inlined_call_operand.vmem [shape: f32[1,128], index: 7, kind: input, shape index: {}]   ;;  %s5537_s8 = inlined_call_operand.hbm [shape: f32[2,128], index: 8, kind: output, shape index: {}]  }
   0x1   :  { %14 = vsyncpa [#allocation6], 0 }
   0x2   :  { %15 = vsyncpa [#allocation4], 0  ;;  %s3800_s27 = smov [#allocation5]   ;;  %s3801_s29 = smov [#allocation2]  }
   0x3   :  { %s39_s28 = sshll.u32 %s3800_s27, 4  ;;  %s25_s30 = sshll.u32 %s3801_s29, 4  ;;  %s40_s28 = int_to_ptr.vmem [resolvable:$true] %s39_s28  ;;  %s3857_s30 = int_to_ptr.vmem [resolvable:$true] %s25_s30 }
   0x4   :  { %s3706_s11 = scalar_lea.hbm %s5533_s4, 8192 }
   0x5   :  { %p3707_p0 = scmp.ne.s32.totalorder %s5533_s4, %s3706_s11  ;;  %p3710_p1 = scmp.lt.u32.totalorder %s3706_s11, %s5533_s4 }
   0x7   :  { %p3712_p2 = pnand %p3710_p1, %p3707_p0 }
   0x9   :  { %3715 = shalt.err (!%p3712_p2)
}
   0xa   :  { %s3716_s16 = scalar_lea.vmem %s40_s28, 8192  ;;  %p3721_p4 = scmp.lt.s32.totalorder %s40_s28, %s40_s28 }
   0xb   :  { %p3717_p3 = scmp.ne.s32.totalorder %s40_s28, %s3716_s16  ;;  %p3722_p5 = scmp.lt.s32.totalorder %s3716_s16, %s3716_s16 }
   0xd   :  { %p3723_p6 = por %p3722_p5, %p3721_p4 }
   0xf   :  { %p3724_p7 = pnand %p3723_p6, %p3717_p3 }
  0x11   :  { %3727 = shalt.err (!%p3724_p7)
}
  0x12   :  { %s3802_s17 = smov 256   ;;  %s3803_s18 = smov 16  }
  0x13   :  { %45 = dma.hbm_to_vmem [thread:$0]  %s5533_s4, 8192, %s40_s28, [#allocation6], %s3802_s17, %s3802_s17, %s3803_s18  }
  0x14   :  { %s3728_s23 = scalar_lea.hbm %s5531_s2, 4096 }
  0x15   :  { %p3729_p8 = scmp.ne.s32.totalorder %s5531_s2, %s3728_s23  ;;  %p3732_p9 = scmp.lt.u32.totalorder %s3728_s23, %s5531_s2 }
  0x17   :  { %p3734_p10 = pnand %p3732_p9, %p3729_p8 }
  0x19   :  { %3737 = shalt.err (!%p3734_p10)
}
  0x1a   :  { %s3738_s29 = scalar_lea.vmem %s3857_s30, 4096  ;;  %p3743_p12 = scmp.lt.s32.totalorder %s3857_s30, %s3857_s30 }
  0x1b   :  { %p3739_p11 = scmp.ne.s32.totalorder %s3857_s30, %s3738_s29  ;;  %p3744_p13 = scmp.lt.s32.totalorder %s3738_s29, %s3738_s29 }
  0x1d   :  { %p3745_p0 = por %p3744_p13, %p3743_p12 }
  0x1f   :  { %p3746_p1 = pnand %p3745_p0, %p3739_p11 }
  0x21   :  { %3749 = shalt.err (!%p3746_p1)
}
  0x22   :  { %31 = dma.hbm_to_vmem [thread:$0]  %s5531_s2, 4096, %s3857_s30, [#allocation3], %s3802_s17, %s3802_s17, %s3803_s18  }
  0x23   :  { %s3804_s9 = smov [#allocation7]   ;;  %s3750_s13 = scalar_lea.hbm %s5535_s6, 2048 }
  0x24   :  { %s53_s10 = sshll.u32 %s3804_s9, 4  ;;  %p3751_p2 = scmp.ne.s32.totalorder %s5535_s6, %s3750_s13  ;;  %s54_s10 = int_to_ptr.vmem [resolvable:$true] %s53_s10 }
  0x25   :  { %p3754_p3 = scmp.lt.u32.totalorder %s3750_s13, %s5535_s6 }
  0x27   :  { %p3756_p4 = pnand %p3754_p3, %p3751_p2 }
  0x29   :  { %3759 = shalt.err (!%p3756_p4)
}
  0x2a   :  { %s3760_s20 = scalar_lea.vmem %s54_s10, 2048  ;;  %p3765_p6 = scmp.lt.s32.totalorder %s54_s10, %s54_s10 }
  0x2b   :  { %p3761_p5 = scmp.ne.s32.totalorder %s54_s10, %s3760_s20  ;;  %p3766_p7 = scmp.lt.s32.totalorder %s3760_s20, %s3760_s20 }
  0x2d   :  { %p3767_p8 = por %p3766_p7, %p3765_p6 }
  0x2f   :  { %p3768_p9 = pnand %p3767_p8, %p3761_p5 }
  0x31   :  { %3771 = shalt.err (!%p3768_p9)
}
  0x32   :  { %s3805_s2 = smov 128   ;;  %s3806_s30 = smov 8  }
  0x33   :  { %59 = dma.hbm_to_vmem [thread:$0]  %s5535_s6, 2048, %s54_s10, [#allocation6], %s3805_s2, %s3805_s2, %s3806_s30  }
  0x34   :  { %3794 = dma.done.wait [#allocation3], 4096  }
  0x35   :  { %3795 = vsyncadd [#allocation3], 4294963200 }
  0x36   :  { %3796 = dma.done.wait [#allocation6], 10240  }
  0x37   :  { %3797 = vsyncadd [#allocation6], 4294957056  ;;  %v5538_v0 = vmov 0.0   ;;  %v5545_v1 = vmov 0   ;;  %vm107_vm0 = vcmask 1044480   ;;  %v72_v4 = vld [vmem:[%s5529_s0] sm:$0xff]  ;;  %v80_v42 = vlaneseq }
  0x38   :  { %184 = vmatprep.mubr.f32.mxu1 %v5538_v0  ;;  %498 = vmatprep.mubr.bf16.mxu0 %v5545_v1  ;;  %v75_v2 = vld [vmem:[%s5530_s1 + $0x8] sm:$0x1f]  ;;  %v74_v3 = vld [vmem:[%s5530_s1] sm:$0x1f]  ;;  %vm100_vm1 = vcmask 39936   ;;  %vm3810_vm2 = vmmov 0  }
  0x39   :  { %2873 = vmatprep.subr.msk.mxu1 %vm107_vm0, %v75_v2  ;;  %v3912_v5 = vld [vmem:[#allocation2 + $0x4] ss:$16 sps:$4 sm:$0xff]   ;;  %v3915_v6 = vld [vmem:[#allocation2] ss:$16 sps:$4 sm:$0xff]   ;;  %v73_v7 = vld [vmem:[%s5529_s0 + $0x8] sm:$0xff]  ;;  %v4070_v43 = vshrl.u32 %v80_v42, 7 }
  0x3a   :  { %2874 = vmatpush1.msk.msra.mxu1 %vm107_vm0, %v74_v3  ;;  %466 = vmatprep.subr.bf16.mxu0 %v3912_v5  ;;  %v3922_v8 = vld [vmem:[#allocation2 + $0x24] ss:$16 sps:$4 sm:$0xff]   ;;  %v77_v9 = vld [vmem:[%s5530_s1 + $0x18] sm:$0x1f]  ;;  %v3929_v10 = vld [vmem:[#allocation2 + $0x20] ss:$16 sps:$4 sm:$0xff]  }
  0x3b   :  { %2875 = vmatmul.mubr.msk.f32.vlgmr.msra.gmra.mrb[0].mxu1 %vm100_vm1, %v72_v4  ;;  %467 = vmatpush1.bf16.msra.mxu0 %v3915_v6  ;;  %v76_v11 = vld [vmem:[%s5530_s1 + $0x10] sm:$0x1f]  ;;  %v3936_v12 = vld [vmem:[#allocation2 + $0xc] ss:$16 sps:$4 sm:$0xff]   ;;  %v3943_v14 = vld [vmem:[#allocation2 + $0x8] ss:$16 sps:$4 sm:$0xff]  }
  0x3c   :  { %190 = vmatprep.mubr.f32.mxu1 %v5538_v0  ;;  %468 = vmatprep.subr.bf16.mxu0 %v3922_v8  ;;  %v3939_v13 = vld [vmem:[#allocation2 + $0x44] ss:$16 sps:$4 sm:$0xff]   ;;  %v3947_v15 = vld [vmem:[#allocation2 + $0x40] ss:$16 sps:$4 sm:$0xff]   ;;  %v3950_v16 = vld [vmem:[#allocation2 + $0x2c] ss:$16 sps:$4 sm:$0xff]  }
  0x3d   :  { %2877 = vmatprep.subr.msk.mxu1 %vm107_vm0, %v77_v9  ;;  %v3952_v17 = vld [vmem:[#allocation2 + $0x64] ss:$16 sps:$4 sm:$0xff]   ;;  %v3955_v18 = vld [vmem:[#allocation2 + $0x28] ss:$16 sps:$4 sm:$0xff]   ;;  %v3959_v19 = vld [vmem:[#allocation2 + $0x60] ss:$16 sps:$4 sm:$0xff]  }
  0x3e   :  { %2878 = vmatpush1.msk.msra.mxu1 %vm107_vm0, %v76_v11  ;;  %v3961_v20 = vld [vmem:[#allocation2 + $0x4c] ss:$16 sps:$4 sm:$0xff]   ;;  %v3965_v21 = vld [vmem:[#allocation2 + $0x84] ss:$16 sps:$4 sm:$0xff]   ;;  %v3968_v22 = vld [vmem:[#allocation2 + $0x48] ss:$16 sps:$4 sm:$0xff]  }
  0x3f   :  { %2876 = vmatmul.mubr.msk.f32.gmra.mrb[2].mxu1 %vm100_vm1, %v73_v7  ;;  %507 = vmatprep.subr.bf16.mxu1 %v3936_v12  ;;  %v3973_v23 = vld [vmem:[#allocation2 + $0x80] ss:$16 sps:$4 sm:$0xff]   ;;  %v3977_v24 = vld [vmem:[#allocation2 + $0x6c] ss:$16 sps:$4 sm:$0xff]   ;;  %v3979_v25 = vld [vmem:[#allocation2 + $0xa4] ss:$16 sps:$4 sm:$0xff]  }
  0x40   :  { %469 = vmatpush1.bf16.msra.mxu0 %v3929_v10  ;;  %261 = vmatprep.mubr.f32.mxu1 %v5538_v0  ;;  %v3984_v26 = vld [vmem:[#allocation2 + $0x68] ss:$16 sps:$4 sm:$0xff]   ;;  %v3986_v27 = vld [vmem:[#allocation2 + $0xa0] ss:$16 sps:$4 sm:$0xff]   ;;  %v3990_v28 = vld [vmem:[#allocation2 + $0x8c] ss:$16 sps:$4 sm:$0xff]  }
  0x41   :  { %470 = vmatprep.subr.bf16.mxu0 %v3939_v13  ;;  %v3992_v29 = vld [vmem:[#allocation2 + $0xc4] ss:$16 sps:$4 sm:$0xff]   ;;  %v3994_v30 = vld [vmem:[#allocation2 + $0x88] ss:$16 sps:$4 sm:$0xff]   ;;  %v3996_v31 = vld [vmem:[#allocation2 + $0xc0] ss:$16 sps:$4 sm:$0xff]  }
  0x42   :  { %v3998_v32 = vld [vmem:[#allocation2 + $0xac] ss:$16 sps:$4 sm:$0xff]   ;;  %v4000_v33 = vld [vmem:[#allocation2 + $0xe4] ss:$16 sps:$4 sm:$0xff]   ;;  %v4006_v34 = vld [vmem:[#allocation2 + $0xa8] ss:$16 sps:$4 sm:$0xff]  }
  0x43   :  { %2879 = vmatmul.mubr.msk.f32.vlgmr.msra.gmra.mrb[4].mxu1 %vm100_vm1, %v72_v4  ;;  %v4008_v35 = vld [vmem:[#allocation2 + $0xe0] ss:$16 sps:$4 sm:$0xff]   ;;  %v4010_v36 = vld [vmem:[#allocation2 + $0xcc] ss:$16 sps:$4 sm:$0xff]   ;;  %v4016_v37 = vld [vmem:[#allocation2 + $0xc8] ss:$16 sps:$4 sm:$0xff]  }
  0x44   :  { %508 = vmatpush1.bf16.msra.mxu1 %v3943_v14  ;;  %471 = vmatpush1.bf16.msra.mxu0 %v3947_v15  ;;  %v4018_v38 = vld [vmem:[#allocation2 + $0xec] ss:$16 sps:$4 sm:$0xff]   ;;  %v4024_v39 = vld [vmem:[#allocation2 + $0xe8] ss:$16 sps:$4 sm:$0xff]   ;;  %v4064_v40 = vld [vmem:[#allocation5 + $0x4] ss:$16 sps:$4 sm:$0xff]  }
  0x45   :  { %509 = vmatprep.subr.bf16.mxu1 %v3950_v16  ;;  %472 = vmatprep.subr.bf16.mxu0 %v3952_v17  ;;  %v4066_v41 = vld [vmem:[#allocation5 + $0xc] ss:$16 sps:$4 sm:$0xff]   ;;  %v5544_v44 = vsub.s32 0, %v4070_v43  ;;  %v78_v45 = vld [vmem:[%s5532_s3] sm:$0xf]  ;;  %v5543_v47 = vsub.s32 1, %v4070_v43 }
  0x46   :  { %267 = vmatprep.mubr.f32.mxu1 %v5538_v0  ;;  %v5540_v55 = vsub.s32 2, %v4070_v43  ;;  %v5539_v57 = vsub.s32 3, %v4070_v43  ;;  %s3811_s12 = smov [#allocation8]  }
  0x47   :  { %2880 = vmatmul.mubr.msk.f32.gmra.mrb[6].mxu1 %vm100_vm1, %v73_v7  ;;  %v83_v49 = vrot.slane %v78_v45, %v5544_v44  ;;  %v87_v50 = vrot.slane %v78_v45, %v5543_v47  ;;  %v4162_v47 = vld [vmem:[#allocation5 + $0x80] ss:$16 sps:$4 sm:$0xff]   ;;  %v4164_v44 = vld [vmem:[#allocation5 + $0x88] ss:$16 sps:$4 sm:$0xff]   ;;  %s2863_s13 = sshll.u32 %s3811_s12, 4  ;;  %s2864_s13 = int_to_ptr.vmem [resolvable:$true] %s2863_s13 }
  0x48   :  { %510 = vmatpush1.bf16.msra.mxu1 %v3955_v18  ;;  %473 = vmatpush1.bf16.msra.mxu0 %v3959_v19  ;;  %v91_v59 = vrot.slane %v78_v45, %v5540_v55  ;;  %v95_v60 = vrot.slane %v78_v45, %v5539_v57  ;;  %5853 = vst [vmem:[#allocation18_spill] sm:$0xff] %v4162_v47  ;;  %5854 = vst [vmem:[#allocation19_spill] sm:$0xff] %v4164_v44  ;;  %s3772_s14 = scalar_lea.vmem %s2864_s13, 32  ;;  %p3777_p11 = scmp.lt.s32.totalorder %s2864_s13, %s2864_s13 }
  0x49   :  { %511 = vmatprep.subr.bf16.mxu1 %v3961_v20  ;;  %474 = vmatprep.subr.bf16.mxu0 %v3965_v21  ;;  %p3773_p10 = scmp.ne.s32.totalorder %s2864_s13, %s3772_s14  ;;  %p3778_p12 = scmp.lt.s32.totalorder %s3772_s14, %s3772_s14 }
  0x4a   :  { %539 = vmatprep.mubr.bf16.mxu1 %v5545_v1 }
  0x4b   :  { %p3779_p13 = por %p3778_p12, %p3777_p11 }
  0x4c   :  { %512 = vmatpush1.bf16.msra.mxu1 %v3968_v22  ;;  %475 = vmatpush1.bf16.msra.mxu0 %v3973_v23 }
  0x4d   :  { %513 = vmatprep.subr.bf16.mxu1 %v3977_v24  ;;  %476 = vmatprep.subr.bf16.mxu0 %v3979_v25  ;;  %p3780_p0 = pnand %p3779_p13, %p3773_p10 }
  0x50   :  { %514 = vmatpush1.bf16.msra.mxu1 %v3984_v26  ;;  %477 = vmatpush1.bf16.msra.mxu0 %v3986_v27 }
  0x51   :  { %515 = vmatprep.subr.bf16.mxu1 %v3990_v28  ;;  %478 = vmatprep.subr.bf16.mxu0 %v3992_v29 }
  0x54   :  { %516 = vmatpush1.bf16.msra.mxu1 %v3994_v30  ;;  %479 = vmatpush1.bf16.msra.mxu0 %v3996_v31 }
  0x55   :  { %517 = vmatprep.subr.bf16.mxu1 %v3998_v32  ;;  %480 = vmatprep.subr.bf16.mxu0 %v4000_v33 }
  0x58   :  { %518 = vmatpush1.bf16.msra.mxu1 %v4006_v34  ;;  %481 = vmatpush1.bf16.msra.mxu0 %v4008_v35 }
  0x59   :  { %519 = vmatprep.subr.bf16.mxu1 %v4010_v36  ;;  %577 = vmatprep.subr.bf16.mxu0 %v3912_v5 }
  0x5b   :  { %499 = vmatmul.mubr.bf16.vlgmr.msra.gmra.mrb[0].mxu0 %v5545_v1 }
  0x5c   :  { %520 = vmatpush1.bf16.msra.mxu1 %v4016_v37  ;;  %578 = vmatpush1.bf16.msra.mxu0 %v3915_v6 }
  0x5d   :  { %521 = vmatprep.subr.bf16.mxu1 %v4018_v38  ;;  %579 = vmatprep.subr.bf16.mxu0 %v3922_v8 }
  0x5e   :  { %609 = vmatprep.mubr.bf16.mxu0 %v5545_v1 }
  0x60   :  { %522 = vmatpush1.bf16.msra.mxu1 %v4024_v39  ;;  %580 = vmatpush1.bf16.msra.mxu0 %v3929_v10 }
  0x61   :  { %618 = vmatprep.subr.bf16.mxu1 %v3936_v12  ;;  %581 = vmatprep.subr.bf16.mxu0 %v3939_v13 }
  0x63   :  { %540 = vmatmul.mubr.bf16.vlgmr.msra.gmra.mrb[8].mxu1 %v5545_v1 }
  0x64   :  { %619 = vmatpush1.bf16.msra.mxu1 %v3943_v14  ;;  %582 = vmatpush1.bf16.msra.mxu0 %v3947_v15 }
  0x65   :  { %620 = vmatprep.subr.bf16.mxu1 %v3950_v16  ;;  %583 = vmatprep.subr.bf16.mxu0 %v3952_v17 }
  0x66   :  { %650 = vmatprep.mubr.bf16.mxu1 %v5545_v1  ;;  %v4168_v1 = vld [vmem:[#allocation5 + $0xa4] ss:$16 sps:$4 sm:$0xff]  }
  0x67   :  { %5855 = vst [vmem:[#allocation20_spill] sm:$0xff] %v4168_v1 }
  0x68   :  { %621 = vmatpush1.bf16.msra.mxu1 %v3955_v18  ;;  %584 = vmatpush1.bf16.msra.mxu0 %v3959_v19 }
  0x69   :  { %622 = vmatprep.subr.bf16.mxu1 %v3961_v20  ;;  %585 = vmatprep.subr.bf16.mxu0 %v3965_v21 }
  0x6c   :  { %623 = vmatpush1.bf16.msra.mxu1 %v3968_v22  ;;  %586 = vmatpush1.bf16.msra.mxu0 %v3973_v23 }
  0x6d   :  { %624 = vmatprep.subr.bf16.mxu1 %v3977_v24  ;;  %587 = vmatprep.subr.bf16.mxu0 %v3979_v25 }
  0x70   :  { %625 = vmatpush1.bf16.msra.mxu1 %v3984_v26  ;;  %588 = vmatpush1.bf16.msra.mxu0 %v3986_v27 }
  0x71   :  { %626 = vmatprep.subr.bf16.mxu1 %v3990_v28  ;;  %589 = vmatprep.subr.bf16.mxu0 %v3992_v29 }
  0x74   :  { %627 = vmatpush1.bf16.msra.mxu1 %v3994_v30  ;;  %590 = vmatpush1.bf16.msra.mxu0 %v3996_v31 }
  0x75   :  { %628 = vmatprep.subr.bf16.mxu1 %v3998_v32  ;;  %591 = vmatprep.subr.bf16.mxu0 %v4000_v33 }
  0x78   :  { %629 = vmatpush1.bf16.msra.mxu1 %v4006_v34  ;;  %592 = vmatpush1.bf16.msra.mxu0 %v4008_v35 }
  0x79   :  { %630 = vmatprep.subr.bf16.mxu1 %v4010_v36  ;;  %1109 = vmatprep.subr.bf16.mxu0 %v4064_v40 }
  0x7c   :  { %631 = vmatpush1.bf16.msra.mxu1 %v4016_v37 }
  0x7d   :  { %632 = vmatprep.subr.bf16.mxu1 %v4018_v38 }
  0x80   :  { %633 = vmatpush1.bf16.msra.mxu1 %v4024_v39 }
  0x81   :  { %1150 = vmatprep.subr.bf16.mxu1 %v4066_v41 }
 0x10e   :  { %v186_v46 = vpop.f32.mrb[0].mxu1 }
 0x10f   :  { %v188_v48 = vpop.f32.mrb[1].mxu1  ;;  %v4095_v3 = vadd.f32 %v186_v46, %v83_v49 }
 0x110   :  { %v4097_v4 = vadd.f32 %v188_v48, %v87_v50 }
 0x112   :  { %v192_v51 = vpop.f32.mrb[2].mxu1 }
 0x113   :  { %v4081_v52 = vadd.f32 %v192_v51, %v83_v49  ;;  %v194_v53 = vpop.f32.mrb[3].mxu1 }
 0x114   :  { %v4083_v54 = vadd.f32 %v194_v53, %v87_v50 }
 0x115   :  { %5847 = vst [vmem:[#allocation12_spill] sm:$0xff] %v4081_v52  ;;  %v4180_v52 = vld [vmem:[#allocation5 + $0xc4] ss:$16 sps:$4 sm:$0xff]  }
 0x116   :  { %5848 = vst [vmem:[#allocation13_spill] sm:$0xff] %v4083_v54  ;;  %v263_v56 = vpop.f32.mrb[4].mxu1  ;;  %v4176_v54 = vld [vmem:[#allocation5 + $0xa8] ss:$16 sps:$4 sm:$0xff]   ;;  %5859 = vst [vmem:[#allocation24_spill] sm:$0xff] %v4180_v52 }
 0x117   :  { %v265_v58 = vpop.f32.mrb[5].mxu1  ;;  %5858 = vst [vmem:[#allocation23_spill] sm:$0xff] %v4176_v54 }
 0x118   :  { %v4104_v50 = vadd.f32 %v265_v58, %v95_v60 }
 0x11a   :  { %v269_v61 = vpop.f32.mrb[6].mxu1 }
 0x11b   :  { %v4091_v62 = vadd.f32 %v269_v61, %v91_v59  ;;  %v271_v63 = vpop.f32.mrb[7].mxu1  ;;  %v4101_v61 = vadd.f32 %v263_v56, %v91_v59 }
 0x11c   :  { %v4093_v2 = vadd.f32 %v271_v63, %v95_v60 }
 0x11d   :  { %5849 = vst [vmem:[#allocation14_spill] sm:$0xff] %v4091_v62  ;;  %v4174_v62 = vld [vmem:[#allocation5 + $0xa0] ss:$16 sps:$4 sm:$0xff]  }
 0x11e   :  { %5850 = vst [vmem:[#allocation15_spill] sm:$0xff] %v4093_v2  ;;  %v4170_v2 = vld [vmem:[#allocation5 + $0xac] ss:$16 sps:$4 sm:$0xff]   ;;  %5857 = vst [vmem:[#allocation22_spill] sm:$0xff] %v4174_v62 }
 0x11f   :  { %5856 = vst [vmem:[#allocation21_spill] sm:$0xff] %v4170_v2 }
 0x12e   :  { %v500_v7 = vpop.f32.mrb[0].mxu0 }
 0x12f   :  { %v548_v9 = vadd.f32 %v500_v7, %v4095_v3  ;;  %v502_v11 = vpop.f32.mrb[1].mxu0 }
 0x130   :  { %v549_v42 = vadd.f32 %v502_v11, %v4097_v4  ;;  %v504_v51 = vpop.f32.mrb[2].mxu0 }
 0x131   :  { %v2913_v53 = vmul.f32 -1.442695, %v548_v9  ;;  %v505_v0 = vpop.f32.mrb[3].mxu0 }
 0x132   :  { %v2914_v45 = vmul.f32 -1.442695, %v549_v42 }
 0x133   :  { %3258 = vpow2.f32 %v2913_v53 }
 0x134   :  { %3260 = vpow2.f32 %v2914_v45 }
 0x136   :  { %v541_v63 = vpop.f32.mrb[8].mxu1 }
 0x137   :  { %v550_v46 = vadd.f32 %v541_v63, %v4101_v61  ;;  %v543_v49 = vpop.f32.mrb[9].mxu1 }
 0x138   :  { %v545_v48 = vpop.f32.mrb[10].mxu1  ;;  %v551_v55 = vadd.f32 %v543_v49, %v4104_v50 }
 0x139   :  { %v546_v57 = vpop.f32.mrb[11].mxu1  ;;  %v2915_v7 = vmul.f32 -1.442695, %v550_v46  ;;  %v4110_v48 = vld [vmem:[#allocation5] ss:$16 sps:$4 sm:$0xff]  }
 0x13b   :  { %3262 = vpow2.f32 %v2915_v7 }
 0x13c   :  { %3264 = vtanh.f32 %v551_v55  ;;  %v4112_v55 = vld [vmem:[#allocation5 + $0x8] ss:$16 sps:$4 sm:$0xff]  }
 0x13d   :  { %v3259_v11 = vpop.eup %3258 }
 0x13e   :  { %v3261_v51 = vpop.eup %3260  ;;  %v561_v9 = vadd.f32 1.0, %v3259_v11  ;;  %v4116_v11 = vld [vmem:[#allocation5 + $0x24] ss:$16 sps:$4 sm:$0xff]  }
 0x13f   :  { %v562_v0 = vadd.f32 1.0, %v3261_v51  ;;  %v4118_v51 = vld [vmem:[#allocation5 + $0x2c] ss:$16 sps:$4 sm:$0xff]  }
 0x140   :  { %3266 = vrcp.f32 %v561_v9  ;;  %v4124_v9 = vld [vmem:[#allocation5 + $0x20] ss:$16 sps:$4 sm:$0xff]  }
 0x141   :  { %3268 = vrcp.f32 %v562_v0  ;;  %v4126_v0 = vld [vmem:[#allocation5 + $0x28] ss:$16 sps:$4 sm:$0xff]  }
 0x145   :  { %v3263_v56 = vpop.eup %3262 }
 0x146   :  { %v3265_v59 = vpop.eup %3264  ;;  %v563_v45 = vadd.f32 1.0, %v3263_v56  ;;  %v4130_v56 = vld [vmem:[#allocation5 + $0x44] ss:$16 sps:$4 sm:$0xff]  }
 0x148   :  { %3270 = vrcp.f32 %v563_v45  ;;  %v4140_v45 = vld [vmem:[#allocation5 + $0x48] ss:$16 sps:$4 sm:$0xff]  }
 0x14a   :  { %v3267_v42 = vpop.eup %3266 }
 0x14b   :  { %v3269_v53 = vpop.eup %3268  ;;  %v572_v63 = vmul.f32 %v3267_v42, %v3265_v59  ;;  %v4132_v59 = vld [vmem:[#allocation5 + $0x4c] ss:$16 sps:$4 sm:$0xff]   ;;  %v5541_v42 = vmov 0.0|0.0  }
 0x14c   :  { %v571_v58 = vmul.f32 0.0, %v3269_v53  ;;  %v4138_v53 = vld [vmem:[#allocation5 + $0x40] ss:$16 sps:$4 sm:$0xff]  }
 0x14e   :  { %v4107_v60 = vadd.f32 %v572_v63, %v571_v58  ;;  %v4144_v63 = vld [vmem:[#allocation5 + $0x64] ss:$16 sps:$4 sm:$0xff]   ;;  %v4146_v58 = vld [vmem:[#allocation5 + $0x6c] ss:$16 sps:$4 sm:$0xff]  }
 0x150   :  { %3272 = vtanh.f32 %v4107_v60 }
 0x152   :  { %v3271_v57 = vpop.eup %3270 }
 0x15a   :  { %v3273_v46 = vpop.eup %3272 }
 0x15b   :  { %v575_v49 = vmul.f32 %v3273_v46, %v3271_v57  ;;  %v4150_v57 = vld [vmem:[#allocation5 + $0x60] ss:$16 sps:$4 sm:$0xff]   ;;  %v4152_v46 = vld [vmem:[#allocation5 + $0x68] ss:$16 sps:$4 sm:$0xff]  }
 0x15d   :  { %v4114_v7 = vpack.c.bf16 %v575_v49, %v575_v49  ;;  %v4156_v49 = vld [vmem:[#allocation5 + $0x84] ss:$16 sps:$4 sm:$0xff]  }
 0x15e   :  { %5851 = vst [vmem:[#allocation16_spill] sm:$0xff] %v4156_v49 }
 0x15f   :  { %610 = vmatmul.mubr.bf16.vlgmr.msra.gmra.mrb[4].mxu0 %v4114_v7  ;;  %651 = vmatmul.mubr.bf16.vlgmr.msra.gmra.mrb[12].mxu1 %v4114_v7 }
 0x160   :  { %1110 = vmatpush1.bf16.msra.mxu0 %v4110_v48  ;;  %1151 = vmatpush1.bf16.msra.mxu1 %v4112_v55 }
 0x161   :  { %1111 = vmatprep.subr.bf16.mxu0 %v4116_v11  ;;  %1152 = vmatprep.subr.bf16.mxu1 %v4118_v51 }
 0x162   :  { %1141 = vmatprep.mubr.bf16.mxu0 %v5541_v42  ;;  %1182 = vmatprep.mubr.bf16.mxu1 %v5541_v42  ;;  %v4158_v42 = vld [vmem:[#allocation5 + $0x8c] ss:$16 sps:$4 sm:$0xff]  }
 0x163   :  { %5852 = vst [vmem:[#allocation17_spill] sm:$0xff] %v4158_v42 }
 0x164   :  { %1112 = vmatpush1.bf16.msra.mxu0 %v4124_v9  ;;  %1153 = vmatpush1.bf16.msra.mxu1 %v4126_v0 }
 0x165   :  { %1113 = vmatprep.subr.bf16.mxu0 %v4130_v56  ;;  %1154 = vmatprep.subr.bf16.mxu1 %v4132_v59 }
 0x168   :  { %1114 = vmatpush1.bf16.msra.mxu0 %v4138_v53  ;;  %1155 = vmatpush1.bf16.msra.mxu1 %v4140_v45 }
 0x169   :  { %1115 = vmatprep.subr.bf16.mxu0 %v4144_v63  ;;  %1156 = vmatprep.subr.bf16.mxu1 %v4146_v58 }
 0x16c   :  { %1116 = vmatpush1.bf16.msra.mxu0 %v4150_v57  ;;  %1157 = vmatpush1.bf16.msra.mxu1 %v4152_v46 }
 0x16d   :  { %1117 = vmatprep.subr.bf16.mxu0 %v4156_v49  ;;  %1158 = vmatprep.subr.bf16.mxu1 %v4158_v42  ;;  %v4182_v49 = vld [vmem:[#allocation5 + $0xcc] ss:$16 sps:$4 sm:$0xff]   ;;  %v4186_v42 = vld [vmem:[#allocation5 + $0xc0] ss:$16 sps:$4 sm:$0xff]  }
 0x16e   :  { %5860 = vst [vmem:[#allocation25_spill] sm:$0xff] %v4182_v49  ;;  %5861 = vst [vmem:[#allocation26_spill] sm:$0xff] %v4186_v42 }
 0x170   :  { %1118 = vmatpush1.bf16.msra.mxu0 %v4162_v47  ;;  %1159 = vmatpush1.bf16.msra.mxu1 %v4164_v44  ;;  %v4188_v47 = vld [vmem:[#allocation5 + $0xc8] ss:$16 sps:$4 sm:$0xff]   ;;  %v4192_v44 = vld [vmem:[#allocation5 + $0xe4] ss:$16 sps:$4 sm:$0xff]  }
 0x171   :  { %1119 = vmatprep.subr.bf16.mxu0 %v4168_v1  ;;  %1160 = vmatprep.subr.bf16.mxu1 %v4170_v2  ;;  %5862 = vst [vmem:[#allocation27_spill] sm:$0xff] %v4188_v47  ;;  %5863 = vst [vmem:[#allocation28_spill] sm:$0xff] %v4192_v44  ;;  %v4194_v1 = vld [vmem:[#allocation5 + $0xec] ss:$16 sps:$4 sm:$0xff]   ;;  %v4198_v2 = vld [vmem:[#allocation5 + $0xe0] ss:$16 sps:$4 sm:$0xff]  }
 0x172   :  { %5864 = vst [vmem:[#allocation29_spill] sm:$0xff] %v4194_v1  ;;  %5865 = vst [vmem:[#allocation30_spill] sm:$0xff] %v4198_v2 }
 0x174   :  { %1120 = vmatpush1.bf16.msra.mxu0 %v4174_v62  ;;  %1161 = vmatpush1.bf16.msra.mxu1 %v4176_v54  ;;  %v4200_v62 = vld [vmem:[#allocation5 + $0xe8] ss:$16 sps:$4 sm:$0xff]   ;;  %v4204_v54 = vld [vmem:[#allocation5 + $0x104] ss:$16 sps:$4 sm:$0xff]  }
 0x175   :  { %1121 = vmatprep.subr.bf16.mxu0 %v4180_v52  ;;  %1162 = vmatprep.subr.bf16.mxu1 %v4182_v49  ;;  %5866 = vst [vmem:[#allocation31_spill] sm:$0xff] %v4200_v62  ;;  %5867 = vst [vmem:[#allocation32_spill] sm:$0xff] %v4204_v54  ;;  %v4206_v52 = vld [vmem:[#allocation5 + $0x10c] ss:$16 sps:$4 sm:$0xff]   ;;  %v4210_v49 = vld [vmem:[#allocation5 + $0x100] ss:$16 sps:$4 sm:$0xff]  }
 0x176   :  { %5868 = vst [vmem:[#allocation33_spill] sm:$0xff] %v4206_v52  ;;  %5869 = vst [vmem:[#allocation34_spill] sm:$0xff] %v4210_v49 }
 0x178   :  { %1122 = vmatpush1.bf16.msra.mxu0 %v4186_v42  ;;  %1163 = vmatpush1.bf16.msra.mxu1 %v4188_v47  ;;  %v4212_v42 = vld [vmem:[#allocation5 + $0x108] ss:$16 sps:$4 sm:$0xff]   ;;  %v4216_v47 = vld [vmem:[#allocation5 + $0x124] ss:$16 sps:$4 sm:$0xff]  }
 0x179   :  { %1123 = vmatprep.subr.bf16.mxu0 %v4192_v44  ;;  %1164 = vmatprep.subr.bf16.mxu1 %v4194_v1  ;;  %5870 = vst [vmem:[#allocation35_spill] sm:$0xff] %v4212_v42  ;;  %5871 = vst [vmem:[#allocation36_spill] sm:$0xff] %v4216_v47  ;;  %v4218_v44 = vld [vmem:[#allocation5 + $0x12c] ss:$16 sps:$4 sm:$0xff]   ;;  %v4222_v1 = vld [vmem:[#allocation5 + $0x120] ss:$16 sps:$4 sm:$0xff]  }
 0x17a   :  { %5872 = vst [vmem:[#allocation37_spill] sm:$0xff] %v4218_v44  ;;  %5873 = vst [vmem:[#allocation38_spill] sm:$0xff] %v4222_v1 }
 0x17c   :  { %1124 = vmatpush1.bf16.msra.mxu0 %v4198_v2  ;;  %1165 = vmatpush1.bf16.msra.mxu1 %v4200_v62  ;;  %v4224_v2 = vld [vmem:[#allocation5 + $0x128] ss:$16 sps:$4 sm:$0xff]   ;;  %v4228_v62 = vld [vmem:[#allocation5 + $0x144] ss:$16 sps:$4 sm:$0xff]  }
 0x17d   :  { %1125 = vmatprep.subr.bf16.mxu0 %v4204_v54  ;;  %1166 = vmatprep.subr.bf16.mxu1 %v4206_v52  ;;  %5874 = vst [vmem:[#allocation39_spill] sm:$0xff] %v4224_v2  ;;  %5875 = vst [vmem:[#allocation40_spill] sm:$0xff] %v4228_v62  ;;  %v4230_v54 = vld [vmem:[#allocation5 + $0x14c] ss:$16 sps:$4 sm:$0xff]   ;;  %v4234_v52 = vld [vmem:[#allocation5 + $0x140] ss:$16 sps:$4 sm:$0xff]  }
 0x17e   :  { %5876 = vst [vmem:[#allocation41_spill] sm:$0xff] %v4230_v54  ;;  %5877 = vst [vmem:[#allocation42_spill] sm:$0xff] %v4234_v52 }
 0x180   :  { %1126 = vmatpush1.bf16.msra.mxu0 %v4210_v49  ;;  %1167 = vmatpush1.bf16.msra.mxu1 %v4212_v42  ;;  %v4236_v49 = vld [vmem:[#allocation5 + $0x148] ss:$16 sps:$4 sm:$0xff]   ;;  %v4240_v42 = vld [vmem:[#allocation5 + $0x164] ss:$16 sps:$4 sm:$0xff]  }
 0x181   :  { %1127 = vmatprep.subr.bf16.mxu0 %v4216_v47  ;;  %1168 = vmatprep.subr.bf16.mxu1 %v4218_v44  ;;  %5878 = vst [vmem:[#allocation43_spill] sm:$0xff] %v4236_v49  ;;  %5879 = vst [vmem:[#allocation44_spill] sm:$0xff] %v4240_v42  ;;  %v4242_v47 = vld [vmem:[#allocation5 + $0x16c] ss:$16 sps:$4 sm:$0xff]   ;;  %v4246_v44 = vld [vmem:[#allocation5 + $0x160] ss:$16 sps:$4 sm:$0xff]  }
 0x182   :  { %5880 = vst [vmem:[#allocation45_spill] sm:$0xff] %v4242_v47  ;;  %5881 = vst [vmem:[#allocation46_spill] sm:$0xff] %v4246_v44 }
 0x184   :  { %1128 = vmatpush1.bf16.msra.mxu0 %v4222_v1  ;;  %1169 = vmatpush1.bf16.msra.mxu1 %v4224_v2  ;;  %v4248_v1 = vld [vmem:[#allocation5 + $0x168] ss:$16 sps:$4 sm:$0xff]   ;;  %v4252_v2 = vld [vmem:[#allocation5 + $0x184] ss:$16 sps:$4 sm:$0xff]  }
 0x185   :  { %1129 = vmatprep.subr.bf16.mxu0 %v4228_v62  ;;  %1170 = vmatprep.subr.bf16.mxu1 %v4230_v54  ;;  %5882 = vst [vmem:[#allocation47_spill] sm:$0xff] %v4248_v1  ;;  %5883 = vst [vmem:[#allocation48_spill] sm:$0xff] %v4252_v2  ;;  %v4254_v62 = vld [vmem:[#allocation5 + $0x18c] ss:$16 sps:$4 sm:$0xff]   ;;  %v4258_v54 = vld [vmem:[#allocation5 + $0x180] ss:$16 sps:$4 sm:$0xff]  }
 0x186   :  { %5884 = vst [vmem:[#allocation49_spill] sm:$0xff] %v4254_v62  ;;  %5885 = vst [vmem:[#allocation50_spill] sm:$0xff] %v4258_v54 }
 0x188   :  { %1130 = vmatpush1.bf16.msra.mxu0 %v4234_v52  ;;  %1171 = vmatpush1.bf16.msra.mxu1 %v4236_v49  ;;  %v4260_v52 = vld [vmem:[#allocation5 + $0x188] ss:$16 sps:$4 sm:$0xff]   ;;  %v4264_v49 = vld [vmem:[#allocation5 + $0x1a4] ss:$16 sps:$4 sm:$0xff]  }
 0x189   :  { %1131 = vmatprep.subr.bf16.mxu0 %v4240_v42  ;;  %1172 = vmatprep.subr.bf16.mxu1 %v4242_v47  ;;  %5886 = vst [vmem:[#allocation51_spill] sm:$0xff] %v4260_v52  ;;  %5887 = vst [vmem:[#allocation52_spill] sm:$0xff] %v4264_v49  ;;  %v4266_v42 = vld [vmem:[#allocation5 + $0x1ac] ss:$16 sps:$4 sm:$0xff]   ;;  %v4270_v47 = vld [vmem:[#allocation5 + $0x1a0] ss:$16 sps:$4 sm:$0xff]  }
 0x18a   :  { %5888 = vst [vmem:[#allocation53_spill] sm:$0xff] %v4266_v42  ;;  %5889 = vst [vmem:[#allocation54_spill] sm:$0xff] %v4270_v47 }
 0x18c   :  { %1132 = vmatpush1.bf16.msra.mxu0 %v4246_v44  ;;  %1173 = vmatpush1.bf16.msra.mxu1 %v4248_v1  ;;  %v4272_v44 = vld [vmem:[#allocation5 + $0x1a8] ss:$16 sps:$4 sm:$0xff]   ;;  %v4276_v1 = vld [vmem:[#allocation5 + $0x1c4] ss:$16 sps:$4 sm:$0xff]  }
 0x18d   :  { %1133 = vmatprep.subr.bf16.mxu0 %v4252_v2  ;;  %1174 = vmatprep.subr.bf16.mxu1 %v4254_v62  ;;  %5890 = vst [vmem:[#allocation55_spill] sm:$0xff] %v4272_v44  ;;  %5891 = vst [vmem:[#allocation56_spill] sm:$0xff] %v4276_v1  ;;  %v4278_v2 = vld [vmem:[#allocation5 + $0x1cc] ss:$16 sps:$4 sm:$0xff]   ;;  %v4282_v62 = vld [vmem:[#allocation5 + $0x1c0] ss:$16 sps:$4 sm:$0xff]  }
 0x18e   :  { %5892 = vst [vmem:[#allocation57_spill] sm:$0xff] %v4282_v62 }
 0x190   :  { %1134 = vmatpush1.bf16.msra.mxu0 %v4258_v54  ;;  %1175 = vmatpush1.bf16.msra.mxu1 %v4260_v52  ;;  %v4284_v54 = vld [vmem:[#allocation5 + $0x1c8] ss:$16 sps:$4 sm:$0xff]   ;;  %v4288_v52 = vld [vmem:[#allocation5 + $0x1e4] ss:$16 sps:$4 sm:$0xff]  }
 0x191   :  { %1135 = vmatprep.subr.bf16.mxu0 %v4264_v49  ;;  %1176 = vmatprep.subr.bf16.mxu1 %v4266_v42  ;;  %5893 = vst [vmem:[#allocation58_spill] sm:$0xff] %v4284_v54  ;;  %5894 = vst [vmem:[#allocation59_spill] sm:$0xff] %v4288_v52  ;;  %v4290_v49 = vld [vmem:[#allocation5 + $0x1ec] ss:$16 sps:$4 sm:$0xff]   ;;  %v4294_v42 = vld [vmem:[#allocation5 + $0x1e0] ss:$16 sps:$4 sm:$0xff]  }
 0x192   :  { %5895 = vst [vmem:[#allocation60_spill] sm:$0xff] %v4290_v49  ;;  %5896 = vst [vmem:[#allocation61_spill] sm:$0xff] %v4294_v42 }
 0x194   :  { %1136 = vmatpush1.bf16.msra.mxu0 %v4270_v47  ;;  %1177 = vmatpush1.bf16.msra.mxu1 %v4272_v44  ;;  %v4296_v47 = vld [vmem:[#allocation5 + $0x1e8] ss:$16 sps:$4 sm:$0xff]  }
 0x195   :  { %1137 = vmatprep.subr.bf16.mxu0 %v4276_v1  ;;  %1178 = vmatprep.subr.bf16.mxu1 %v4278_v2  ;;  %5897 = vst [vmem:[#allocation62_spill] sm:$0xff] %v4296_v47 }
 0x198   :  { %1138 = vmatpush1.bf16.msra.mxu0 %v4282_v62  ;;  %1179 = vmatpush1.bf16.msra.mxu1 %v4284_v54 }
 0x199   :  { %1139 = vmatprep.subr.bf16.mxu0 %v4288_v52  ;;  %1180 = vmatprep.subr.bf16.mxu1 %v4290_v49  ;;  %v5898_v49 = vmov 0  }
 0x19c   :  { %1140 = vmatpush1.bf16.msra.mxu0 %v4294_v42  ;;  %1181 = vmatpush1.bf16.msra.mxu1 %v4296_v47 }
 0x19d   :  { %1219 = vmatprep.subr.bf16.mxu0 %v3912_v5  ;;  %1260 = vmatprep.subr.bf16.mxu1 %v3936_v12 }
 0x19f   :  { %1142 = vmatmul.mubr.bf16.vlgmr.msra.gmra.mrb[8].mxu0 %v4114_v7  ;;  %1183 = vmatmul.mubr.bf16.vlgmr.msra.gmra.mrb[16].mxu1 %v4114_v7 }
 0x1a0   :  { %1220 = vmatpush1.bf16.msra.mxu0 %v3915_v6  ;;  %1261 = vmatpush1.bf16.msra.mxu1 %v3943_v14 }
 0x1a1   :  { %1221 = vmatprep.subr.bf16.mxu0 %v3922_v8  ;;  %1262 = vmatprep.subr.bf16.mxu1 %v3950_v16 }
 0x1a2   :  { %1251 = vmatprep.mubr.bf16.mxu0 %v5898_v49  ;;  %1292 = vmatprep.mubr.bf16.mxu1 %v5898_v49 }
 0x1a4   :  { %1222 = vmatpush1.bf16.msra.mxu0 %v3929_v10  ;;  %1263 = vmatpush1.bf16.msra.mxu1 %v3955_v18 }
 0x1a5   :  { %1223 = vmatprep.subr.bf16.mxu0 %v3939_v13  ;;  %1264 = vmatprep.subr.bf16.mxu1 %v3961_v20 }
 0x1a8   :  { %1224 = vmatpush1.bf16.msra.mxu0 %v3947_v15  ;;  %1265 = vmatpush1.bf16.msra.mxu1 %v3968_v22 }
 0x1a9   :  { %1225 = vmatprep.subr.bf16.mxu0 %v3952_v17  ;;  %1266 = vmatprep.subr.bf16.mxu1 %v3977_v24 }
 0x1ac   :  { %1226 = vmatpush1.bf16.msra.mxu0 %v3959_v19  ;;  %1267 = vmatpush1.bf16.msra.mxu1 %v3984_v26 }
 0x1ad   :  { %1227 = vmatprep.subr.bf16.mxu0 %v3965_v21  ;;  %1268 = vmatprep.subr.bf16.mxu1 %v3990_v28 }
 0x1b0   :  { %1228 = vmatpush1.bf16.msra.mxu0 %v3973_v23  ;;  %1269 = vmatpush1.bf16.msra.mxu1 %v3994_v30 }
 0x1b1   :  { %1229 = vmatprep.subr.bf16.mxu0 %v3979_v25  ;;  %1270 = vmatprep.subr.bf16.mxu1 %v3998_v32 }
 0x1b4   :  { %1230 = vmatpush1.bf16.msra.mxu0 %v3986_v27  ;;  %1271 = vmatpush1.bf16.msra.mxu1 %v4006_v34  ;;  %v695_v34 = vrot.slane %v4107_v60, 6  ;;  %v767_v60 = vld [vmem:[%s5534_s5] sm:$0xf] }
 0x1b5   :  { %1231 = vmatprep.subr.bf16.mxu0 %v3992_v29  ;;  %1272 = vmatprep.subr.bf16.mxu1 %v4010_v36 }
 0x1b8   :  { %1232 = vmatpush1.bf16.msra.mxu0 %v3996_v31  ;;  %1273 = vmatpush1.bf16.msra.mxu1 %v4016_v37 }
 0x1b9   :  { %1233 = vmatprep.subr.bf16.mxu0 %v4000_v33  ;;  %1274 = vmatprep.subr.bf16.mxu1 %v4018_v38 }
 0x1bc   :  { %1234 = vmatpush1.bf16.msra.mxu0 %v4008_v35  ;;  %1275 = vmatpush1.bf16.msra.mxu1 %v4024_v39 }
 0x1bd   :  { %1351 = vmatprep.subr.bf16.mxu0 %v4064_v40  ;;  %1392 = vmatprep.subr.bf16.mxu1 %v4066_v41 }
 0x232   :  { %v611_v5 = vpop.f32.mrb[4].mxu0  ;;  %v652_v6 = vpop.f32.mrb[12].mxu1 }
 0x233   :  { %v663_v8 = vrot.slane %v611_v5, 6  ;;  %v613_v10 = vpop.f32.mrb[5].mxu0  ;;  %v654_v12 = vpop.f32.mrb[13].mxu1  ;;  %v665_v22 = vrot.slane %v652_v6, 6 }
 0x234   :  { %v664_v13 = vrot.slane %v613_v10, 6  ;;  %v615_v14 = vpop.f32.mrb[6].mxu0  ;;  %v656_v15 = vpop.f32.mrb[14].mxu1  ;;  %v666_v23 = vrot.slane %v654_v12, 6 }
 0x235   :  { %v671_v16 = vadd.f32 %v663_v8, %v4095_v3  ;;  %v616_v17 = vpop.f32.mrb[7].mxu0  ;;  %v657_v18 = vpop.f32.mrb[15].mxu1  ;;  %v673_v24 = vadd.f32 %v665_v22, %v4101_v61  ;;  %v5901_v15 = vsub.s32 1, %v4070_v43 }
 0x236   :  { %v672_v19 = vadd.f32 %v664_v13, %v4097_v4  ;;  %v674_v25 = vadd.f32 %v666_v23, %v4104_v50  ;;  %v5899_v13 = vsub.s32 0, %v4070_v43 }
 0x237   :  { %v2916_v20 = vmul.f32 -1.442695, %v671_v16  ;;  %v2918_v26 = vmul.f32 -1.442695, %v673_v24  ;;  %v4369_v16 = vrot.slane %v767_v60, %v5901_v15  ;;  %v5916_v15 = vld [vmem:[#allocation25_spill] sm:$0xff] }
 0x238   :  { %v2917_v21 = vmul.f32 -1.442695, %v672_v19  ;;  %v4365_v14 = vrot.slane %v767_v60, %v5899_v13  ;;  %v5915_v13 = vld [vmem:[#allocation24_spill] sm:$0xff] }
 0x239   :  { %3274 = vpow2.f32 %v2916_v20  ;;  %5902 = vst [vmem:[#allocation64_spill] sm:$0xff] %v4369_v16 }
 0x23a   :  { %3276 = vpow2.f32 %v2917_v21  ;;  %5900 = vst [vmem:[#allocation63_spill] sm:$0xff] %v4365_v14 }
 0x23b   :  { %3278 = vtanh.f32 %v674_v25 }
 0x23c   :  { %3280 = vpow2.f32 %v2918_v26 }
 0x243   :  { %v3275_v27 = vpop.eup %3274 }
 0x244   :  { %v684_v28 = vadd.f32 1.0, %v3275_v27  ;;  %v3277_v29 = vpop.eup %3276 }
 0x245   :  { %v685_v30 = vadd.f32 1.0, %v3277_v29  ;;  %v3279_v31 = vpop.eup %3278  ;;  %v5903_v29 = vld [vmem:[#allocation16_spill] sm:$0xff] }
 0x246   :  { %3282 = vrcp.f32 %v684_v28  ;;  %v3281_v32 = vpop.eup %3280 }
 0x247   :  { %3284 = vrcp.f32 %v685_v30  ;;  %v686_v37 = vadd.f32 1.0, %v3281_v32  ;;  %v5904_v30 = vld [vmem:[#allocation17_spill] sm:$0xff] }
 0x249   :  { %3286 = vrcp.f32 %v686_v37  ;;  %v5911_v37 = vld [vmem:[#allocation20_spill] sm:$0xff] }
 0x250   :  { %v3283_v33 = vpop.eup %3282 }
 0x251   :  { %v698_v35 = vmul.f32 %v3283_v33, %v3279_v31  ;;  %v3285_v36 = vpop.eup %3284  ;;  %v5905_v31 = vsub.s32 2, %v4070_v43  ;;  %v5907_v33 = vld [vmem:[#allocation18_spill] sm:$0xff] }
 0x252   :  { %v697_v38 = vmul.f32 %v3285_v36, %v695_v34  ;;  %v5908_v34 = vld [vmem:[#allocation19_spill] sm:$0xff] }
 0x253   :  { %v3287_v5 = vpop.eup %3286  ;;  %v4383_v32 = vrot.slane %v767_v60, %v5905_v31  ;;  %v5926_v31 = vld [vmem:[#allocation35_spill] sm:$0xff] }
 0x254   :  { %v4345_v7 = vadd.f32 %v698_v35, %v697_v38  ;;  %v5909_v35 = vsub.s32 3, %v4070_v43  ;;  %v5912_v38 = vld [vmem:[#allocation21_spill] sm:$0xff] }
 0x255   :  { %5906 = vst [vmem:[#allocation16_spill] sm:$0xff] %v4383_v32 }
 0x256   :  { %3288 = vtanh.f32 %v4345_v7  ;;  %v4389_v36 = vrot.slane %v767_v60, %v5909_v35  ;;  %v5917_v60 = vld [vmem:[#allocation26_spill] sm:$0xff]  ;;  %v5927_v35 = vld [vmem:[#allocation36_spill] sm:$0xff] }
 0x258   :  { %5910 = vst [vmem:[#allocation17_spill] sm:$0xff] %v4389_v36 }
 0x260   :  { %v3289_v6 = vpop.eup %3288 }
 0x261   :  { %v701_v8 = vmul.f32 %v3289_v6, %v3287_v5  ;;  %v5913_v6 = vld [vmem:[#allocation22_spill] sm:$0xff] }
 0x263   :  { %v1215_v10 = vpack.c.bf16 %v701_v8, %v701_v8  ;;  %v5914_v8 = vld [vmem:[#allocation23_spill] sm:$0xff] }
 0x265   :  { %v4348_v12 = vrot.slane %v1215_v10, 1 }
 0x267   :  { %1252 = vmatmul.mubr.bf16.vlgmr.msra.gmra.mrb[12].mxu0 %v4348_v12  ;;  %1293 = vmatmul.mubr.bf16.vlgmr.msra.gmra.mrb[20].mxu1 %v4348_v12 }
 0x268   :  { %1352 = vmatpush1.bf16.msra.mxu0 %v4110_v48  ;;  %1393 = vmatpush1.bf16.msra.mxu1 %v4112_v55 }
 0x269   :  { %1353 = vmatprep.subr.bf16.mxu0 %v4116_v11  ;;  %1394 = vmatprep.subr.bf16.mxu1 %v4118_v51 }
 0x26c   :  { %1354 = vmatpush1.bf16.msra.mxu0 %v4124_v9  ;;  %1395 = vmatpush1.bf16.msra.mxu1 %v4126_v0 }
 0x26d   :  { %1355 = vmatprep.subr.bf16.mxu0 %v4130_v56  ;;  %1396 = vmatprep.subr.bf16.mxu1 %v4132_v59 }
 0x270   :  { %1356 = vmatpush1.bf16.msra.mxu0 %v4138_v53  ;;  %1397 = vmatpush1.bf16.msra.mxu1 %v4140_v45 }
 0x271   :  { %1357 = vmatprep.subr.bf16.mxu0 %v4144_v63  ;;  %1398 = vmatprep.subr.bf16.mxu1 %v4146_v58 }
 0x272   :  { %v1143_v17 = vpop.f32.mrb[8].mxu0  ;;  %v1184_v18 = vpop.f32.mrb[16].mxu1 }
 0x273   :  { %v1144_v19 = vadd.f32 %v1143_v17, %v4365_v14  ;;  %v1145_v20 = vpop.f32.mrb[9].mxu0  ;;  %v1186_v21 = vpop.f32.mrb[17].mxu1  ;;  %v1185_v5 = vadd.f32 %v1184_v18, %v4383_v32  ;;  %v5920_v18 = vld [vmem:[#allocation29_spill] sm:$0xff] }
 0x274   :  { %v1146_v22 = vadd.f32 %v1145_v20, %v4369_v16  ;;  %v1147_v23 = vpop.f32.mrb[10].mxu0  ;;  %v1188_v24 = vpop.f32.mrb[18].mxu1  ;;  %1358 = vmatpush1.bf16.msra.mxu0 %v4150_v57  ;;  %1399 = vmatpush1.bf16.msra.mxu1 %v4152_v46  ;;  %v1187_v10 = vadd.f32 %v1186_v21, %v4389_v36 }
 0x275   :  { %v2983_v25 = vmul.f32 -1.442695, %v1144_v19  ;;  %v1148_v26 = vpop.f32.mrb[11].mxu0  ;;  %v1189_v27 = vpop.f32.mrb[19].mxu1  ;;  %1359 = vmatprep.subr.bf16.mxu0 %v5903_v29  ;;  %1400 = vmatprep.subr.bf16.mxu1 %v5904_v30  ;;  %v2985_v17 = vmul.f32 -1.442695, %v1185_v5 }
 0x276   :  { %v2984_v28 = vmul.f32 -1.442695, %v1146_v22  ;;  %v5918_v19 = vld [vmem:[#allocation27_spill] sm:$0xff]  ;;  %v5919_v22 = vld [vmem:[#allocation28_spill] sm:$0xff]  ;;  %v5921_v24 = vld [vmem:[#allocation30_spill] sm:$0xff] }
 0x277   :  { %3290 = vpow2.f32 %v2983_v25  ;;  %v5922_v25 = vld [vmem:[#allocation31_spill] sm:$0xff]  ;;  %v5923_v26 = vld [vmem:[#allocation32_spill] sm:$0xff]  ;;  %v5924_v27 = vld [vmem:[#allocation33_spill] sm:$0xff] }
 0x278   :  { %3292 = vpow2.f32 %v2984_v28  ;;  %1360 = vmatpush1.bf16.msra.mxu0 %v5907_v33  ;;  %1401 = vmatpush1.bf16.msra.mxu1 %v5908_v34  ;;  %v5925_v28 = vld [vmem:[#allocation34_spill] sm:$0xff]  ;;  %v5928_v5 = vld [vmem:[#allocation37_spill] sm:$0xff] }
 0x279   :  { %1361 = vmatprep.subr.bf16.mxu0 %v5911_v37  ;;  %1402 = vmatprep.subr.bf16.mxu1 %v5912_v38  ;;  %3294 = vtanh.f32 %v1187_v10 }
 0x27a   :  { %3296 = vpow2.f32 %v2985_v17 }
 0x27c   :  { %1362 = vmatpush1.bf16.msra.mxu0 %v5913_v6  ;;  %1403 = vmatpush1.bf16.msra.mxu1 %v5914_v8 }
 0x27d   :  { %1363 = vmatprep.subr.bf16.mxu0 %v5915_v13  ;;  %1404 = vmatprep.subr.bf16.mxu1 %v5916_v15 }
 0x280   :  { %1364 = vmatpush1.bf16.msra.mxu0 %v5917_v60  ;;  %1405 = vmatpush1.bf16.msra.mxu1 %v5918_v19 }
 0x281   :  { %v3291_v43 = vpop.eup %3290  ;;  %1365 = vmatprep.subr.bf16.mxu0 %v5919_v22  ;;  %1406 = vmatprep.subr.bf16.mxu1 %v5920_v18  ;;  %v5936_v18 = vld [vmem:[#allocation45_spill] sm:$0xff] }
 0x282   :  { %v1200_v20 = vadd.f32 1.0, %v3291_v43  ;;  %v3293_v23 = vpop.eup %3292  ;;  %v5929_v43 = vld [vmem:[#allocation38_spill] sm:$0xff] }
 0x283   :  { %v1201_v21 = vadd.f32 1.0, %v3293_v23  ;;  %v3295_v10 = vpop.eup %3294 }
 0x284   :  { %3298 = vrcp.f32 %v1200_v20  ;;  %1366 = vmatpush1.bf16.msra.mxu0 %v5921_v24  ;;  %1407 = vmatpush1.bf16.msra.mxu1 %v5922_v25  ;;  %v3297_v17 = vpop.eup %3296  ;;  %v5930_v20 = vld [vmem:[#allocation39_spill] sm:$0xff] }
 0x285   :  { %3300 = vrcp.f32 %v1201_v21  ;;  %1367 = vmatprep.subr.bf16.mxu0 %v5923_v26  ;;  %1408 = vmatprep.subr.bf16.mxu1 %v5924_v27  ;;  %v5931_v21 = vld [vmem:[#allocation40_spill] sm:$0xff]  ;;  %v5932_v26 = vld [vmem:[#allocation41_spill] sm:$0xff] }
 0x288   :  { %1368 = vmatpush1.bf16.msra.mxu0 %v5925_v28  ;;  %1409 = vmatpush1.bf16.msra.mxu1 %v5926_v31  ;;  %v1202_v28 = vadd.f32 1.0, %v3297_v17  ;;  %v5933_v31 = vld [vmem:[#allocation42_spill] sm:$0xff] }
 0x289   :  { %1369 = vmatprep.subr.bf16.mxu0 %v5927_v35  ;;  %1410 = vmatprep.subr.bf16.mxu1 %v5928_v5  ;;  %v5934_v35 = vld [vmem:[#allocation43_spill] sm:$0xff]  ;;  %v5935_v5 = vld [vmem:[#allocation44_spill] sm:$0xff]  ;;  %v5941_v17 = vld [vmem:[#allocation50_spill] sm:$0xff] }
 0x28a   :  { %3302 = vrcp.f32 %v1202_v28 }
 0x28c   :  { %1370 = vmatpush1.bf16.msra.mxu0 %v5929_v43  ;;  %1411 = vmatpush1.bf16.msra.mxu1 %v5930_v20 }
 0x28d   :  { %1371 = vmatprep.subr.bf16.mxu0 %v5931_v21  ;;  %1412 = vmatprep.subr.bf16.mxu1 %v5932_v26  ;;  %v5937_v21 = vld [vmem:[#allocation46_spill] sm:$0xff]  ;;  %v5938_v26 = vld [vmem:[#allocation47_spill] sm:$0xff] }
 0x28e   :  { %v3299_v23 = vpop.eup %3298 }
 0x28f   :  { %v1211_v27 = vmul.f32 %v3299_v23, %v3295_v10  ;;  %v3301_v25 = vpop.eup %3300  ;;  %v5939_v10 = vld [vmem:[#allocation48_spill] sm:$0xff]  ;;  %v5942_v23 = vld [vmem:[#allocation51_spill] sm:$0xff] }
 0x290   :  { %v1210_v24 = vmul.f32 0.0, %v3301_v25  ;;  %1372 = vmatpush1.bf16.msra.mxu0 %v5933_v31  ;;  %1413 = vmatpush1.bf16.msra.mxu1 %v5934_v35  ;;  %v5940_v25 = vld [vmem:[#allocation49_spill] sm:$0xff] }
 0x291   :  { %1373 = vmatprep.subr.bf16.mxu0 %v5935_v5  ;;  %1414 = vmatprep.subr.bf16.mxu1 %v5936_v18  ;;  %v5943_v5 = vld [vmem:[#allocation52_spill] sm:$0xff]  ;;  %v5944_v18 = vld [vmem:[#allocation53_spill] sm:$0xff] }
 0x292   :  { %v4419_v43 = vadd.f32 %v1211_v27, %v1210_v24  ;;  %v5945_v24 = vld [vmem:[#allocation54_spill] sm:$0xff] }
 0x294   :  { %3304 = vtanh.f32 %v4419_v43  ;;  %1374 = vmatpush1.bf16.msra.mxu0 %v5937_v21  ;;  %1415 = vmatpush1.bf16.msra.mxu1 %v5938_v26  ;;  %v3303_v27 = vpop.eup %3302 }
 0x295   :  { %1375 = vmatprep.subr.bf16.mxu0 %v5939_v10  ;;  %1416 = vmatprep.subr.bf16.mxu1 %v5940_v25 }
 0x298   :  { %1376 = vmatpush1.bf16.msra.mxu0 %v5941_v17  ;;  %1417 = vmatpush1.bf16.msra.mxu1 %v5942_v23 }
 0x299   :  { %1377 = vmatprep.subr.bf16.mxu0 %v5943_v5  ;;  %1418 = vmatprep.subr.bf16.mxu1 %v5944_v18  ;;  %v5946_v5 = vld [vmem:[#allocation60_spill] sm:$0xff] }
 0x29c   :  { %1378 = vmatpush1.bf16.msra.mxu0 %v5945_v24  ;;  %1419 = vmatpush1.bf16.msra.mxu1 %v4272_v44 }
 0x29d   :  { %1379 = vmatprep.subr.bf16.mxu0 %v4276_v1  ;;  %1420 = vmatprep.subr.bf16.mxu1 %v4278_v2  ;;  %v4440_v1 = vld [vmem:[#allocation2 + $0x4] ss:$16 sps:$4 sm:$0xff]  }
 0x29e   :  { %v3305_v28 = vpop.eup %3304  ;;  %5947 = vst [vmem:[#allocation18_spill] sm:$0xff] %v4440_v1 }
 0x29f   :  { %v1214_v10 = vmul.f32 %v3305_v28, %v3303_v27  ;;  %v4443_v27 = vld [vmem:[#allocation2 + $0xc] ss:$16 sps:$4 sm:$0xff]  }
 0x2a0   :  { %1380 = vmatpush1.bf16.msra.mxu0 %v4282_v62  ;;  %1421 = vmatpush1.bf16.msra.mxu1 %v4284_v54  ;;  %5948 = vst [vmem:[#allocation19_spill] sm:$0xff] %v4443_v27  ;;  %v4457_v28 = vld [vmem:[#allocation2 + $0x2c] ss:$16 sps:$4 sm:$0xff]  }
 0x2a1   :  { %1381 = vmatprep.subr.bf16.mxu0 %v4288_v52  ;;  %1422 = vmatprep.subr.bf16.mxu1 %v5946_v5  ;;  %v1345_v18 = vrot.slane %v1214_v10, 6  ;;  %v4451_v10 = vld [vmem:[#allocation2 + $0x8] ss:$16 sps:$4 sm:$0xff]   ;;  %5952 = vst [vmem:[#allocation23_spill] sm:$0xff] %v4457_v28 }
 0x2a2   :  { %5950 = vst [vmem:[#allocation21_spill] sm:$0xff] %v4451_v10 }
 0x2a3   :  { %v1347_v23 = vpack.c.bf16 %v1345_v18, %v1345_v18  ;;  %v4448_v18 = vld [vmem:[#allocation2] ss:$16 sps:$4 sm:$0xff]  }
 0x2a4   :  { %1382 = vmatpush1.bf16.msra.mxu0 %v4294_v42  ;;  %1423 = vmatpush1.bf16.msra.mxu1 %v4296_v47  ;;  %5949 = vst [vmem:[#allocation20_spill] sm:$0xff] %v4448_v18 }
 0x2a5   :  { %v1349_v44 = vrot.slane %v1347_v23, 1  ;;  %1461 = vmatprep.subr.bf16.mxu0 %v4440_v1  ;;  %1502 = vmatprep.subr.bf16.mxu1 %v4443_v27  ;;  %v4454_v23 = vld [vmem:[#allocation2 + $0x24] ss:$16 sps:$4 sm:$0xff]  }
 0x2a6   :  { %5951 = vst [vmem:[#allocation22_spill] sm:$0xff] %v4454_v23 }
 0x2a7   :  { %1383 = vmatprep.mubr.bf16.mxu0 %v1349_v44  ;;  %1424 = vmatprep.mubr.bf16.mxu1 %v1349_v44  ;;  %v4462_v44 = vld [vmem:[#allocation2 + $0x20] ss:$16 sps:$4 sm:$0xff]  }
 0x2a8   :  { %1384 = vmatmul.mubr.bf16.vlgmr.msra.gmra.mrb[16].mxu0 %v4348_v12  ;;  %1425 = vmatmul.mubr.bf16.vlgmr.msra.gmra.mrb[24].mxu1 %v4348_v12  ;;  %5953 = vst [vmem:[#allocation24_spill] sm:$0xff] %v4462_v44  ;;  %v4465_v12 = vld [vmem:[#allocation2 + $0x28] ss:$16 sps:$4 sm:$0xff]  }
 0x2a9   :  { %1462 = vmatpush1.bf16.msra.mxu0 %v4448_v18  ;;  %1503 = vmatpush1.bf16.msra.mxu1 %v4451_v10  ;;  %5954 = vst [vmem:[#allocation25_spill] sm:$0xff] %v4465_v12  ;;  %v4468_v10 = vld [vmem:[#allocation2 + $0x44] ss:$16 sps:$4 sm:$0xff]  }
 0x2aa   :  { %1463 = vmatprep.subr.bf16.mxu0 %v4454_v23  ;;  %1504 = vmatprep.subr.bf16.mxu1 %v4457_v28  ;;  %5955 = vst [vmem:[#allocation26_spill] sm:$0xff] %v4468_v10  ;;  %v4471_v23 = vld [vmem:[#allocation2 + $0x4c] ss:$16 sps:$4 sm:$0xff]   ;;  %v4474_v28 = vld [vmem:[#allocation2 + $0x40] ss:$16 sps:$4 sm:$0xff]  }
 0x2ab   :  { %1493 = vmatprep.mubr.bf16.mxu0 %v5898_v49  ;;  %1534 = vmatprep.mubr.bf16.mxu1 %v5898_v49  ;;  %5956 = vst [vmem:[#allocation27_spill] sm:$0xff] %v4471_v23  ;;  %5957 = vst [vmem:[#allocation28_spill] sm:$0xff] %v4474_v28  ;;  %v4477_v49 = vld [vmem:[#allocation2 + $0x48] ss:$16 sps:$4 sm:$0xff]  }
 0x2ac   :  { %5958 = vst [vmem:[#allocation39_spill] sm:$0xff] %v4477_v49 }
 0x2ad   :  { %1464 = vmatpush1.bf16.msra.mxu0 %v4462_v44  ;;  %1505 = vmatpush1.bf16.msra.mxu1 %v4465_v12  ;;  %v4480_v44 = vld [vmem:[#allocation2 + $0x64] ss:$16 sps:$4 sm:$0xff]   ;;  %v4483_v12 = vld [vmem:[#allocation2 + $0x6c] ss:$16 sps:$4 sm:$0xff]  }
 0x2ae   :  { %1465 = vmatprep.subr.bf16.mxu0 %v4468_v10  ;;  %1506 = vmatprep.subr.bf16.mxu1 %v4471_v23  ;;  %5959 = vst [vmem:[#allocation42_spill] sm:$0xff] %v4480_v44  ;;  %5960 = vst [vmem:[#allocation43_spill] sm:$0xff] %v4483_v12  ;;  %v4486_v10 = vld [vmem:[#allocation2 + $0x60] ss:$16 sps:$4 sm:$0xff]   ;;  %v4489_v23 = vld [vmem:[#allocation2 + $0x68] ss:$16 sps:$4 sm:$0xff]  }
 0x2af   :  { %5961 = vst [vmem:[#allocation46_spill] sm:$0xff] %v4486_v10  ;;  %5962 = vst [vmem:[#allocation47_spill] sm:$0xff] %v4489_v23 }
 0x2b1   :  { %1466 = vmatpush1.bf16.msra.mxu0 %v4474_v28  ;;  %1507 = vmatpush1.bf16.msra.mxu1 %v4477_v49  ;;  %v4492_v28 = vld [vmem:[#allocation2 + $0x84] ss:$16 sps:$4 sm:$0xff]   ;;  %v4495_v49 = vld [vmem:[#allocation2 + $0x8c] ss:$16 sps:$4 sm:$0xff]  }
 0x2b2   :  { %1467 = vmatprep.subr.bf16.mxu0 %v4480_v44  ;;  %1508 = vmatprep.subr.bf16.mxu1 %v4483_v12  ;;  %5963 = vst [vmem:[#allocation49_spill] sm:$0xff] %v4492_v28  ;;  %5964 = vst [vmem:[#allocation50_spill] sm:$0xff] %v4495_v49  ;;  %v4498_v44 = vld [vmem:[#allocation2 + $0x80] ss:$16 sps:$4 sm:$0xff]   ;;  %v4501_v12 = vld [vmem:[#allocation2 + $0x88] ss:$16 sps:$4 sm:$0xff]  }
 0x2b3   :  { %5965 = vst [vmem:[#allocation54_spill] sm:$0xff] %v4498_v44  ;;  %5966 = vst [vmem:[#allocation65_spill] sm:$0xff] %v4501_v12 }
 0x2b5   :  { %1468 = vmatpush1.bf16.msra.mxu0 %v4486_v10  ;;  %1509 = vmatpush1.bf16.msra.mxu1 %v4489_v23  ;;  %v4504_v10 = vld [vmem:[#allocation2 + $0xa4] ss:$16 sps:$4 sm:$0xff]   ;;  %v4507_v23 = vld [vmem:[#allocation2 + $0xac] ss:$16 sps:$4 sm:$0xff]  }
 0x2b6   :  { %1469 = vmatprep.subr.bf16.mxu0 %v4492_v28  ;;  %1510 = vmatprep.subr.bf16.mxu1 %v4495_v49  ;;  %5967 = vst [vmem:[#allocation66_spill] sm:$0xff] %v4504_v10  ;;  %5968 = vst [vmem:[#allocation67_spill] sm:$0xff] %v4507_v23  ;;  %v4510_v28 = vld [vmem:[#allocation2 + $0xa0] ss:$16 sps:$4 sm:$0xff]   ;;  %v4513_v49 = vld [vmem:[#allocation2 + $0xa8] ss:$16 sps:$4 sm:$0xff]  }
 0x2b7   :  { %5969 = vst [vmem:[#allocation68_spill] sm:$0xff] %v4510_v28  ;;  %5970 = vst [vmem:[#allocation69_spill] sm:$0xff] %v4513_v49 }
 0x2b9   :  { %1470 = vmatpush1.bf16.msra.mxu0 %v4498_v44  ;;  %1511 = vmatpush1.bf16.msra.mxu1 %v4501_v12  ;;  %v4516_v44 = vld [vmem:[#allocation2 + $0xc4] ss:$16 sps:$4 sm:$0xff]   ;;  %v4519_v12 = vld [vmem:[#allocation2 + $0xcc] ss:$16 sps:$4 sm:$0xff]  }
 0x2ba   :  { %1471 = vmatprep.subr.bf16.mxu0 %v4504_v10  ;;  %1512 = vmatprep.subr.bf16.mxu1 %v4507_v23  ;;  %5971 = vst [vmem:[#allocation70_spill] sm:$0xff] %v4516_v44  ;;  %5972 = vst [vmem:[#allocation71_spill] sm:$0xff] %v4519_v12  ;;  %v4522_v10 = vld [vmem:[#allocation2 + $0xc0] ss:$16 sps:$4 sm:$0xff]   ;;  %v4525_v23 = vld [vmem:[#allocation2 + $0xc8] ss:$16 sps:$4 sm:$0xff]  }
 0x2bb   :  { %5973 = vst [vmem:[#allocation72_spill] sm:$0xff] %v4522_v10  ;;  %5974 = vst [vmem:[#allocation73_spill] sm:$0xff] %v4525_v23 }
 0x2bd   :  { %1472 = vmatpush1.bf16.msra.mxu0 %v4510_v28  ;;  %1513 = vmatpush1.bf16.msra.mxu1 %v4513_v49  ;;  %v4528_v28 = vld [vmem:[#allocation2 + $0xe4] ss:$16 sps:$4 sm:$0xff]   ;;  %v4531_v49 = vld [vmem:[#allocation2 + $0xec] ss:$16 sps:$4 sm:$0xff]  }
 0x2be   :  { %1473 = vmatprep.subr.bf16.mxu0 %v4516_v44  ;;  %1514 = vmatprep.subr.bf16.mxu1 %v4519_v12  ;;  %5975 = vst [vmem:[#allocation74_spill] sm:$0xff] %v4528_v28  ;;  %5976 = vst [vmem:[#allocation75_spill] sm:$0xff] %v4531_v49  ;;  %v4534_v44 = vld [vmem:[#allocation2 + $0xe0] ss:$16 sps:$4 sm:$0xff]  }
 0x2bf   :  { %5977 = vst [vmem:[#allocation76_spill] sm:$0xff] %v4534_v44 }
 0x2c1   :  { %1474 = vmatpush1.bf16.msra.mxu0 %v4522_v10  ;;  %1515 = vmatpush1.bf16.msra.mxu1 %v4525_v23 }
 0x2c2   :  { %1475 = vmatprep.subr.bf16.mxu0 %v4528_v28  ;;  %1516 = vmatprep.subr.bf16.mxu1 %v4531_v49 }
 0x2c5   :  { %1476 = vmatpush1.bf16.msra.mxu0 %v4534_v44  ;;  %1517 = vmatpush1.bf16.msra.mxu1 %v4024_v39 }
 0x2c6   :  { %1593 = vmatprep.subr.bf16.mxu0 %v4064_v40  ;;  %1634 = vmatprep.subr.bf16.mxu1 %v4066_v41 }
 0x33a   :  { %v1253_v10 = vpop.f32.mrb[12].mxu0  ;;  %v1294_v23 = vpop.f32.mrb[20].mxu1 }
 0x33b   :  { %v1305_v12 = vrot.slane %v1253_v10, 4  ;;  %v1255_v18 = vpop.f32.mrb[13].mxu0  ;;  %v1296_v27 = vpop.f32.mrb[21].mxu1  ;;  %v1307_v40 = vrot.slane %v1294_v23, 4 }
 0x33c   :  { %v1306_v28 = vrot.slane %v1255_v18, 4  ;;  %v1257_v1 = vpop.f32.mrb[14].mxu0  ;;  %v1298_v47 = vpop.f32.mrb[22].mxu1  ;;  %v1308_v41 = vrot.slane %v1296_v27, 4 }
 0x33d   :  { %v1313_v49 = vadd.f32 %v1305_v12, %v4095_v3  ;;  %v1258_v42 = vpop.f32.mrb[15].mxu0  ;;  %v1299_v5 = vpop.f32.mrb[23].mxu1  ;;  %v1315_v54 = vadd.f32 %v1307_v40, %v4101_v61 }
 0x33e   :  { %v1314_v44 = vadd.f32 %v1306_v28, %v4097_v4  ;;  %v1316_v10 = vadd.f32 %v1308_v41, %v4104_v50 }
 0x33f   :  { %v2986_v52 = vmul.f32 -1.442695, %v1313_v49  ;;  %v2988_v62 = vmul.f32 -1.442695, %v1315_v54 }
 0x340   :  { %v2987_v39 = vmul.f32 -1.442695, %v1314_v44 }
 0x341   :  { %3306 = vpow2.f32 %v2986_v52  ;;  %v1337_v52 = vrot.slane %v4345_v7, 6 }
 0x342   :  { %3308 = vpow2.f32 %v2987_v39 }
 0x343   :  { %3310 = vtanh.f32 %v1316_v10 }
 0x344   :  { %3312 = vpow2.f32 %v2988_v62 }
 0x34b   :  { %v3307_v18 = vpop.eup %3306 }
 0x34c   :  { %v1326_v1 = vadd.f32 1.0, %v3307_v18  ;;  %v3309_v47 = vpop.eup %3308 }
 0x34d   :  { %v1327_v42 = vadd.f32 1.0, %v3309_v47  ;;  %v3311_v5 = vpop.eup %3310 }
 0x34e   :  { %3314 = vrcp.f32 %v1326_v1  ;;  %v3313_v49 = vpop.eup %3312  ;;  %v5987_v1 = vld [vmem:[#allocation38_spill] sm:$0xff] }
 0x34f   :  { %3316 = vrcp.f32 %v1327_v42  ;;  %v1328_v44 = vadd.f32 1.0, %v3313_v49  ;;  %v5988_v42 = vld [vmem:[#allocation40_spill] sm:$0xff] }
 0x351   :  { %3318 = vrcp.f32 %v1328_v44  ;;  %v5990_v44 = vld [vmem:[#allocation44_spill] sm:$0xff] }
 0x358   :  { %v3315_v28 = vpop.eup %3314 }
 0x359   :  { %v1340_v23 = vmul.f32 %v3315_v28, %v3311_v5  ;;  %v3317_v27 = vpop.eup %3316  ;;  %v5989_v5 = vld [vmem:[#allocation41_spill] sm:$0xff] }
 0x35a   :  { %v1339_v12 = vmul.f32 %v3317_v27, %v1337_v52 }
 0x35b   :  { %v3319_v54 = vpop.eup %3318 }
 0x35c   :  { %v4545_v39 = vadd.f32 %v1340_v23, %v1339_v12  ;;  %v5991_v12 = vld [vmem:[#allocation45_spill] sm:$0xff] }
 0x35e   :  { %3320 = vtanh.f32 %v4545_v39 }
 0x368   :  { %v3321_v40 = vpop.eup %3320 }
 0x369   :  { %v1343_v62 = vmul.f32 %v3321_v40, %v3319_v54  ;;  %v5992_v54 = vld [vmem:[#allocation48_spill] sm:$0xff]  ;;  %v5996_v40 = vld [vmem:[#allocation55_spill] sm:$0xff] }
 0x36b   :  { %v1457_v41 = vpack.c.bf16 %v1343_v62, %v1343_v62 }
 0x36d   :  { %v4548_v10 = vrot.slane %v1457_v41, 2  ;;  %v5998_v41 = vld [vmem:[#allocation57_spill] sm:$0xff] }
 0x36f   :  { %1494 = vmatmul.mubr.bf16.vlgmr.msra.gmra.mrb[20].mxu0 %v4548_v10  ;;  %1535 = vmatmul.mubr.bf16.vlgmr.msra.gmra.mrb[28].mxu1 %v4548_v10 }
 0x370   :  { %1594 = vmatpush1.bf16.msra.mxu0 %v4110_v48  ;;  %1635 = vmatpush1.bf16.msra.mxu1 %v4112_v55 }
 0x371   :  { %1595 = vmatprep.subr.bf16.mxu0 %v4116_v11  ;;  %1636 = vmatprep.subr.bf16.mxu1 %v4118_v51 }
 0x374   :  { %1596 = vmatpush1.bf16.msra.mxu0 %v4124_v9  ;;  %1637 = vmatpush1.bf16.msra.mxu1 %v4126_v0 }
 0x375   :  { %1597 = vmatprep.subr.bf16.mxu0 %v4130_v56  ;;  %1638 = vmatprep.subr.bf16.mxu1 %v4132_v59 }
 0x378   :  { %1598 = vmatpush1.bf16.msra.mxu0 %v4138_v53  ;;  %1639 = vmatpush1.bf16.msra.mxu1 %v4140_v45 }
 0x379   :  { %1599 = vmatprep.subr.bf16.mxu0 %v4144_v63  ;;  %1640 = vmatprep.subr.bf16.mxu1 %v4146_v58 }
 0x37b   :  { %v1385_v48 = vpop.f32.mrb[16].mxu0  ;;  %v1426_v55 = vpop.f32.mrb[24].mxu1 }
 0x37c   :  { %v1386_v11 = vadd.f32 %v1385_v48, %v4365_v14  ;;  %v1387_v51 = vpop.f32.mrb[17].mxu0  ;;  %v1428_v9 = vpop.f32.mrb[25].mxu1  ;;  %1600 = vmatpush1.bf16.msra.mxu0 %v4150_v57  ;;  %1641 = vmatpush1.bf16.msra.mxu1 %v4152_v46  ;;  %v1427_v58 = vadd.f32 %v1426_v55, %v4383_v32  ;;  %v6000_v48 = vld [vmem:[#allocation59_spill] sm:$0xff]  ;;  %v6001_v55 = vld [vmem:[#allocation60_spill] sm:$0xff] }
 0x37d   :  { %v1388_v0 = vadd.f32 %v1387_v51, %v4369_v16  ;;  %v1389_v7 = vpop.f32.mrb[18].mxu0  ;;  %v1430_v56 = vpop.f32.mrb[26].mxu1  ;;  %1601 = vmatprep.subr.bf16.mxu0 %v5903_v29  ;;  %1642 = vmatprep.subr.bf16.mxu1 %v5904_v30  ;;  %v1429_v57 = vadd.f32 %v1428_v9, %v4389_v36  ;;  %v5978_v30 = vld [vmem:[#allocation29_spill] sm:$0xff] }
 0x37e   :  { %v2989_v59 = vmul.f32 -1.442695, %v1386_v11  ;;  %v1390_v53 = vpop.f32.mrb[19].mxu0  ;;  %v1431_v45 = vpop.f32.mrb[27].mxu1  ;;  %v2991_v46 = vmul.f32 -1.442695, %v1427_v58 }
 0x37f   :  { %v2990_v63 = vmul.f32 -1.442695, %v1388_v0  ;;  %v6002_v51 = vld [vmem:[#allocation61_spill] sm:$0xff]  ;;  %v6004_v0 = vld [vmem:[#allocation18_spill] sm:$0xff]  ;;  %v6006_v56 = vld [vmem:[#allocation20_spill] sm:$0xff] }
 0x380   :  { %3322 = vpow2.f32 %v2989_v59  ;;  %1602 = vmatpush1.bf16.msra.mxu0 %v5907_v33  ;;  %1643 = vmatpush1.bf16.msra.mxu1 %v5908_v34  ;;  %v6007_v59 = vld [vmem:[#allocation21_spill] sm:$0xff]  ;;  %v6008_v53 = vld [vmem:[#allocation22_spill] sm:$0xff]  ;;  %v6009_v45 = vld [vmem:[#allocation23_spill] sm:$0xff] }
 0x381   :  { %3324 = vpow2.f32 %v2990_v63  ;;  %1603 = vmatprep.subr.bf16.mxu0 %v5911_v37  ;;  %1644 = vmatprep.subr.bf16.mxu1 %v5912_v38  ;;  %v5979_v38 = vld [vmem:[#allocation30_spill] sm:$0xff]  ;;  %v6010_v63 = vmov 0   ;;  %v6011_v58 = vld [vmem:[#allocation24_spill] sm:$0xff] }
 0x382   :  { %3326 = vtanh.f32 %v1429_v57  ;;  %v6012_v57 = vld [vmem:[#allocation25_spill] sm:$0xff] }
 0x383   :  { %3328 = vpow2.f32 %v2991_v46  ;;  %v6013_v46 = vld [vmem:[#allocation26_spill] sm:$0xff] }
 0x384   :  { %1604 = vmatpush1.bf16.msra.mxu0 %v5913_v6  ;;  %1645 = vmatpush1.bf16.msra.mxu1 %v5914_v8  ;;  %v5980_v6 = vld [vmem:[#allocation31_spill] sm:$0xff]  ;;  %v5981_v8 = vld [vmem:[#allocation32_spill] sm:$0xff] }
 0x385   :  { %1605 = vmatprep.subr.bf16.mxu0 %v5915_v13  ;;  %1646 = vmatprep.subr.bf16.mxu1 %v5916_v15  ;;  %v5982_v13 = vld [vmem:[#allocation33_spill] sm:$0xff]  ;;  %v5983_v15 = vld [vmem:[#allocation34_spill] sm:$0xff] }
 0x388   :  { %1606 = vmatpush1.bf16.msra.mxu0 %v5917_v60  ;;  %1647 = vmatpush1.bf16.msra.mxu1 %v5918_v19  ;;  %v5984_v60 = vld [vmem:[#allocation35_spill] sm:$0xff]  ;;  %v5985_v19 = vld [vmem:[#allocation36_spill] sm:$0xff] }
 0x389   :  { %1607 = vmatprep.subr.bf16.mxu0 %v5919_v22  ;;  %1648 = vmatprep.subr.bf16.mxu1 %v5978_v30  ;;  %v5986_v22 = vld [vmem:[#allocation37_spill] sm:$0xff]  ;;  %v6016_v30 = vld [vmem:[#allocation39_spill] sm:$0xff] }
 0x38a   :  { %v3323_v29 = vpop.eup %3322 }
 0x38b   :  { %v1442_v33 = vadd.f32 1.0, %v3323_v29  ;;  %v3325_v34 = vpop.eup %3324  ;;  %v6014_v29 = vld [vmem:[#allocation27_spill] sm:$0xff] }
 0x38c   :  { %v1443_v37 = vadd.f32 1.0, %v3325_v34  ;;  %1608 = vmatpush1.bf16.msra.mxu0 %v5979_v38  ;;  %1649 = vmatpush1.bf16.msra.mxu1 %v5980_v6  ;;  %v3327_v18 = vpop.eup %3326  ;;  %v6018_v34 = vld [vmem:[#allocation43_spill] sm:$0xff]  ;;  %v6021_v6 = vld [vmem:[#allocation49_spill] sm:$0xff] }
 0x38d   :  { %3330 = vrcp.f32 %v1442_v33  ;;  %1609 = vmatprep.subr.bf16.mxu0 %v5981_v8  ;;  %1650 = vmatprep.subr.bf16.mxu1 %v5982_v13  ;;  %v3329_v47 = vpop.eup %3328  ;;  %v6017_v33 = vld [vmem:[#allocation42_spill] sm:$0xff]  ;;  %v6020_v38 = vld [vmem:[#allocation47_spill] sm:$0xff] }
 0x38e   :  { %3332 = vrcp.f32 %v1443_v37  ;;  %v1444_v23 = vadd.f32 1.0, %v3329_v47  ;;  %v6019_v37 = vld [vmem:[#allocation46_spill] sm:$0xff]  ;;  %v6030_v47 = vld [vmem:[#allocation71_spill] sm:$0xff] }
 0x38f   :  { %v6022_v8 = vld [vmem:[#allocation50_spill] sm:$0xff] }
 0x390   :  { %1610 = vmatpush1.bf16.msra.mxu0 %v5983_v15  ;;  %1651 = vmatpush1.bf16.msra.mxu1 %v5984_v60  ;;  %3334 = vrcp.f32 %v1444_v23  ;;  %v6023_v13 = vld [vmem:[#allocation54_spill] sm:$0xff]  ;;  %v6024_v15 = vld [vmem:[#allocation65_spill] sm:$0xff] }
 0x391   :  { %1611 = vmatprep.subr.bf16.mxu0 %v5985_v19  ;;  %1652 = vmatprep.subr.bf16.mxu1 %v5986_v22  ;;  %v6025_v60 = vld [vmem:[#allocation66_spill] sm:$0xff]  ;;  %v6026_v19 = vld [vmem:[#allocation67_spill] sm:$0xff]  ;;  %v6027_v22 = vld [vmem:[#allocation68_spill] sm:$0xff] }
 0x392   :  { %v4657_v23 = vld [vmem:[#allocation2 + $0xe8] ss:$16 sps:$4 sm:$0xff]  }
 0x394   :  { %1612 = vmatpush1.bf16.msra.mxu0 %v5987_v1  ;;  %1653 = vmatpush1.bf16.msra.mxu1 %v5930_v20  ;;  %v6029_v1 = vld [vmem:[#allocation70_spill] sm:$0xff] }
 0x395   :  { %1613 = vmatprep.subr.bf16.mxu0 %v5988_v42  ;;  %1654 = vmatprep.subr.bf16.mxu1 %v5989_v5  ;;  %v6031_v42 = vld [vmem:[#allocation72_spill] sm:$0xff]  ;;  %v6032_v5 = vld [vmem:[#allocation73_spill] sm:$0xff] }
 0x397   :  { %v3331_v49 = vpop.eup %3330 }
 0x398   :  { %v1453_v28 = vmul.f32 %v3331_v49, %v3327_v18  ;;  %v3333_v52 = vpop.eup %3332  ;;  %1614 = vmatpush1.bf16.msra.mxu0 %v5933_v31  ;;  %1655 = vmatpush1.bf16.msra.mxu1 %v5934_v35  ;;  %v5993_v31 = vld [vmem:[#allocation51_spill] sm:$0xff]  ;;  %v5994_v35 = vld [vmem:[#allocation52_spill] sm:$0xff]  ;;  %v6028_v18 = vld [vmem:[#allocation69_spill] sm:$0xff] }
 0x399   :  { %v1452_v27 = vmul.f32 %v3333_v52, %v4419_v43  ;;  %1615 = vmatprep.subr.bf16.mxu0 %v5990_v44  ;;  %1656 = vmatprep.subr.bf16.mxu1 %v5991_v12  ;;  %v5995_v43 = vld [vmem:[#allocation53_spill] sm:$0xff]  ;;  %v6033_v49 = vld [vmem:[#allocation74_spill] sm:$0xff]  ;;  %v6035_v52 = vld [vmem:[#allocation76_spill] sm:$0xff] }
 0x39a   :  { %v4663_v44 = vld [vmem:[#allocation5 + $0xc] ss:$16 sps:$4 sm:$0xff]  }
 0x39b   :  { %v4601_v20 = vadd.f32 %v1453_v28, %v1452_v27  ;;  %v6034_v28 = vld [vmem:[#allocation75_spill] sm:$0xff]  ;;  %v4660_v27 = vld [vmem:[#allocation5 + $0x4] ss:$16 sps:$4 sm:$0xff]  }
 0x39c   :  { %1616 = vmatpush1.bf16.msra.mxu0 %v5937_v21  ;;  %1657 = vmatpush1.bf16.msra.mxu1 %v5938_v26  ;;  %v5997_v21 = vld [vmem:[#allocation56_spill] sm:$0xff]  ;;  %v3335_v26 = vpop.eup %3334 }
 0x39d   :  { %3336 = vtanh.f32 %v4601_v20  ;;  %1617 = vmatprep.subr.bf16.mxu0 %v5992_v54  ;;  %1658 = vmatprep.subr.bf16.mxu1 %v5940_v25  ;;  %v5999_v25 = vld [vmem:[#allocation58_spill] sm:$0xff] }
 0x3a0   :  { %1618 = vmatpush1.bf16.msra.mxu0 %v5941_v17  ;;  %1659 = vmatpush1.bf16.msra.mxu1 %v5993_v31 }
 0x3a1   :  { %1619 = vmatprep.subr.bf16.mxu0 %v5994_v35  ;;  %1660 = vmatprep.subr.bf16.mxu1 %v5995_v43 }
 0x3a4   :  { %1620 = vmatpush1.bf16.msra.mxu0 %v5945_v24  ;;  %1661 = vmatpush1.bf16.msra.mxu1 %v5996_v40  ;;  %v6003_v24 = vld [vmem:[#allocation62_spill] sm:$0xff] }
 0x3a5   :  { %1621 = vmatprep.subr.bf16.mxu0 %v5997_v21  ;;  %1662 = vmatprep.subr.bf16.mxu1 %v4278_v2  ;;  %v6005_v2 = vld [vmem:[#allocation19_spill] sm:$0xff] }
 0x3a7   :  { %v3337_v62 = vpop.eup %3336 }
 0x3a8   :  { %1622 = vmatpush1.bf16.msra.mxu0 %v5998_v41  ;;  %1663 = vmatpush1.bf16.msra.mxu1 %v5999_v25  ;;  %v1456_v17 = vmul.f32 %v3337_v62, %v3335_v26 }
 0x3a9   :  { %1623 = vmatprep.subr.bf16.mxu0 %v6000_v48  ;;  %1664 = vmatprep.subr.bf16.mxu1 %v6001_v55 }
 0x3aa   :  { %v1587_v11 = vrot.slane %v1456_v17, 4 }
 0x3ac   :  { %1624 = vmatpush1.bf16.msra.mxu0 %v6002_v51  ;;  %1665 = vmatpush1.bf16.msra.mxu1 %v6003_v24  ;;  %v1589_v9 = vpack.c.bf16 %v1587_v11, %v1587_v11 }
 0x3ad   :  { %1703 = vmatprep.subr.bf16.mxu0 %v6004_v0  ;;  %1744 = vmatprep.subr.bf16.mxu1 %v6005_v2 }
 0x3ae   :  { %v1591_v7 = vrot.slane %v1589_v9, 2 }
 0x3b0   :  { %1625 = vmatprep.mubr.bf16.mxu0 %v1591_v7  ;;  %1666 = vmatprep.mubr.bf16.mxu1 %v1591_v7 }
 0x3b1   :  { %1626 = vmatmul.mubr.bf16.vlgmr.msra.gmra.mrb[24].mxu0 %v4548_v10  ;;  %1667 = vmatmul.mubr.bf16.vlgmr.msra.gmra.mrb[32].mxu1 %v4548_v10  ;;  %v6015_v10 = vld [vmem:[#allocation28_spill] sm:$0xff] }
 0x3b2   :  { %1704 = vmatpush1.bf16.msra.mxu0 %v6006_v56  ;;  %1745 = vmatpush1.bf16.msra.mxu1 %v6007_v59 }
 0x3b3   :  { %1705 = vmatprep.subr.bf16.mxu0 %v6008_v53  ;;  %1746 = vmatprep.subr.bf16.mxu1 %v6009_v45 }
 0x3b4   :  { %1735 = vmatprep.mubr.bf16.mxu0 %v6010_v63  ;;  %1776 = vmatprep.mubr.bf16.mxu1 %v6010_v63 }
 0x3b6   :  { %1706 = vmatpush1.bf16.msra.mxu0 %v6011_v58  ;;  %1747 = vmatpush1.bf16.msra.mxu1 %v6012_v57 }
 0x3b7   :  { %1707 = vmatprep.subr.bf16.mxu0 %v6013_v46  ;;  %1748 = vmatprep.subr.bf16.mxu1 %v6014_v29 }
 0x3ba   :  { %1708 = vmatpush1.bf16.msra.mxu0 %v6015_v10  ;;  %1749 = vmatpush1.bf16.msra.mxu1 %v6016_v30 }
 0x3bb   :  { %1709 = vmatprep.subr.bf16.mxu0 %v6017_v33  ;;  %1750 = vmatprep.subr.bf16.mxu1 %v6018_v34 }
 0x3be   :  { %1710 = vmatpush1.bf16.msra.mxu0 %v6019_v37  ;;  %1751 = vmatpush1.bf16.msra.mxu1 %v6020_v38 }
 0x3bf   :  { %1711 = vmatprep.subr.bf16.mxu0 %v6021_v6  ;;  %1752 = vmatprep.subr.bf16.mxu1 %v6022_v8 }
 0x3c2   :  { %1712 = vmatpush1.bf16.msra.mxu0 %v6023_v13  ;;  %1753 = vmatpush1.bf16.msra.mxu1 %v6024_v15 }
 0x3c3   :  { %1713 = vmatprep.subr.bf16.mxu0 %v6025_v60  ;;  %1754 = vmatprep.subr.bf16.mxu1 %v6026_v19 }
 0x3c6   :  { %1714 = vmatpush1.bf16.msra.mxu0 %v6027_v22  ;;  %1755 = vmatpush1.bf16.msra.mxu1 %v6028_v18 }
 0x3c7   :  { %1715 = vmatprep.subr.bf16.mxu0 %v6029_v1  ;;  %1756 = vmatprep.subr.bf16.mxu1 %v6030_v47 }
 0x3ca   :  { %1716 = vmatpush1.bf16.msra.mxu0 %v6031_v42  ;;  %1757 = vmatpush1.bf16.msra.mxu1 %v6032_v5 }
 0x3cb   :  { %1717 = vmatprep.subr.bf16.mxu0 %v6033_v49  ;;  %1758 = vmatprep.subr.bf16.mxu1 %v6034_v28 }
 0x3ce   :  { %1718 = vmatpush1.bf16.msra.mxu0 %v6035_v52  ;;  %1759 = vmatpush1.bf16.msra.mxu1 %v4657_v23 }
 0x3cf   :  { %1823 = vmatprep.subr.bf16.mxu0 %v4660_v27  ;;  %1864 = vmatprep.subr.bf16.mxu1 %v4663_v44 }
 0x442   :  { %v1495_v12 = vpop.f32.mrb[20].mxu0  ;;  %v1536_v54 = vpop.f32.mrb[28].mxu1 }
 0x443   :  { %v1547_v31 = vrot.slane %v1495_v12, 2  ;;  %v1497_v35 = vpop.f32.mrb[21].mxu0  ;;  %v1538_v43 = vpop.f32.mrb[29].mxu1  ;;  %v1549_v11 = vrot.slane %v1536_v54, 2  ;;  %v1579_v54 = vrot.slane %v4545_v39, 6 }
 0x444   :  { %v1548_v40 = vrot.slane %v1497_v35, 2  ;;  %v1499_v21 = vpop.f32.mrb[22].mxu0  ;;  %v1540_v26 = vpop.f32.mrb[30].mxu1  ;;  %v1550_v51 = vrot.slane %v1538_v43, 2  ;;  %v4678_v39 = vld [vmem:[#allocation5] ss:$16 sps:$4 sm:$0xff]  }
 0x445   :  { %v1555_v62 = vadd.f32 %v1547_v31, %v4095_v3  ;;  %v1500_v41 = vpop.f32.mrb[23].mxu0  ;;  %v1541_v25 = vpop.f32.mrb[31].mxu1  ;;  %v1557_v24 = vadd.f32 %v1549_v11, %v4101_v61  ;;  %v4681_v11 = vld [vmem:[#allocation5 + $0x8] ss:$16 sps:$4 sm:$0xff]  }
 0x446   :  { %v1556_v17 = vadd.f32 %v1548_v40, %v4097_v4  ;;  %v1558_v9 = vadd.f32 %v1550_v51, %v4104_v50  ;;  %v4684_v51 = vld [vmem:[#allocation5 + $0x24] ss:$16 sps:$4 sm:$0xff]  }
 0x447   :  { %v2992_v48 = vmul.f32 -1.442695, %v1555_v62  ;;  %v2994_v7 = vmul.f32 -1.442695, %v1557_v24  ;;  %v4687_v24 = vld [vmem:[#allocation5 + $0x2c] ss:$16 sps:$4 sm:$0xff]  }
 0x448   :  { %v2993_v55 = vmul.f32 -1.442695, %v1556_v17 }
 0x449   :  { %3338 = vpow2.f32 %v2992_v48 }
 0x44a   :  { %3340 = vpow2.f32 %v2993_v55 }
 0x44b   :  { %3342 = vtanh.f32 %v1558_v9  ;;  %v4690_v9 = vld [vmem:[#allocation5 + $0x20] ss:$16 sps:$4 sm:$0xff]  }
 0x44c   :  { %3344 = vpow2.f32 %v2994_v7  ;;  %v4693_v7 = vld [vmem:[#allocation5 + $0x28] ss:$16 sps:$4 sm:$0xff]  }
 0x453   :  { %v3339_v12 = vpop.eup %3338 }
 0x454   :  { %v1568_v35 = vadd.f32 1.0, %v3339_v12  ;;  %v3341_v21 = vpop.eup %3340  ;;  %v4696_v12 = vld [vmem:[#allocation5 + $0x44] ss:$16 sps:$4 sm:$0xff]  }
 0x455   :  { %v1569_v3 = vadd.f32 1.0, %v3341_v21  ;;  %v3343_v4 = vpop.eup %3342  ;;  %v4702_v21 = vld [vmem:[#allocation5 + $0x40] ss:$16 sps:$4 sm:$0xff]  }
 0x456   :  { %3346 = vrcp.f32 %v1568_v35  ;;  %v3345_v31 = vpop.eup %3344  ;;  %v4699_v35 = vld [vmem:[#allocation5 + $0x4c] ss:$16 sps:$4 sm:$0xff]   ;;  %6036 = vst [vmem:[#allocation29_spill] sm:$0xff] %v4702_v21 }
 0x457   :  { %3348 = vrcp.f32 %v1569_v3  ;;  %v1570_v62 = vadd.f32 1.0, %v3345_v31  ;;  %v4705_v3 = vld [vmem:[#allocation5 + $0x48] ss:$16 sps:$4 sm:$0xff]   ;;  %v4711_v31 = vld [vmem:[#allocation5 + $0x6c] ss:$16 sps:$4 sm:$0xff]  }
 0x458   :  { %6037 = vst [vmem:[#allocation30_spill] sm:$0xff] %v4705_v3  ;;  %6039 = vst [vmem:[#allocation32_spill] sm:$0xff] %v4711_v31 }
 0x459   :  { %3350 = vrcp.f32 %v1570_v62 }
 0x460   :  { %v3347_v40 = vpop.eup %3346 }
 0x461   :  { %v1582_v26 = vmul.f32 %v3347_v40, %v3343_v4  ;;  %v3349_v43 = vpop.eup %3348  ;;  %v4708_v4 = vld [vmem:[#allocation5 + $0x64] ss:$16 sps:$4 sm:$0xff]  }
 0x462   :  { %v1581_v61 = vmul.f32 %v3349_v43, %v1579_v54  ;;  %6038 = vst [vmem:[#allocation31_spill] sm:$0xff] %v4708_v4 }
 0x463   :  { %v3351_v50 = vpop.eup %3350 }
 0x464   :  { %v4671_v41 = vadd.f32 %v1582_v26, %v1581_v61  ;;  %v4715_v61 = vld [vmem:[#allocation5 + $0x60] ss:$16 sps:$4 sm:$0xff]  }
 0x465   :  { %6040 = vst [vmem:[#allocation33_spill] sm:$0xff] %v4715_v61 }
 0x466   :  { %3352 = vtanh.f32 %v4671_v41 }
 0x470   :  { %v3353_v25 = vpop.eup %3352 }
 0x471   :  { %v1585_v17 = vmul.f32 %v3353_v25, %v3351_v50  ;;  %v4718_v50 = vld [vmem:[#allocation5 + $0x68] ss:$16 sps:$4 sm:$0xff]  }
 0x473   :  { %v1699_v48 = vpack.c.bf16 %v1585_v17, %v1585_v17 }
 0x475   :  { %v4674_v55 = vrot.slane %v1699_v48, 3 }
 0x477   :  { %1736 = vmatmul.mubr.bf16.vlgmr.msra.gmra.mrb[28].mxu0 %v4674_v55  ;;  %1777 = vmatmul.mubr.bf16.vlgmr.msra.gmra.mrb[36].mxu1 %v4674_v55 }
 0x478   :  { %1824 = vmatpush1.bf16.msra.mxu0 %v4678_v39  ;;  %1865 = vmatpush1.bf16.msra.mxu1 %v4681_v11 }
 0x479   :  { %1825 = vmatprep.subr.bf16.mxu0 %v4684_v51  ;;  %1866 = vmatprep.subr.bf16.mxu1 %v4687_v24 }
 0x47c   :  { %1826 = vmatpush1.bf16.msra.mxu0 %v4690_v9  ;;  %1867 = vmatpush1.bf16.msra.mxu1 %v4693_v7 }
 0x47d   :  { %1827 = vmatprep.subr.bf16.mxu0 %v4696_v12  ;;  %1868 = vmatprep.subr.bf16.mxu1 %v4699_v35 }
 0x480   :  { %1828 = vmatpush1.bf16.msra.mxu0 %v4702_v21  ;;  %1869 = vmatpush1.bf16.msra.mxu1 %v4705_v3  ;;  %v4728_v21 = vld [vmem:[#allocation5 + $0x80] ss:$16 sps:$4 sm:$0xff]  }
 0x481   :  { %1829 = vmatprep.subr.bf16.mxu0 %v4708_v4  ;;  %1870 = vmatprep.subr.bf16.mxu1 %v4711_v31  ;;  %v4722_v4 = vld [vmem:[#allocation5 + $0x84] ss:$16 sps:$4 sm:$0xff]   ;;  %v4725_v31 = vld [vmem:[#allocation5 + $0x8c] ss:$16 sps:$4 sm:$0xff]  }
 0x484   :  { %v1627_v40 = vpop.f32.mrb[24].mxu0  ;;  %v1668_v54 = vpop.f32.mrb[32].mxu1  ;;  %1830 = vmatpush1.bf16.msra.mxu0 %v4715_v61  ;;  %1871 = vmatpush1.bf16.msra.mxu1 %v4718_v50 }
 0x485   :  { %v1628_v26 = vadd.f32 %v1627_v40, %v4365_v14  ;;  %v1629_v43 = vpop.f32.mrb[25].mxu0  ;;  %v1670_v62 = vpop.f32.mrb[33].mxu1  ;;  %1831 = vmatprep.subr.bf16.mxu0 %v4722_v4  ;;  %1872 = vmatprep.subr.bf16.mxu1 %v4725_v31 }
 0x486   :  { %v1630_v25 = vadd.f32 %v1629_v43, %v4369_v16  ;;  %v1631_v17 = vpop.f32.mrb[26].mxu0  ;;  %v1672_v48 = vpop.f32.mrb[34].mxu1  ;;  %v4731_v43 = vld [vmem:[#allocation5 + $0x88] ss:$16 sps:$4 sm:$0xff]  }
 0x487   :  { %v2995_v40 = vmul.f32 -1.442695, %v1628_v26  ;;  %v1632_v14 = vpop.f32.mrb[27].mxu0  ;;  %v1673_v3 = vpop.f32.mrb[35].mxu1  ;;  %v4734_v17 = vld [vmem:[#allocation5 + $0xa4] ss:$16 sps:$4 sm:$0xff]  }
 0x488   :  { %v2996_v61 = vmul.f32 -1.442695, %v1630_v25  ;;  %1832 = vmatpush1.bf16.msra.mxu0 %v4728_v21  ;;  %1873 = vmatpush1.bf16.msra.mxu1 %v4731_v43  ;;  %v4737_v48 = vld [vmem:[#allocation5 + $0xac] ss:$16 sps:$4 sm:$0xff]   ;;  %v1669_v14 = vadd.f32 %v1668_v54, %v4383_v32  ;;  %v4741_v3 = vld [vmem:[#allocation5 + $0xa0] ss:$16 sps:$4 sm:$0xff]  }
 0x489   :  { %3354 = vpow2.f32 %v2995_v40  ;;  %1833 = vmatprep.subr.bf16.mxu0 %v4734_v17  ;;  %1874 = vmatprep.subr.bf16.mxu1 %v4737_v48  ;;  %6041 = vst [vmem:[#allocation34_spill] sm:$0xff] %v4741_v3  ;;  %v4744_v26 = vld [vmem:[#allocation5 + $0xa8] ss:$16 sps:$4 sm:$0xff]   ;;  %v4747_v25 = vld [vmem:[#allocation5 + $0xc4] ss:$16 sps:$4 sm:$0xff]  }
 0x48a   :  { %3356 = vpow2.f32 %v2996_v61  ;;  %6042 = vst [vmem:[#allocation35_spill] sm:$0xff] %v4744_v26  ;;  %6043 = vst [vmem:[#allocation36_spill] sm:$0xff] %v4747_v25  ;;  %v4750_v40 = vld [vmem:[#allocation5 + $0xcc] ss:$16 sps:$4 sm:$0xff]   ;;  %v1671_v61 = vadd.f32 %v1670_v62, %v4389_v36  ;;  %v2997_v16 = vmul.f32 -1.442695, %v1669_v14 }
 0x48b   :  { %6044 = vst [vmem:[#allocation37_spill] sm:$0xff] %v4750_v40  ;;  %v4754_v54 = vld [vmem:[#allocation5 + $0xc0] ss:$16 sps:$4 sm:$0xff]   ;;  %v4757_v32 = vld [vmem:[#allocation5 + $0xc8] ss:$16 sps:$4 sm:$0xff]  }
 0x48c   :  { %1834 = vmatpush1.bf16.msra.mxu0 %v4741_v3  ;;  %1875 = vmatpush1.bf16.msra.mxu1 %v4744_v26  ;;  %6045 = vst [vmem:[#allocation38_spill] sm:$0xff] %v4754_v54  ;;  %6046 = vst [vmem:[#allocation40_spill] sm:$0xff] %v4757_v32  ;;  %v4760_v26 = vld [vmem:[#allocation5 + $0xe4] ss:$16 sps:$4 sm:$0xff]   ;;  %3358 = vtanh.f32 %v1671_v61  ;;  %v4766_v14 = vld [vmem:[#allocation5 + $0xe0] ss:$16 sps:$4 sm:$0xff]  }
 0x48d   :  { %1835 = vmatprep.subr.bf16.mxu0 %v4747_v25  ;;  %1876 = vmatprep.subr.bf16.mxu1 %v4750_v40  ;;  %6047 = vst [vmem:[#allocation41_spill] sm:$0xff] %v4760_v26  ;;  %v4763_v25 = vld [vmem:[#allocation5 + $0xec] ss:$16 sps:$4 sm:$0xff]   ;;  %3360 = vpow2.f32 %v2997_v16  ;;  %6049 = vst [vmem:[#allocation45_spill] sm:$0xff] %v4766_v14  ;;  %v4769_v36 = vld [vmem:[#allocation5 + $0xe8] ss:$16 sps:$4 sm:$0xff]  }
 0x48e   :  { %6048 = vst [vmem:[#allocation44_spill] sm:$0xff] %v4763_v25  ;;  %6050 = vst [vmem:[#allocation48_spill] sm:$0xff] %v4769_v36  ;;  %v4778_v16 = vld [vmem:[#allocation5 + $0x100] ss:$16 sps:$4 sm:$0xff]   ;;  %v4784_v61 = vld [vmem:[#allocation5 + $0x124] ss:$16 sps:$4 sm:$0xff]  }
 0x48f   :  { %6053 = vst [vmem:[#allocation53_spill] sm:$0xff] %v4778_v16  ;;  %6055 = vst [vmem:[#allocation56_spill] sm:$0xff] %v4784_v61 }
 0x490   :  { %1836 = vmatpush1.bf16.msra.mxu0 %v4754_v54  ;;  %1877 = vmatpush1.bf16.msra.mxu1 %v4757_v32  ;;  %v4808_v54 = vld [vmem:[#allocation5 + $0x164] ss:$16 sps:$4 sm:$0xff]  }
 0x491   :  { %1837 = vmatprep.subr.bf16.mxu0 %v4760_v26  ;;  %1878 = vmatprep.subr.bf16.mxu1 %v4763_v25  ;;  %v4772_v26 = vld [vmem:[#allocation5 + $0x104] ss:$16 sps:$4 sm:$0xff]   ;;  %v4775_v25 = vld [vmem:[#allocation5 + $0x10c] ss:$16 sps:$4 sm:$0xff]   ;;  %6063 = vst [vmem:[#allocation19_spill] sm:$0xff] %v4808_v54 }
 0x492   :  { %6051 = vst [vmem:[#allocation51_spill] sm:$0xff] %v4772_v26  ;;  %6052 = vst [vmem:[#allocation52_spill] sm:$0xff] %v4775_v25 }
 0x493   :  { %v3355_v40 = vpop.eup %3354 }
 0x494   :  { %v1684_v3 = vadd.f32 1.0, %v3355_v40  ;;  %v3357_v62 = vpop.eup %3356  ;;  %1838 = vmatpush1.bf16.msra.mxu0 %v4766_v14  ;;  %1879 = vmatpush1.bf16.msra.mxu1 %v4769_v36  ;;  %v4781_v40 = vld [vmem:[#allocation5 + $0x108] ss:$16 sps:$4 sm:$0xff]   ;;  %v4802_v36 = vld [vmem:[#allocation5 + $0x140] ss:$16 sps:$4 sm:$0xff]  }
 0x495   :  { %v1685_v32 = vadd.f32 1.0, %v3357_v62  ;;  %1839 = vmatprep.subr.bf16.mxu0 %v4772_v26  ;;  %1880 = vmatprep.subr.bf16.mxu1 %v4775_v25  ;;  %6054 = vst [vmem:[#allocation55_spill] sm:$0xff] %v4781_v40  ;;  %v4790_v62 = vld [vmem:[#allocation5 + $0x120] ss:$16 sps:$4 sm:$0xff]   ;;  %v4796_v25 = vld [vmem:[#allocation5 + $0x144] ss:$16 sps:$4 sm:$0xff]  }
 0x496   :  { %3362 = vrcp.f32 %v1684_v3  ;;  %v4787_v3 = vld [vmem:[#allocation5 + $0x12c] ss:$16 sps:$4 sm:$0xff]   ;;  %6057 = vst [vmem:[#allocation58_spill] sm:$0xff] %v4790_v62  ;;  %6059 = vst [vmem:[#allocation60_spill] sm:$0xff] %v4796_v25 }
 0x497   :  { %3364 = vrcp.f32 %v1685_v32  ;;  %6056 = vst [vmem:[#allocation57_spill] sm:$0xff] %v4787_v3  ;;  %v4793_v32 = vld [vmem:[#allocation5 + $0x128] ss:$16 sps:$4 sm:$0xff]   ;;  %6061 = vst [vmem:[#allocation62_spill] sm:$0xff] %v4802_v36 }
 0x498   :  { %1840 = vmatpush1.bf16.msra.mxu0 %v4778_v16  ;;  %1881 = vmatpush1.bf16.msra.mxu1 %v4781_v40  ;;  %6058 = vst [vmem:[#allocation59_spill] sm:$0xff] %v4793_v32  ;;  %v3359_v16 = vpop.eup %3358  ;;  %v4799_v40 = vld [vmem:[#allocation5 + $0x14c] ss:$16 sps:$4 sm:$0xff]  }
 0x499   :  { %1841 = vmatprep.subr.bf16.mxu0 %v4784_v61  ;;  %1882 = vmatprep.subr.bf16.mxu1 %v4787_v3  ;;  %6060 = vst [vmem:[#allocation61_spill] sm:$0xff] %v4799_v40  ;;  %v3361_v61 = vpop.eup %3360 }
 0x49a   :  { %v1686_v14 = vadd.f32 1.0, %v3361_v61  ;;  %v4823_v61 = vld [vmem:[#allocation5 + $0x184] ss:$16 sps:$4 sm:$0xff]  }
 0x49b   :  { %6068 = vst [vmem:[#allocation24_spill] sm:$0xff] %v4823_v61 }
 0x49c   :  { %1842 = vmatpush1.bf16.msra.mxu0 %v4790_v62  ;;  %1883 = vmatpush1.bf16.msra.mxu1 %v4793_v32  ;;  %v4805_v62 = vld [vmem:[#allocation5 + $0x148] ss:$16 sps:$4 sm:$0xff]   ;;  %3366 = vrcp.f32 %v1686_v14  ;;  %v4839_v14 = vld [vmem:[#allocation5 + $0x1ac] ss:$16 sps:$4 sm:$0xff]  }
 0x49d   :  { %1843 = vmatprep.subr.bf16.mxu0 %v4796_v25  ;;  %1884 = vmatprep.subr.bf16.mxu1 %v4799_v40  ;;  %6062 = vst [vmem:[#allocation18_spill] sm:$0xff] %v4805_v62  ;;  %v4811_v25 = vld [vmem:[#allocation5 + $0x16c] ss:$16 sps:$4 sm:$0xff]   ;;  %v4817_v40 = vld [vmem:[#allocation5 + $0x160] ss:$16 sps:$4 sm:$0xff]   ;;  %6073 = vst [vmem:[#allocation39_spill] sm:$0xff] %v4839_v14 }
 0x49e   :  { %6064 = vst [vmem:[#allocation20_spill] sm:$0xff] %v4811_v25  ;;  %6066 = vst [vmem:[#allocation22_spill] sm:$0xff] %v4817_v40 }
 0x4a0   :  { %v3363_v26 = vpop.eup %3362  ;;  %1844 = vmatpush1.bf16.msra.mxu0 %v4802_v36  ;;  %1885 = vmatpush1.bf16.msra.mxu1 %v4805_v62  ;;  %v4820_v36 = vld [vmem:[#allocation5 + $0x168] ss:$16 sps:$4 sm:$0xff]  }
 0x4a1   :  { %v1695_v3 = vmul.f32 %v3363_v26, %v3359_v16  ;;  %v3365_v32 = vpop.eup %3364  ;;  %1845 = vmatprep.subr.bf16.mxu0 %v4808_v54  ;;  %1886 = vmatprep.subr.bf16.mxu1 %v4811_v25  ;;  %6067 = vst [vmem:[#allocation23_spill] sm:$0xff] %v4820_v36  ;;  %v4826_v54 = vld [vmem:[#allocation5 + $0x18c] ss:$16 sps:$4 sm:$0xff]  }
 0x4a2   :  { %v1694_v26 = vmul.f32 %v3365_v32, %v4601_v20  ;;  %6069 = vst [vmem:[#allocation25_spill] sm:$0xff] %v4826_v54  ;;  %v4830_v20 = vld [vmem:[#allocation5 + $0x180] ss:$16 sps:$4 sm:$0xff]   ;;  %v4836_v32 = vld [vmem:[#allocation5 + $0x1a4] ss:$16 sps:$4 sm:$0xff]  }
 0x4a3   :  { %6070 = vst [vmem:[#allocation26_spill] sm:$0xff] %v4830_v20  ;;  %6072 = vst [vmem:[#allocation28_spill] sm:$0xff] %v4836_v32 }
 0x4a4   :  { %v4815_v16 = vadd.f32 %v1695_v3, %v1694_v26  ;;  %1846 = vmatpush1.bf16.msra.mxu0 %v4817_v40  ;;  %1887 = vmatpush1.bf16.msra.mxu1 %v4820_v36  ;;  %v4833_v3 = vld [vmem:[#allocation5 + $0x188] ss:$16 sps:$4 sm:$0xff]   ;;  %v4842_v26 = vld [vmem:[#allocation5 + $0x1a0] ss:$16 sps:$4 sm:$0xff]  }
 0x4a5   :  { %1847 = vmatprep.subr.bf16.mxu0 %v4823_v61  ;;  %1888 = vmatprep.subr.bf16.mxu1 %v4826_v54  ;;  %6071 = vst [vmem:[#allocation27_spill] sm:$0xff] %v4833_v3  ;;  %6074 = vst [vmem:[#allocation42_spill] sm:$0xff] %v4842_v26  ;;  %v4854_v61 = vld [vmem:[#allocation5 + $0x1c0] ss:$16 sps:$4 sm:$0xff]   ;;  %v4869_v40 = vld [vmem:[#allocation5 + $0x1e8] ss:$16 sps:$4 sm:$0xff]  }
 0x4a6   :  { %6065 = vst [vmem:[#allocation21_spill] sm:$0xff] %v4815_v16  ;;  %3368 = vtanh.f32 %v4815_v16  ;;  %v4845_v16 = vld [vmem:[#allocation5 + $0x1a8] ss:$16 sps:$4 sm:$0xff]   ;;  %6078 = vst [vmem:[#allocation49_spill] sm:$0xff] %v4854_v61  ;;  %v4866_v36 = vld [vmem:[#allocation5 + $0x1e0] ss:$16 sps:$4 sm:$0xff]  }
 0x4a7   :  { %6075 = vst [vmem:[#allocation43_spill] sm:$0xff] %v4845_v16  ;;  %6082 = vst [vmem:[#allocation66_spill] sm:$0xff] %v4866_v36 }
 0x4a8   :  { %1848 = vmatpush1.bf16.msra.mxu0 %v4830_v20  ;;  %1889 = vmatpush1.bf16.msra.mxu1 %v4833_v3  ;;  %v4848_v20 = vld [vmem:[#allocation5 + $0x1c4] ss:$16 sps:$4 sm:$0xff]   ;;  %v4851_v3 = vld [vmem:[#allocation5 + $0x1cc] ss:$16 sps:$4 sm:$0xff]   ;;  %6083 = vst [vmem:[#allocation67_spill] sm:$0xff] %v4869_v40 }
 0x4a9   :  { %1849 = vmatprep.subr.bf16.mxu0 %v4836_v32  ;;  %1890 = vmatprep.subr.bf16.mxu1 %v4839_v14  ;;  %6076 = vst [vmem:[#allocation46_spill] sm:$0xff] %v4848_v20  ;;  %6077 = vst [vmem:[#allocation47_spill] sm:$0xff] %v4851_v3  ;;  %v3367_v32 = vpop.eup %3366  ;;  %v4857_v14 = vld [vmem:[#allocation5 + $0x1c8] ss:$16 sps:$4 sm:$0xff]  }
 0x4aa   :  { %6079 = vst [vmem:[#allocation50_spill] sm:$0xff] %v4857_v14 }
 0x4ac   :  { %1850 = vmatpush1.bf16.msra.mxu0 %v4842_v26  ;;  %1891 = vmatpush1.bf16.msra.mxu1 %v4845_v16  ;;  %v4860_v26 = vld [vmem:[#allocation5 + $0x1e4] ss:$16 sps:$4 sm:$0xff]   ;;  %v4863_v16 = vld [vmem:[#allocation5 + $0x1ec] ss:$16 sps:$4 sm:$0xff]  }
 0x4ad   :  { %1851 = vmatprep.subr.bf16.mxu0 %v4848_v20  ;;  %1892 = vmatprep.subr.bf16.mxu1 %v4851_v3  ;;  %6080 = vst [vmem:[#allocation54_spill] sm:$0xff] %v4860_v26  ;;  %6081 = vst [vmem:[#allocation65_spill] sm:$0xff] %v4863_v16 }
 0x4b0   :  { %v3369_v54 = vpop.eup %3368  ;;  %1852 = vmatpush1.bf16.msra.mxu0 %v4854_v61  ;;  %1893 = vmatpush1.bf16.msra.mxu1 %v4857_v14 }
 0x4b1   :  { %1853 = vmatprep.subr.bf16.mxu0 %v4860_v26  ;;  %1894 = vmatprep.subr.bf16.mxu1 %v4863_v16  ;;  %v1698_v20 = vmul.f32 %v3369_v54, %v3367_v32  ;;  %v6089_v32 = vld [vmem:[#allocation30_spill] sm:$0xff] }
 0x4b3   :  { %v1817_v3 = vrot.slane %v1698_v20, 2 }
 0x4b4   :  { %1854 = vmatpush1.bf16.msra.mxu0 %v4866_v36  ;;  %1895 = vmatpush1.bf16.msra.mxu1 %v4869_v40 }
 0x4b5   :  { %v1819_v61 = vpack.c.bf16 %v1817_v3, %v1817_v3  ;;  %1930 = vmatprep.subr.bf16.mxu0 %v6004_v0  ;;  %1971 = vmatprep.subr.bf16.mxu1 %v6005_v2 }
 0x4b7   :  { %v1821_v26 = vrot.slane %v1819_v61, 3 }
 0x4b9   :  { %1855 = vmatprep.mubr.bf16.mxu0 %v1821_v26  ;;  %1896 = vmatprep.mubr.bf16.mxu1 %v1821_v26  ;;  %v6090_v26 = vld [vmem:[#allocation31_spill] sm:$0xff] }
 0x4ba   :  { %1856 = vmatmul.mubr.bf16.vlgmr.msra.gmra.mrb[32].mxu0 %v4674_v55  ;;  %1897 = vmatmul.mubr.bf16.vlgmr.msra.gmra.mrb[40].mxu1 %v4674_v55 }
 0x4bb   :  { %1931 = vmatpush1.bf16.msra.mxu0 %v6006_v56  ;;  %1972 = vmatpush1.bf16.msra.mxu1 %v6007_v59  ;;  %v6084_v56 = vld [vmem:[#allocation12_spill] sm:$0xff] }
 0x4bc   :  { %1932 = vmatprep.subr.bf16.mxu0 %v6008_v53  ;;  %1973 = vmatprep.subr.bf16.mxu1 %v6009_v45 }
 0x4bd   :  { %1962 = vmatprep.mubr.bf16.mxu0 %v6010_v63  ;;  %2003 = vmatprep.mubr.bf16.mxu1 %v6010_v63 }
 0x4bf   :  { %1933 = vmatpush1.bf16.msra.mxu0 %v6011_v58  ;;  %1974 = vmatpush1.bf16.msra.mxu1 %v6012_v57  ;;  %v6085_v58 = vld [vmem:[#allocation13_spill] sm:$0xff] }
 0x4c0   :  { %1934 = vmatprep.subr.bf16.mxu0 %v6013_v46  ;;  %1975 = vmatprep.subr.bf16.mxu1 %v6014_v29 }
 0x4c3   :  { %1935 = vmatpush1.bf16.msra.mxu0 %v6015_v10  ;;  %1976 = vmatpush1.bf16.msra.mxu1 %v6016_v30 }
 0x4c4   :  { %1936 = vmatprep.subr.bf16.mxu0 %v6017_v33  ;;  %1977 = vmatprep.subr.bf16.mxu1 %v6018_v34 }
 0x4c7   :  { %1937 = vmatpush1.bf16.msra.mxu0 %v6019_v37  ;;  %1978 = vmatpush1.bf16.msra.mxu1 %v6020_v38  ;;  %v6086_v37 = vld [vmem:[#allocation14_spill] sm:$0xff] }
 0x4c8   :  { %1938 = vmatprep.subr.bf16.mxu0 %v6021_v6  ;;  %1979 = vmatprep.subr.bf16.mxu1 %v6022_v8  ;;  %v6087_v6 = vld [vmem:[#allocation15_spill] sm:$0xff] }
 0x4cb   :  { %1939 = vmatpush1.bf16.msra.mxu0 %v6023_v13  ;;  %1980 = vmatpush1.bf16.msra.mxu1 %v6024_v15 }
 0x4cc   :  { %1940 = vmatprep.subr.bf16.mxu0 %v6025_v60  ;;  %1981 = vmatprep.subr.bf16.mxu1 %v6026_v19 }
 0x4cf   :  { %1941 = vmatpush1.bf16.msra.mxu0 %v6027_v22  ;;  %1982 = vmatpush1.bf16.msra.mxu1 %v6028_v18 }
 0x4d0   :  { %1942 = vmatprep.subr.bf16.mxu0 %v6029_v1  ;;  %1983 = vmatprep.subr.bf16.mxu1 %v6030_v47 }
 0x4d3   :  { %1943 = vmatpush1.bf16.msra.mxu0 %v6031_v42  ;;  %1984 = vmatpush1.bf16.msra.mxu1 %v6032_v5  ;;  %v1809_v42 = vrot.slane %v4671_v41, 6  ;;  %v6088_v41 = vld [vmem:[#allocation29_spill] sm:$0xff] }
 0x4d4   :  { %1944 = vmatprep.subr.bf16.mxu0 %v6033_v49  ;;  %1985 = vmatprep.subr.bf16.mxu1 %v6034_v28 }
 0x4d7   :  { %1945 = vmatpush1.bf16.msra.mxu0 %v6035_v52  ;;  %1986 = vmatpush1.bf16.msra.mxu1 %v4657_v23 }
 0x4d8   :  { %2056 = vmatprep.subr.bf16.mxu0 %v4660_v27  ;;  %2097 = vmatprep.subr.bf16.mxu1 %v4663_v44 }
 0x54a   :  { %v1737_v0 = vpop.f32.mrb[28].mxu0  ;;  %v1778_v2 = vpop.f32.mrb[36].mxu1 }
 0x54b   :  { %v1785_v59 = vadd.f32 %v1737_v0, %v6084_v56  ;;  %v1739_v53 = vpop.f32.mrb[29].mxu0  ;;  %v1780_v45 = vpop.f32.mrb[37].mxu1  ;;  %v1787_v38 = vadd.f32 %v1778_v2, %v6086_v37  ;;  %v6091_v0 = vld [vmem:[#allocation32_spill] sm:$0xff]  ;;  %v6092_v2 = vld [vmem:[#allocation33_spill] sm:$0xff] }
 0x54c   :  { %v1786_v57 = vadd.f32 %v1739_v53, %v6085_v58  ;;  %v1741_v46 = vpop.f32.mrb[30].mxu0  ;;  %v1782_v29 = vpop.f32.mrb[38].mxu1  ;;  %v1788_v8 = vadd.f32 %v1780_v45, %v6087_v6  ;;  %v6093_v45 = vld [vmem:[#allocation63_spill] sm:$0xff] }
 0x54d   :  { %v2998_v10 = vmul.f32 -1.442695, %v1785_v59  ;;  %v1742_v30 = vpop.f32.mrb[31].mxu0  ;;  %v1783_v33 = vpop.f32.mrb[39].mxu1  ;;  %v3000_v13 = vmul.f32 -1.442695, %v1787_v38 }
 0x54e   :  { %v2999_v34 = vmul.f32 -1.442695, %v1786_v57 }
 0x54f   :  { %3370 = vpow2.f32 %v2998_v10  ;;  %v6094_v10 = vld [vmem:[#allocation64_spill] sm:$0xff] }
 0x550   :  { %3372 = vpow2.f32 %v2999_v34 }
 0x551   :  { %3374 = vtanh.f32 %v1788_v8 }
 0x552   :  { %3376 = vpow2.f32 %v3000_v13 }
 0x559   :  { %v3371_v15 = vpop.eup %3370 }
 0x55a   :  { %v1798_v60 = vadd.f32 1.0, %v3371_v15  ;;  %v3373_v19 = vpop.eup %3372 }
 0x55b   :  { %v1799_v22 = vadd.f32 1.0, %v3373_v19  ;;  %v3375_v18 = vpop.eup %3374  ;;  %v6096_v19 = vld [vmem:[#allocation35_spill] sm:$0xff] }
 0x55c   :  { %3378 = vrcp.f32 %v1798_v60  ;;  %v3377_v1 = vpop.eup %3376  ;;  %v6095_v60 = vld [vmem:[#allocation34_spill] sm:$0xff] }
 0x55d   :  { %3380 = vrcp.f32 %v1799_v22  ;;  %v1800_v28 = vadd.f32 1.0, %v3377_v1  ;;  %v6097_v22 = vld [vmem:[#allocation36_spill] sm:$0xff]  ;;  %v6099_v1 = vld [vmem:[#allocation38_spill] sm:$0xff] }
 0x55f   :  { %3382 = vrcp.f32 %v1800_v28  ;;  %v6103_v28 = vld [vmem:[#allocation44_spill] sm:$0xff] }
 0x566   :  { %v3379_v47 = vpop.eup %3378 }
 0x567   :  { %v1812_v5 = vmul.f32 %v3379_v47, %v3375_v18  ;;  %v3381_v49 = vpop.eup %3380  ;;  %v6098_v18 = vld [vmem:[#allocation37_spill] sm:$0xff]  ;;  %v6100_v47 = vld [vmem:[#allocation40_spill] sm:$0xff] }
 0x568   :  { %v1811_v52 = vmul.f32 %v3381_v49, %v1809_v42  ;;  %v6101_v42 = vld [vmem:[#allocation16_spill] sm:$0xff]  ;;  %v6102_v49 = vld [vmem:[#allocation41_spill] sm:$0xff] }
 0x569   :  { %v3383_v54 = vpop.eup %3382 }
 0x56a   :  { %v4915_v55 = vadd.f32 %v1812_v5, %v1811_v52  ;;  %v6104_v52 = vld [vmem:[#allocation17_spill] sm:$0xff] }
 0x56c   :  { %3384 = vtanh.f32 %v4915_v55 }
 0x576   :  { %v3385_v61 = vpop.eup %3384 }
 0x577   :  { %v1815_v20 = vmul.f32 %v3385_v61, %v3383_v54  ;;  %v6105_v61 = vld [vmem:[#allocation45_spill] sm:$0xff] }
 0x579   :  { %v4918_v3 = vpack.c.bf16 %v1815_v20, %v1815_v20  ;;  %v6106_v20 = vld [vmem:[#allocation48_spill] sm:$0xff] }
 0x57b   :  { %1963 = vmatmul.mubr.bf16.vlgmr.msra.gmra.mrb[36].mxu0 %v4918_v3  ;;  %2004 = vmatmul.mubr.bf16.vlgmr.msra.gmra.mrb[44].mxu1 %v4918_v3 }
 0x57c   :  { %2057 = vmatpush1.bf16.msra.mxu0 %v4678_v39  ;;  %2098 = vmatpush1.bf16.msra.mxu1 %v4681_v11 }
 0x57d   :  { %2058 = vmatprep.subr.bf16.mxu0 %v4684_v51  ;;  %2099 = vmatprep.subr.bf16.mxu1 %v4687_v24 }
 0x580   :  { %2059 = vmatpush1.bf16.msra.mxu0 %v4690_v9  ;;  %2100 = vmatpush1.bf16.msra.mxu1 %v4693_v7 }
 0x581   :  { %2060 = vmatprep.subr.bf16.mxu0 %v4696_v12  ;;  %2101 = vmatprep.subr.bf16.mxu1 %v4699_v35 }
 0x584   :  { %2061 = vmatpush1.bf16.msra.mxu0 %v6088_v41  ;;  %2102 = vmatpush1.bf16.msra.mxu1 %v6089_v32 }
 0x585   :  { %2062 = vmatprep.subr.bf16.mxu0 %v6090_v26  ;;  %2103 = vmatprep.subr.bf16.mxu1 %v6091_v0 }
 0x588   :  { %2063 = vmatpush1.bf16.msra.mxu0 %v6092_v2  ;;  %2104 = vmatpush1.bf16.msra.mxu1 %v4718_v50 }
 0x589   :  { %2064 = vmatprep.subr.bf16.mxu0 %v4722_v4  ;;  %2105 = vmatprep.subr.bf16.mxu1 %v4725_v31 }
 0x58c   :  { %2065 = vmatpush1.bf16.msra.mxu0 %v4728_v21  ;;  %2106 = vmatpush1.bf16.msra.mxu1 %v4731_v43 }
 0x58d   :  { %v1857_v59 = vpop.f32.mrb[32].mxu0  ;;  %v1898_v53 = vpop.f32.mrb[40].mxu1  ;;  %2066 = vmatprep.subr.bf16.mxu0 %v4734_v17  ;;  %2107 = vmatprep.subr.bf16.mxu1 %v4737_v48 }
 0x58e   :  { %v1858_v57 = vadd.f32 %v1857_v59, %v6093_v45  ;;  %v1859_v46 = vpop.f32.mrb[33].mxu0  ;;  %v1900_v29 = vpop.f32.mrb[41].mxu1  ;;  %v1899_v5 = vadd.f32 %v1898_v53, %v6101_v42  ;;  %v6110_v53 = vld [vmem:[#allocation55_spill] sm:$0xff] }
 0x58f   :  { %v1860_v30 = vadd.f32 %v1859_v46, %v6094_v10  ;;  %v1861_v33 = vpop.f32.mrb[34].mxu0  ;;  %v1902_v34 = vpop.f32.mrb[42].mxu1  ;;  %v1901_v54 = vadd.f32 %v1900_v29, %v6104_v52  ;;  %v6108_v46 = vld [vmem:[#allocation52_spill] sm:$0xff]  ;;  %v6112_v29 = vld [vmem:[#allocation57_spill] sm:$0xff] }
 0x590   :  { %v3001_v38 = vmul.f32 -1.442695, %v1858_v57  ;;  %v1862_v8 = vpop.f32.mrb[35].mxu0  ;;  %v1903_v13 = vpop.f32.mrb[43].mxu1  ;;  %2067 = vmatpush1.bf16.msra.mxu0 %v6095_v60  ;;  %2108 = vmatpush1.bf16.msra.mxu1 %v6096_v19  ;;  %v3003_v59 = vmul.f32 -1.442695, %v1899_v5 }
 0x591   :  { %v3002_v15 = vmul.f32 -1.442695, %v1860_v30  ;;  %2068 = vmatprep.subr.bf16.mxu0 %v6097_v22  ;;  %2109 = vmatprep.subr.bf16.mxu1 %v6098_v18  ;;  %v6107_v57 = vld [vmem:[#allocation51_spill] sm:$0xff]  ;;  %v6109_v34 = vld [vmem:[#allocation53_spill] sm:$0xff]  ;;  %v6111_v8 = vld [vmem:[#allocation56_spill] sm:$0xff] }
 0x592   :  { %3386 = vpow2.f32 %v3001_v38  ;;  %v6114_v5 = vld [vmem:[#allocation59_spill] sm:$0xff] }
 0x593   :  { %3388 = vpow2.f32 %v3002_v15  ;;  %v6113_v15 = vld [vmem:[#allocation58_spill] sm:$0xff] }
 0x594   :  { %2069 = vmatpush1.bf16.msra.mxu0 %v6099_v1  ;;  %2110 = vmatpush1.bf16.msra.mxu1 %v6100_v47  ;;  %3390 = vtanh.f32 %v1901_v54  ;;  %v6116_v54 = vld [vmem:[#allocation61_spill] sm:$0xff] }
 0x595   :  { %2070 = vmatprep.subr.bf16.mxu0 %v6102_v49  ;;  %2111 = vmatprep.subr.bf16.mxu1 %v6103_v28  ;;  %3392 = vpow2.f32 %v3003_v59  ;;  %v6118_v59 = vld [vmem:[#allocation19_spill] sm:$0xff] }
 0x598   :  { %2071 = vmatpush1.bf16.msra.mxu0 %v6105_v61  ;;  %2112 = vmatpush1.bf16.msra.mxu1 %v6106_v20 }
 0x599   :  { %2072 = vmatprep.subr.bf16.mxu0 %v6107_v57  ;;  %2113 = vmatprep.subr.bf16.mxu1 %v6108_v46  ;;  %v6115_v46 = vld [vmem:[#allocation60_spill] sm:$0xff] }
 0x59a   :  { %v6126_v57 = vld [vmem:[#allocation28_spill] sm:$0xff] }
 0x59c   :  { %v3387_v30 = vpop.eup %3386  ;;  %2073 = vmatpush1.bf16.msra.mxu0 %v6109_v34  ;;  %2114 = vmatpush1.bf16.msra.mxu1 %v6110_v53  ;;  %v6123_v53 = vld [vmem:[#allocation21_spill] sm:$0xff]  ;;  %v6124_v34 = vld [vmem:[#allocation26_spill] sm:$0xff] }
 0x59d   :  { %v1914_v33 = vadd.f32 1.0, %v3387_v30  ;;  %v3389_v38 = vpop.eup %3388  ;;  %2074 = vmatprep.subr.bf16.mxu0 %v6111_v8  ;;  %2115 = vmatprep.subr.bf16.mxu1 %v6112_v29  ;;  %v6117_v30 = vld [vmem:[#allocation62_spill] sm:$0xff]  ;;  %v6121_v8 = vld [vmem:[#allocation24_spill] sm:$0xff] }
 0x59e   :  { %v1915_v13 = vadd.f32 1.0, %v3389_v38  ;;  %v3391_v29 = vpop.eup %3390 }
 0x59f   :  { %3394 = vrcp.f32 %v1914_v33  ;;  %v3393_v33 = vpop.eup %3392 }
 0x5a0   :  { %3396 = vrcp.f32 %v1915_v13  ;;  %2075 = vmatpush1.bf16.msra.mxu0 %v6113_v15  ;;  %2116 = vmatpush1.bf16.msra.mxu1 %v6114_v5  ;;  %v6119_v13 = vld [vmem:[#allocation22_spill] sm:$0xff]  ;;  %v6120_v15 = vld [vmem:[#allocation23_spill] sm:$0xff] }
 0x5a1   :  { %2076 = vmatprep.subr.bf16.mxu0 %v6115_v46  ;;  %2117 = vmatprep.subr.bf16.mxu1 %v6116_v54  ;;  %v6122_v46 = vld [vmem:[#allocation25_spill] sm:$0xff] }
 0x5a4   :  { %2077 = vmatpush1.bf16.msra.mxu0 %v6117_v30  ;;  %2118 = vmatpush1.bf16.msra.mxu1 %v4805_v62  ;;  %v1916_v30 = vadd.f32 1.0, %v3393_v33  ;;  %v6130_v33 = vld [vmem:[#allocation46_spill] sm:$0xff] }
 0x5a5   :  { %2078 = vmatprep.subr.bf16.mxu0 %v6118_v59  ;;  %2119 = vmatprep.subr.bf16.mxu1 %v4811_v25  ;;  %v6125_v59 = vld [vmem:[#allocation27_spill] sm:$0xff] }
 0x5a6   :  { %3398 = vrcp.f32 %v1916_v30 }
 0x5a8   :  { %2079 = vmatpush1.bf16.msra.mxu0 %v6119_v13  ;;  %2120 = vmatpush1.bf16.msra.mxu1 %v6120_v15  ;;  %v6127_v13 = vld [vmem:[#allocation39_spill] sm:$0xff] }
 0x5a9   :  { %v3395_v38 = vpop.eup %3394  ;;  %2080 = vmatprep.subr.bf16.mxu0 %v6121_v8  ;;  %2121 = vmatprep.subr.bf16.mxu1 %v6122_v46 }
 0x5aa   :  { %v1925_v5 = vmul.f32 %v3395_v38, %v3391_v29  ;;  %v3397_v54 = vpop.eup %3396  ;;  %v6128_v29 = vld [vmem:[#allocation42_spill] sm:$0xff]  ;;  %v6129_v38 = vld [vmem:[#allocation43_spill] sm:$0xff] }
 0x5ab   :  { %v1924_v62 = vmul.f32 %v3397_v54, %v6123_v53  ;;  %v6131_v53 = vld [vmem:[#allocation47_spill] sm:$0xff]  ;;  %v6132_v54 = vld [vmem:[#allocation49_spill] sm:$0xff] }
 0x5ac   :  { %2081 = vmatpush1.bf16.msra.mxu0 %v6124_v34  ;;  %2122 = vmatpush1.bf16.msra.mxu1 %v6125_v59 }
 0x5ad   :  { %v4977_v25 = vadd.f32 %v1925_v5, %v1924_v62  ;;  %2082 = vmatprep.subr.bf16.mxu0 %v6126_v57  ;;  %2123 = vmatprep.subr.bf16.mxu1 %v6127_v13  ;;  %v6133_v62 = vld [vmem:[#allocation54_spill] sm:$0xff] }
 0x5af   :  { %3400 = vtanh.f32 %v4977_v25 }
 0x5b0   :  { %2083 = vmatpush1.bf16.msra.mxu0 %v6128_v29  ;;  %2124 = vmatpush1.bf16.msra.mxu1 %v6129_v38  ;;  %v3399_v5 = vpop.eup %3398  ;;  %v4992_v29 = vld [vmem:[#allocation2 + $0x4] ss:$16 sps:$4 sm:$0xff]  }
 0x5b1   :  { %2084 = vmatprep.subr.bf16.mxu0 %v6130_v33  ;;  %2125 = vmatprep.subr.bf16.mxu1 %v6131_v53  ;;  %6134 = vst [vmem:[#allocation68_spill] sm:$0xff] %v4992_v29  ;;  %v4995_v33 = vld [vmem:[#allocation2 + $0xc] ss:$16 sps:$4 sm:$0xff]  }
 0x5b2   :  { %6135 = vst [vmem:[#allocation69_spill] sm:$0xff] %v4995_v33 }
 0x5b4   :  { %2085 = vmatpush1.bf16.msra.mxu0 %v6132_v54  ;;  %2126 = vmatpush1.bf16.msra.mxu1 %v4857_v14 }
 0x5b5   :  { %2086 = vmatprep.subr.bf16.mxu0 %v6133_v62  ;;  %2127 = vmatprep.subr.bf16.mxu1 %v4863_v16 }
 0x5b8   :  { %2087 = vmatpush1.bf16.msra.mxu0 %v4866_v36  ;;  %2128 = vmatpush1.bf16.msra.mxu1 %v4869_v40  ;;  %v5000_v36 = vld [vmem:[#allocation2] ss:$16 sps:$4 sm:$0xff]   ;;  %v5003_v40 = vld [vmem:[#allocation2 + $0x8] ss:$16 sps:$4 sm:$0xff]  }
 0x5b9   :  { %v3401_v30 = vpop.eup %3400  ;;  %2166 = vmatprep.subr.bf16.mxu0 %v4992_v29  ;;  %2207 = vmatprep.subr.bf16.mxu1 %v4995_v33  ;;  %6136 = vst [vmem:[#allocation70_spill] sm:$0xff] %v5000_v36  ;;  %6137 = vst [vmem:[#allocation71_spill] sm:$0xff] %v5003_v40  ;;  %v5006_v29 = vld [vmem:[#allocation2 + $0x24] ss:$16 sps:$4 sm:$0xff]  }
 0x5ba   :  { %v1928_v54 = vmul.f32 %v3401_v30, %v3399_v5  ;;  %6138 = vst [vmem:[#allocation72_spill] sm:$0xff] %v5006_v29  ;;  %v5009_v5 = vld [vmem:[#allocation2 + $0x2c] ss:$16 sps:$4 sm:$0xff]  }
 0x5bb   :  { %6139 = vst [vmem:[#allocation73_spill] sm:$0xff] %v5009_v5  ;;  %v5023_v30 = vld [vmem:[#allocation2 + $0x4c] ss:$16 sps:$4 sm:$0xff]  }
 0x5bc   :  { %v2055_v14 = vpack.c.bf16 %v1928_v54, %v1928_v54  ;;  %v5020_v54 = vld [vmem:[#allocation2 + $0x44] ss:$16 sps:$4 sm:$0xff]   ;;  %6143 = vst [vmem:[#allocation29_spill] sm:$0xff] %v5023_v30 }
 0x5bd   :  { %6142 = vst [vmem:[#allocation76_spill] sm:$0xff] %v5020_v54 }
 0x5be   :  { %2088 = vmatprep.mubr.bf16.mxu0 %v2055_v14  ;;  %2129 = vmatprep.mubr.bf16.mxu1 %v2055_v14  ;;  %v5014_v14 = vld [vmem:[#allocation2 + $0x20] ss:$16 sps:$4 sm:$0xff]  }
 0x5bf   :  { %2089 = vmatmul.mubr.bf16.vlgmr.msra.gmra.mrb[40].mxu0 %v4918_v3  ;;  %2130 = vmatmul.mubr.bf16.vlgmr.msra.gmra.mrb[48].mxu1 %v4918_v3  ;;  %6140 = vst [vmem:[#allocation74_spill] sm:$0xff] %v5014_v14  ;;  %v5017_v3 = vld [vmem:[#allocation2 + $0x28] ss:$16 sps:$4 sm:$0xff]  }
 0x5c0   :  { %2167 = vmatpush1.bf16.msra.mxu0 %v5000_v36  ;;  %2208 = vmatpush1.bf16.msra.mxu1 %v5003_v40  ;;  %6141 = vst [vmem:[#allocation75_spill] sm:$0xff] %v5017_v3 }
 0x5c1   :  { %2168 = vmatprep.subr.bf16.mxu0 %v5006_v29  ;;  %2209 = vmatprep.subr.bf16.mxu1 %v5009_v5  ;;  %v5026_v5 = vld [vmem:[#allocation2 + $0x40] ss:$16 sps:$4 sm:$0xff]  }
 0x5c2   :  { %2198 = vmatprep.mubr.bf16.mxu0 %v6010_v63  ;;  %2239 = vmatprep.mubr.bf16.mxu1 %v6010_v63  ;;  %6144 = vst [vmem:[#allocation30_spill] sm:$0xff] %v5026_v5  ;;  %v5029_v63 = vld [vmem:[#allocation2 + $0x48] ss:$16 sps:$4 sm:$0xff]  }
 0x5c3   :  { %6145 = vst [vmem:[#allocation31_spill] sm:$0xff] %v5029_v63 }
 0x5c4   :  { %2169 = vmatpush1.bf16.msra.mxu0 %v5014_v14  ;;  %2210 = vmatpush1.bf16.msra.mxu1 %v5017_v3  ;;  %v5032_v14 = vld [vmem:[#allocation2 + $0x64] ss:$16 sps:$4 sm:$0xff]   ;;  %v5035_v3 = vld [vmem:[#allocation2 + $0x6c] ss:$16 sps:$4 sm:$0xff]  }
 0x5c5   :  { %2170 = vmatprep.subr.bf16.mxu0 %v5020_v54  ;;  %2211 = vmatprep.subr.bf16.mxu1 %v5023_v30  ;;  %6146 = vst [vmem:[#allocation32_spill] sm:$0xff] %v5032_v14  ;;  %6147 = vst [vmem:[#allocation33_spill] sm:$0xff] %v5035_v3  ;;  %v5038_v54 = vld [vmem:[#allocation2 + $0x60] ss:$16 sps:$4 sm:$0xff]   ;;  %v5041_v30 = vld [vmem:[#allocation2 + $0x68] ss:$16 sps:$4 sm:$0xff]  }
 0x5c6   :  { %6148 = vst [vmem:[#allocation34_spill] sm:$0xff] %v5038_v54  ;;  %6149 = vst [vmem:[#allocation35_spill] sm:$0xff] %v5041_v30 }
 0x5c8   :  { %2171 = vmatpush1.bf16.msra.mxu0 %v5026_v5  ;;  %2212 = vmatpush1.bf16.msra.mxu1 %v5029_v63  ;;  %v5044_v5 = vld [vmem:[#allocation2 + $0x84] ss:$16 sps:$4 sm:$0xff]   ;;  %v5047_v63 = vld [vmem:[#allocation2 + $0x8c] ss:$16 sps:$4 sm:$0xff]  }
 0x5c9   :  { %2172 = vmatprep.subr.bf16.mxu0 %v5032_v14  ;;  %2213 = vmatprep.subr.bf16.mxu1 %v5035_v3  ;;  %6150 = vst [vmem:[#allocation36_spill] sm:$0xff] %v5044_v5  ;;  %6151 = vst [vmem:[#allocation37_spill] sm:$0xff] %v5047_v63  ;;  %v5050_v14 = vld [vmem:[#allocation2 + $0x80] ss:$16 sps:$4 sm:$0xff]   ;;  %v5053_v3 = vld [vmem:[#allocation2 + $0x88] ss:$16 sps:$4 sm:$0xff]  }
 0x5ca   :  { %6152 = vst [vmem:[#allocation38_spill] sm:$0xff] %v5050_v14  ;;  %6153 = vst [vmem:[#allocation40_spill] sm:$0xff] %v5053_v3 }
 0x5cc   :  { %2173 = vmatpush1.bf16.msra.mxu0 %v5038_v54  ;;  %2214 = vmatpush1.bf16.msra.mxu1 %v5041_v30  ;;  %v5056_v54 = vld [vmem:[#allocation2 + $0xa4] ss:$16 sps:$4 sm:$0xff]   ;;  %v5059_v30 = vld [vmem:[#allocation2 + $0xac] ss:$16 sps:$4 sm:$0xff]  }
 0x5cd   :  { %2174 = vmatprep.subr.bf16.mxu0 %v5044_v5  ;;  %2215 = vmatprep.subr.bf16.mxu1 %v5047_v63  ;;  %6154 = vst [vmem:[#allocation41_spill] sm:$0xff] %v5056_v54  ;;  %6155 = vst [vmem:[#allocation44_spill] sm:$0xff] %v5059_v30  ;;  %v5062_v5 = vld [vmem:[#allocation2 + $0xa0] ss:$16 sps:$4 sm:$0xff]   ;;  %v5065_v63 = vld [vmem:[#allocation2 + $0xa8] ss:$16 sps:$4 sm:$0xff]  }
 0x5ce   :  { %6156 = vst [vmem:[#allocation45_spill] sm:$0xff] %v5062_v5  ;;  %6157 = vst [vmem:[#allocation48_spill] sm:$0xff] %v5065_v63 }
 0x5d0   :  { %2175 = vmatpush1.bf16.msra.mxu0 %v5050_v14  ;;  %2216 = vmatpush1.bf16.msra.mxu1 %v5053_v3  ;;  %v5068_v14 = vld [vmem:[#allocation2 + $0xc4] ss:$16 sps:$4 sm:$0xff]   ;;  %v5071_v3 = vld [vmem:[#allocation2 + $0xcc] ss:$16 sps:$4 sm:$0xff]  }
 0x5d1   :  { %2176 = vmatprep.subr.bf16.mxu0 %v5056_v54  ;;  %2217 = vmatprep.subr.bf16.mxu1 %v5059_v30  ;;  %6158 = vst [vmem:[#allocation23_spill] sm:$0xff] %v5068_v14  ;;  %6159 = vst [vmem:[#allocation24_spill] sm:$0xff] %v5071_v3  ;;  %v5074_v54 = vld [vmem:[#allocation2 + $0xc0] ss:$16 sps:$4 sm:$0xff]   ;;  %v5077_v30 = vld [vmem:[#allocation2 + $0xc8] ss:$16 sps:$4 sm:$0xff]  }
 0x5d2   :  { %6160 = vst [vmem:[#allocation25_spill] sm:$0xff] %v5074_v54  ;;  %6161 = vst [vmem:[#allocation21_spill] sm:$0xff] %v5077_v30 }
 0x5d4   :  { %2177 = vmatpush1.bf16.msra.mxu0 %v5062_v5  ;;  %2218 = vmatpush1.bf16.msra.mxu1 %v5065_v63  ;;  %v5080_v5 = vld [vmem:[#allocation2 + $0xe4] ss:$16 sps:$4 sm:$0xff]   ;;  %v5083_v63 = vld [vmem:[#allocation2 + $0xec] ss:$16 sps:$4 sm:$0xff]  }
 0x5d5   :  { %2178 = vmatprep.subr.bf16.mxu0 %v5068_v14  ;;  %2219 = vmatprep.subr.bf16.mxu1 %v5071_v3  ;;  %6162 = vst [vmem:[#allocation26_spill] sm:$0xff] %v5080_v5  ;;  %6163 = vst [vmem:[#allocation27_spill] sm:$0xff] %v5083_v63  ;;  %v5086_v14 = vld [vmem:[#allocation2 + $0xe0] ss:$16 sps:$4 sm:$0xff]  }
 0x5d6   :  { %6164 = vst [vmem:[#allocation28_spill] sm:$0xff] %v5086_v14 }
 0x5d8   :  { %2179 = vmatpush1.bf16.msra.mxu0 %v5074_v54  ;;  %2220 = vmatpush1.bf16.msra.mxu1 %v5077_v30 }
 0x5d9   :  { %2180 = vmatprep.subr.bf16.mxu0 %v5080_v5  ;;  %2221 = vmatprep.subr.bf16.mxu1 %v5083_v63 }
 0x5dc   :  { %2181 = vmatpush1.bf16.msra.mxu0 %v5086_v14  ;;  %2222 = vmatpush1.bf16.msra.mxu1 %v4657_v23 }
 0x5dd   :  { %2298 = vmatprep.subr.bf16.mxu0 %v4660_v27  ;;  %2339 = vmatprep.subr.bf16.mxu1 %v4663_v44 }
 0x64e   :  { %v1964_v54 = vpop.f32.mrb[36].mxu0  ;;  %v2005_v30 = vpop.f32.mrb[44].mxu1 }
 0x64f   :  { %v2016_v3 = vrot.slane %v1964_v54, 6  ;;  %v1966_v29 = vpop.f32.mrb[37].mxu0  ;;  %v2007_v40 = vpop.f32.mrb[45].mxu1  ;;  %v2018_v27 = vrot.slane %v2005_v30, 6 }
 0x650   :  { %v2017_v5 = vrot.slane %v1966_v29, 6  ;;  %v1968_v36 = vpop.f32.mrb[38].mxu0  ;;  %v2009_v33 = vpop.f32.mrb[46].mxu1  ;;  %v2019_v44 = vrot.slane %v2007_v40, 6 }
 0x651   :  { %v2024_v63 = vadd.f32 %v2016_v3, %v6084_v56  ;;  %v1969_v16 = vpop.f32.mrb[39].mxu0  ;;  %v2010_v62 = vpop.f32.mrb[47].mxu1  ;;  %v2026_v38 = vadd.f32 %v2018_v27, %v6086_v37 }
 0x652   :  { %v2025_v14 = vadd.f32 %v2017_v5, %v6085_v58  ;;  %v2027_v54 = vadd.f32 %v2019_v44, %v6087_v6 }
 0x653   :  { %v3004_v53 = vmul.f32 -1.442695, %v2024_v63  ;;  %v3006_v13 = vmul.f32 -1.442695, %v2026_v38 }
 0x654   :  { %v3005_v23 = vmul.f32 -1.442695, %v2025_v14 }
 0x655   :  { %3402 = vpow2.f32 %v3004_v53  ;;  %v2048_v53 = vrot.slane %v4915_v55, 6 }
 0x656   :  { %3404 = vpow2.f32 %v3005_v23 }
 0x657   :  { %3406 = vtanh.f32 %v2027_v54 }
 0x658   :  { %3408 = vpow2.f32 %v3006_v13 }
 0x65f   :  { %v3403_v29 = vpop.eup %3402 }
 0x660   :  { %v2037_v36 = vadd.f32 1.0, %v3403_v29  ;;  %v3405_v33 = vpop.eup %3404  ;;  %v6175_v29 = vld [vmem:[#allocation62_spill] sm:$0xff] }
 0x661   :  { %v2038_v16 = vadd.f32 1.0, %v3405_v33  ;;  %v3407_v62 = vpop.eup %3406 }
 0x662   :  { %3410 = vrcp.f32 %v2037_v36  ;;  %v3409_v63 = vpop.eup %3408  ;;  %v6176_v36 = vld [vmem:[#allocation18_spill] sm:$0xff] }
 0x663   :  { %3412 = vrcp.f32 %v2038_v16  ;;  %v2039_v3 = vadd.f32 1.0, %v3409_v63  ;;  %v6177_v16 = vld [vmem:[#allocation19_spill] sm:$0xff] }
 0x665   :  { %3414 = vrcp.f32 %v2039_v3 }
 0x66c   :  { %v3411_v5 = vpop.eup %3410 }
 0x66d   :  { %v2051_v14 = vmul.f32 %v3411_v5, %v3407_v62  ;;  %v3413_v40 = vpop.eup %3412  ;;  %v6178_v62 = vld [vmem:[#allocation20_spill] sm:$0xff] }
 0x66e   :  { %v2050_v30 = vmul.f32 %v3413_v40, %v2048_v53  ;;  %v6179_v40 = vld [vmem:[#allocation22_spill] sm:$0xff] }
 0x66f   :  { %v3415_v38 = vpop.eup %3414 }
 0x670   :  { %v5097_v23 = vadd.f32 %v2051_v14, %v2050_v30  ;;  %v6181_v30 = vld [vmem:[#allocation42_spill] sm:$0xff] }
 0x672   :  { %3416 = vtanh.f32 %v5097_v23 }
 0x67c   :  { %v3417_v27 = vpop.eup %3416 }
 0x67d   :  { %v2054_v13 = vmul.f32 %v3417_v27, %v3415_v38  ;;  %v6185_v38 = vld [vmem:[#allocation49_spill] sm:$0xff]  ;;  %v6186_v27 = vld [vmem:[#allocation50_spill] sm:$0xff] }
 0x67f   :  { %v2162_v44 = vpack.c.bf16 %v2054_v13, %v2054_v13 }
 0x681   :  { %v5100_v54 = vrot.slane %v2162_v44, 1 }
 0x683   :  { %2199 = vmatmul.mubr.bf16.vlgmr.msra.gmra.mrb[44].mxu0 %v5100_v54  ;;  %2240 = vmatmul.mubr.bf16.vlgmr.msra.gmra.mrb[52].mxu1 %v5100_v54 }
 0x684   :  { %2299 = vmatpush1.bf16.msra.mxu0 %v4678_v39  ;;  %2340 = vmatpush1.bf16.msra.mxu1 %v4681_v11 }
 0x685   :  { %2300 = vmatprep.subr.bf16.mxu0 %v4684_v51  ;;  %2341 = vmatprep.subr.bf16.mxu1 %v4687_v24 }
 0x688   :  { %2301 = vmatpush1.bf16.msra.mxu0 %v4690_v9  ;;  %2342 = vmatpush1.bf16.msra.mxu1 %v4693_v7 }
 0x689   :  { %2302 = vmatprep.subr.bf16.mxu0 %v4696_v12  ;;  %2343 = vmatprep.subr.bf16.mxu1 %v4699_v35 }
 0x68c   :  { %2303 = vmatpush1.bf16.msra.mxu0 %v6088_v41  ;;  %2344 = vmatpush1.bf16.msra.mxu1 %v6089_v32 }
 0x68d   :  { %2304 = vmatprep.subr.bf16.mxu0 %v6090_v26  ;;  %2345 = vmatprep.subr.bf16.mxu1 %v6091_v0  ;;  %v6166_v26 = vld [vmem:[#allocation52_spill] sm:$0xff] }
 0x690   :  { %2305 = vmatpush1.bf16.msra.mxu0 %v6092_v2  ;;  %2346 = vmatpush1.bf16.msra.mxu1 %v4718_v50 }
 0x691   :  { %2306 = vmatprep.subr.bf16.mxu0 %v4722_v4  ;;  %2347 = vmatprep.subr.bf16.mxu1 %v4725_v31 }
 0x692   :  { %v2090_v39 = vpop.f32.mrb[40].mxu0  ;;  %v2131_v11 = vpop.f32.mrb[48].mxu1 }
 0x693   :  { %v2091_v51 = vadd.f32 %v2090_v39, %v6093_v45  ;;  %v2092_v24 = vpop.f32.mrb[41].mxu0  ;;  %v2133_v9 = vpop.f32.mrb[49].mxu1  ;;  %v2132_v4 = vadd.f32 %v2131_v11, %v6101_v42  ;;  %v6189_v39 = vld [vmem:[#allocation66_spill] sm:$0xff]  ;;  %v6190_v11 = vld [vmem:[#allocation67_spill] sm:$0xff] }
 0x694   :  { %v2093_v7 = vadd.f32 %v2092_v24, %v6094_v10  ;;  %v2094_v12 = vpop.f32.mrb[42].mxu0  ;;  %v2135_v35 = vpop.f32.mrb[50].mxu1  ;;  %2307 = vmatpush1.bf16.msra.mxu0 %v4728_v21  ;;  %2348 = vmatpush1.bf16.msra.mxu1 %v4731_v43  ;;  %v2134_v21 = vadd.f32 %v2133_v9, %v6104_v52  ;;  %v6191_v24 = vld [vmem:[#allocation68_spill] sm:$0xff]  ;;  %v6192_v9 = vld [vmem:[#allocation69_spill] sm:$0xff] }
 0x695   :  { %v3007_v55 = vmul.f32 -1.442695, %v2091_v51  ;;  %v2095_v41 = vpop.f32.mrb[43].mxu0  ;;  %v2136_v32 = vpop.f32.mrb[51].mxu1  ;;  %2308 = vmatprep.subr.bf16.mxu0 %v4734_v17  ;;  %2349 = vmatprep.subr.bf16.mxu1 %v4737_v48  ;;  %v3009_v31 = vmul.f32 -1.442695, %v2132_v4 }
 0x696   :  { %v3008_v50 = vmul.f32 -1.442695, %v2093_v7  ;;  %v6165_v48 = vld [vmem:[#allocation51_spill] sm:$0xff]  ;;  %v6193_v35 = vld [vmem:[#allocation70_spill] sm:$0xff]  ;;  %v6195_v41 = vld [vmem:[#allocation72_spill] sm:$0xff] }
 0x697   :  { %3418 = vpow2.f32 %v3007_v55  ;;  %v6194_v55 = vld [vmem:[#allocation71_spill] sm:$0xff]  ;;  %v6196_v32 = vld [vmem:[#allocation73_spill] sm:$0xff]  ;;  %v6198_v4 = vld [vmem:[#allocation74_spill] sm:$0xff] }
 0x698   :  { %3420 = vpow2.f32 %v3008_v50  ;;  %2309 = vmatpush1.bf16.msra.mxu0 %v6095_v60  ;;  %2350 = vmatpush1.bf16.msra.mxu1 %v6096_v19  ;;  %v6167_v60 = vld [vmem:[#allocation53_spill] sm:$0xff]  ;;  %v6168_v19 = vld [vmem:[#allocation55_spill] sm:$0xff]  ;;  %v6197_v50 = vmov 0  }
 0x699   :  { %2310 = vmatprep.subr.bf16.mxu0 %v6097_v22  ;;  %2351 = vmatprep.subr.bf16.mxu1 %v6098_v18  ;;  %3422 = vtanh.f32 %v2134_v21  ;;  %v6169_v22 = vld [vmem:[#allocation56_spill] sm:$0xff]  ;;  %v6170_v18 = vld [vmem:[#allocation57_spill] sm:$0xff]  ;;  %v6199_v21 = vld [vmem:[#allocation75_spill] sm:$0xff] }
 0x69a   :  { %3424 = vpow2.f32 %v3009_v31  ;;  %v6200_v31 = vld [vmem:[#allocation76_spill] sm:$0xff] }
 0x69c   :  { %2311 = vmatpush1.bf16.msra.mxu0 %v6099_v1  ;;  %2352 = vmatpush1.bf16.msra.mxu1 %v6100_v47  ;;  %v6171_v1 = vld [vmem:[#allocation58_spill] sm:$0xff]  ;;  %v6172_v47 = vld [vmem:[#allocation59_spill] sm:$0xff] }
 0x69d   :  { %2312 = vmatprep.subr.bf16.mxu0 %v6102_v49  ;;  %2353 = vmatprep.subr.bf16.mxu1 %v6103_v28  ;;  %v6173_v49 = vld [vmem:[#allocation60_spill] sm:$0xff]  ;;  %v6174_v28 = vld [vmem:[#allocation61_spill] sm:$0xff] }
 0x6a0   :  { %2313 = vmatpush1.bf16.msra.mxu0 %v6105_v61  ;;  %2354 = vmatpush1.bf16.msra.mxu1 %v6106_v20 }
 0x6a1   :  { %v3419_v43 = vpop.eup %3418  ;;  %2314 = vmatprep.subr.bf16.mxu0 %v6165_v48  ;;  %2355 = vmatprep.subr.bf16.mxu1 %v6166_v26  ;;  %v6204_v48 = vld [vmem:[#allocation32_spill] sm:$0xff]  ;;  %v6205_v26 = vld [vmem:[#allocation33_spill] sm:$0xff] }
 0x6a2   :  { %v2147_v17 = vadd.f32 1.0, %v3419_v43  ;;  %v3421_v0 = vpop.eup %3420  ;;  %v6201_v43 = vld [vmem:[#allocation29_spill] sm:$0xff] }
 0x6a3   :  { %v2148_v2 = vadd.f32 1.0, %v3421_v0  ;;  %v3423_v61 = vpop.eup %3422  ;;  %v6206_v0 = vld [vmem:[#allocation34_spill] sm:$0xff] }
 0x6a4   :  { %3426 = vrcp.f32 %v2147_v17  ;;  %2315 = vmatpush1.bf16.msra.mxu0 %v6167_v60  ;;  %2356 = vmatpush1.bf16.msra.mxu1 %v6168_v19  ;;  %v3425_v20 = vpop.eup %3424  ;;  %v6203_v17 = vld [vmem:[#allocation31_spill] sm:$0xff]  ;;  %v6208_v60 = vld [vmem:[#allocation36_spill] sm:$0xff]  ;;  %v6209_v19 = vld [vmem:[#allocation37_spill] sm:$0xff] }
 0x6a5   :  { %3428 = vrcp.f32 %v2148_v2  ;;  %2316 = vmatprep.subr.bf16.mxu0 %v6169_v22  ;;  %2357 = vmatprep.subr.bf16.mxu1 %v6170_v18  ;;  %v2149_v53 = vadd.f32 1.0, %v3425_v20  ;;  %v6207_v2 = vld [vmem:[#allocation35_spill] sm:$0xff]  ;;  %v6210_v22 = vld [vmem:[#allocation38_spill] sm:$0xff]  ;;  %v6211_v18 = vld [vmem:[#allocation40_spill] sm:$0xff] }
 0x6a6   :  { %v6217_v20 = vld [vmem:[#allocation24_spill] sm:$0xff] }
 0x6a7   :  { %3430 = vrcp.f32 %v2149_v53  ;;  %v5212_v53 = vld [vmem:[#allocation5 + $0xc] ss:$16 sps:$4 sm:$0xff]  }
 0x6a8   :  { %2317 = vmatpush1.bf16.msra.mxu0 %v6171_v1  ;;  %2358 = vmatpush1.bf16.msra.mxu1 %v6172_v47  ;;  %v6212_v1 = vld [vmem:[#allocation41_spill] sm:$0xff]  ;;  %v6213_v47 = vld [vmem:[#allocation44_spill] sm:$0xff] }
 0x6a9   :  { %2318 = vmatprep.subr.bf16.mxu0 %v6173_v49  ;;  %2359 = vmatprep.subr.bf16.mxu1 %v6174_v28  ;;  %v6214_v49 = vld [vmem:[#allocation45_spill] sm:$0xff]  ;;  %v6215_v28 = vld [vmem:[#allocation48_spill] sm:$0xff] }
 0x6ac   :  { %2319 = vmatpush1.bf16.msra.mxu0 %v6175_v29  ;;  %2360 = vmatpush1.bf16.msra.mxu1 %v6176_v36  ;;  %v6218_v29 = vld [vmem:[#allocation25_spill] sm:$0xff] }
 0x6ad   :  { %2320 = vmatprep.subr.bf16.mxu0 %v6177_v16  ;;  %2361 = vmatprep.subr.bf16.mxu1 %v6178_v62  ;;  %v6219_v36 = vld [vmem:[#allocation21_spill] sm:$0xff]  ;;  %v6221_v16 = vld [vmem:[#allocation27_spill] sm:$0xff]  ;;  %v6222_v62 = vld [vmem:[#allocation28_spill] sm:$0xff] }
 0x6ae   :  { %v3427_v33 = vpop.eup %3426 }
 0x6af   :  { %v2158_v63 = vmul.f32 %v3427_v33, %v3423_v61  ;;  %v3429_v5 = vpop.eup %3428  ;;  %v6216_v61 = vld [vmem:[#allocation23_spill] sm:$0xff]  ;;  %v6220_v33 = vld [vmem:[#allocation26_spill] sm:$0xff] }
 0x6b0   :  { %v2157_v14 = vmul.f32 %v3429_v5, %v4977_v25  ;;  %2321 = vmatpush1.bf16.msra.mxu0 %v6179_v40  ;;  %2362 = vmatpush1.bf16.msra.mxu1 %v6120_v15  ;;  %v6180_v25 = vld [vmem:[#allocation39_spill] sm:$0xff]  ;;  %v5209_v5 = vld [vmem:[#allocation5 + $0x4] ss:$16 sps:$4 sm:$0xff]  }
 0x6b1   :  { %2322 = vmatprep.subr.bf16.mxu0 %v6121_v8  ;;  %2363 = vmatprep.subr.bf16.mxu1 %v6122_v46  ;;  %v6182_v15 = vld [vmem:[#allocation43_spill] sm:$0xff]  ;;  %v6183_v8 = vld [vmem:[#allocation46_spill] sm:$0xff]  ;;  %v3431_v13 = vpop.eup %3430 }
 0x6b2   :  { %v5157_v3 = vadd.f32 %v2158_v63, %v2157_v14  ;;  %v6184_v46 = vld [vmem:[#allocation47_spill] sm:$0xff] }
 0x6b3   :  { %v3641_v63 = vld [vmem:[#allocation2 + $0xe8] ss:$16 sps:$4 sm:$0xff]  }
 0x6b4   :  { %3432 = vtanh.f32 %v5157_v3  ;;  %2323 = vmatpush1.bf16.msra.mxu0 %v6124_v34  ;;  %2364 = vmatpush1.bf16.msra.mxu1 %v6125_v59  ;;  %v6187_v34 = vld [vmem:[#allocation54_spill] sm:$0xff]  ;;  %v6188_v59 = vld [vmem:[#allocation65_spill] sm:$0xff] }
 0x6b5   :  { %2324 = vmatprep.subr.bf16.mxu0 %v6126_v57  ;;  %2365 = vmatprep.subr.bf16.mxu1 %v6180_v25 }
 0x6b8   :  { %2325 = vmatpush1.bf16.msra.mxu0 %v6181_v30  ;;  %2366 = vmatpush1.bf16.msra.mxu1 %v6182_v15 }
 0x6b9   :  { %2326 = vmatprep.subr.bf16.mxu0 %v6183_v8  ;;  %2367 = vmatprep.subr.bf16.mxu1 %v6184_v46 }
 0x6bc   :  { %2327 = vmatpush1.bf16.msra.mxu0 %v6185_v38  ;;  %2368 = vmatpush1.bf16.msra.mxu1 %v6186_v27 }
 0x6bd   :  { %2328 = vmatprep.subr.bf16.mxu0 %v6187_v34  ;;  %2369 = vmatprep.subr.bf16.mxu1 %v6188_v59 }
 0x6be   :  { %v3433_v57 = vpop.eup %3432 }
 0x6bf   :  { %v2161_v44 = vmul.f32 %v3433_v57, %v3431_v13 }
 0x6c0   :  { %2329 = vmatpush1.bf16.msra.mxu0 %v6189_v39  ;;  %2370 = vmatpush1.bf16.msra.mxu1 %v6190_v11 }
 0x6c1   :  { %v2292_v51 = vrot.slane %v2161_v44, 6  ;;  %2408 = vmatprep.subr.bf16.mxu0 %v6191_v24  ;;  %2449 = vmatprep.subr.bf16.mxu1 %v6192_v9 }
 0x6c3   :  { %v2294_v7 = vpack.c.bf16 %v2292_v51, %v2292_v51 }
 0x6c5   :  { %v2296_v12 = vrot.slane %v2294_v7, 1 }
 0x6c7   :  { %2330 = vmatprep.mubr.bf16.mxu0 %v2296_v12  ;;  %2371 = vmatprep.mubr.bf16.mxu1 %v2296_v12 }
 0x6c8   :  { %2331 = vmatmul.mubr.bf16.vlgmr.msra.gmra.mrb[48].mxu0 %v5100_v54  ;;  %2372 = vmatmul.mubr.bf16.vlgmr.msra.gmra.mrb[56].mxu1 %v5100_v54  ;;  %v6202_v54 = vld [vmem:[#allocation30_spill] sm:$0xff] }
 0x6c9   :  { %2409 = vmatpush1.bf16.msra.mxu0 %v6193_v35  ;;  %2450 = vmatpush1.bf16.msra.mxu1 %v6194_v55 }
 0x6ca   :  { %2410 = vmatprep.subr.bf16.mxu0 %v6195_v41  ;;  %2451 = vmatprep.subr.bf16.mxu1 %v6196_v32 }
 0x6cb   :  { %2440 = vmatprep.mubr.bf16.mxu0 %v6197_v50  ;;  %2481 = vmatprep.mubr.bf16.mxu1 %v6197_v50 }
 0x6cd   :  { %2411 = vmatpush1.bf16.msra.mxu0 %v6198_v4  ;;  %2452 = vmatpush1.bf16.msra.mxu1 %v6199_v21  ;;  %v2284_v4 = vrot.slane %v5097_v23, 6  ;;  %v5227_v23 = vld [vmem:[#allocation5] ss:$16 sps:$4 sm:$0xff]  }
 0x6ce   :  { %2412 = vmatprep.subr.bf16.mxu0 %v6200_v31  ;;  %2453 = vmatprep.subr.bf16.mxu1 %v6201_v43 }
 0x6d1   :  { %2413 = vmatpush1.bf16.msra.mxu0 %v6202_v54  ;;  %2454 = vmatpush1.bf16.msra.mxu1 %v6203_v17 }
 0x6d2   :  { %2414 = vmatprep.subr.bf16.mxu0 %v6204_v48  ;;  %2455 = vmatprep.subr.bf16.mxu1 %v6205_v26 }
 0x6d5   :  { %2415 = vmatpush1.bf16.msra.mxu0 %v6206_v0  ;;  %2456 = vmatpush1.bf16.msra.mxu1 %v6207_v2 }
 0x6d6   :  { %2416 = vmatprep.subr.bf16.mxu0 %v6208_v60  ;;  %2457 = vmatprep.subr.bf16.mxu1 %v6209_v19  ;;  %v5230_v19 = vld [vmem:[#allocation5 + $0x8] ss:$16 sps:$4 sm:$0xff]  }
 0x6d9   :  { %2417 = vmatpush1.bf16.msra.mxu0 %v6210_v22  ;;  %2458 = vmatpush1.bf16.msra.mxu1 %v6211_v18  ;;  %v5233_v22 = vld [vmem:[#allocation5 + $0x24] ss:$16 sps:$4 sm:$0xff]   ;;  %v5236_v18 = vld [vmem:[#allocation5 + $0x2c] ss:$16 sps:$4 sm:$0xff]  }
 0x6da   :  { %2418 = vmatprep.subr.bf16.mxu0 %v6212_v1  ;;  %2459 = vmatprep.subr.bf16.mxu1 %v6213_v47  ;;  %v5239_v1 = vld [vmem:[#allocation5 + $0x20] ss:$16 sps:$4 sm:$0xff]   ;;  %v5242_v47 = vld [vmem:[#allocation5 + $0x28] ss:$16 sps:$4 sm:$0xff]  }
 0x6dd   :  { %2419 = vmatpush1.bf16.msra.mxu0 %v6214_v49  ;;  %2460 = vmatpush1.bf16.msra.mxu1 %v6215_v28  ;;  %v5245_v49 = vld [vmem:[#allocation5 + $0x44] ss:$16 sps:$4 sm:$0xff]   ;;  %v5248_v28 = vld [vmem:[#allocation5 + $0x4c] ss:$16 sps:$4 sm:$0xff]  }
 0x6de   :  { %2420 = vmatprep.subr.bf16.mxu0 %v6216_v61  ;;  %2461 = vmatprep.subr.bf16.mxu1 %v6217_v20  ;;  %v5251_v61 = vld [vmem:[#allocation5 + $0x40] ss:$16 sps:$4 sm:$0xff]   ;;  %v5254_v20 = vld [vmem:[#allocation5 + $0x48] ss:$16 sps:$4 sm:$0xff]  }
 0x6e1   :  { %2421 = vmatpush1.bf16.msra.mxu0 %v6218_v29  ;;  %2462 = vmatpush1.bf16.msra.mxu1 %v6219_v36  ;;  %v5257_v29 = vld [vmem:[#allocation5 + $0x64] ss:$16 sps:$4 sm:$0xff]   ;;  %v5260_v36 = vld [vmem:[#allocation5 + $0x6c] ss:$16 sps:$4 sm:$0xff]  }
 0x6e2   :  { %2422 = vmatprep.subr.bf16.mxu0 %v6220_v33  ;;  %2463 = vmatprep.subr.bf16.mxu1 %v6221_v16  ;;  %v5263_v33 = vld [vmem:[#allocation5 + $0x60] ss:$16 sps:$4 sm:$0xff]   ;;  %v5266_v16 = vld [vmem:[#allocation5 + $0x68] ss:$16 sps:$4 sm:$0xff]  }
 0x6e5   :  { %2423 = vmatpush1.bf16.msra.mxu0 %v6222_v62  ;;  %2464 = vmatpush1.bf16.msra.mxu1 %v3641_v63  ;;  %v5269_v62 = vld [vmem:[#allocation5 + $0x84] ss:$16 sps:$4 sm:$0xff]   ;;  %v5272_v63 = vld [vmem:[#allocation5 + $0x8c] ss:$16 sps:$4 sm:$0xff]  }
 0x6e6   :  { %2540 = vmatprep.subr.bf16.mxu0 %v5209_v5  ;;  %2581 = vmatprep.subr.bf16.mxu1 %v5212_v53 }
 0x756   :  { %v2200_v14 = vpop.f32.mrb[44].mxu0  ;;  %v2241_v40 = vpop.f32.mrb[52].mxu1 }
 0x757   :  { %v2252_v25 = vrot.slane %v2200_v14, 4  ;;  %v2202_v30 = vpop.f32.mrb[45].mxu0  ;;  %v2243_v15 = vpop.f32.mrb[53].mxu1  ;;  %v2254_v39 = vrot.slane %v2241_v40, 4 }
 0x758   :  { %v2253_v8 = vrot.slane %v2202_v30, 4  ;;  %v2204_v46 = vpop.f32.mrb[46].mxu0  ;;  %v2245_v38 = vpop.f32.mrb[54].mxu1  ;;  %v2255_v11 = vrot.slane %v2243_v15, 4 }
 0x759   :  { %v2260_v27 = vadd.f32 %v2252_v25, %v6084_v56  ;;  %v2205_v13 = vpop.f32.mrb[47].mxu0  ;;  %v2246_v34 = vpop.f32.mrb[55].mxu1  ;;  %v2262_v51 = vadd.f32 %v2254_v39, %v6086_v37  ;;  %v5286_v39 = vld [vmem:[#allocation5 + $0xac] ss:$16 sps:$4 sm:$0xff]   ;;  %v5409_v37 = vld [vmem:[#allocation5 + $0x1e4] ss:$16 sps:$4 sm:$0xff]  }
 0x75a   :  { %v2261_v59 = vadd.f32 %v2253_v8, %v6085_v58  ;;  %v2263_v24 = vadd.f32 %v2255_v11, %v6087_v6  ;;  %v5280_v13 = vld [vmem:[#allocation5 + $0x88] ss:$16 sps:$4 sm:$0xff]   ;;  %6231 = vst [vmem:[#allocation60_spill] sm:$0xff] %v5409_v37  ;;  %v5412_v58 = vld [vmem:[#allocation5 + $0x1ec] ss:$16 sps:$4 sm:$0xff]  }
 0x75b   :  { %v3010_v57 = vmul.f32 -1.442695, %v2260_v27  ;;  %v3012_v9 = vmul.f32 -1.442695, %v2262_v51  ;;  %v5277_v27 = vld [vmem:[#allocation5 + $0x80] ss:$16 sps:$4 sm:$0xff]  }
 0x75c   :  { %v3011_v44 = vmul.f32 -1.442695, %v2261_v59  ;;  %v5289_v51 = vld [vmem:[#allocation5 + $0xa0] ss:$16 sps:$4 sm:$0xff]   ;;  %v5406_v6 = vld [vmem:[#allocation5 + $0x1c8] ss:$16 sps:$4 sm:$0xff]  }
 0x75d   :  { %3434 = vpow2.f32 %v3010_v57  ;;  %6230 = vst [vmem:[#allocation59_spill] sm:$0xff] %v5406_v6 }
 0x75e   :  { %3436 = vpow2.f32 %v3011_v44  ;;  %v5283_v44 = vld [vmem:[#allocation5 + $0xa4] ss:$16 sps:$4 sm:$0xff]  }
 0x75f   :  { %3438 = vtanh.f32 %v2263_v24  ;;  %v5292_v24 = vld [vmem:[#allocation5 + $0xa8] ss:$16 sps:$4 sm:$0xff]  }
 0x760   :  { %3440 = vpow2.f32 %v3012_v9  ;;  %v5295_v9 = vld [vmem:[#allocation5 + $0xc4] ss:$16 sps:$4 sm:$0xff]  }
 0x767   :  { %v3435_v7 = vpop.eup %3434 }
 0x768   :  { %v2273_v12 = vadd.f32 1.0, %v3435_v7  ;;  %v3437_v35 = vpop.eup %3436  ;;  %v5298_v7 = vld [vmem:[#allocation5 + $0xcc] ss:$16 sps:$4 sm:$0xff]  }
 0x769   :  { %v2274_v55 = vadd.f32 1.0, %v3437_v35  ;;  %v3439_v41 = vpop.eup %3438  ;;  %v5302_v35 = vld [vmem:[#allocation5 + $0xc0] ss:$16 sps:$4 sm:$0xff]  }
 0x76a   :  { %3442 = vrcp.f32 %v2273_v12  ;;  %v3441_v32 = vpop.eup %3440 }
 0x76b   :  { %3444 = vrcp.f32 %v2274_v55  ;;  %v2275_v43 = vadd.f32 1.0, %v3441_v32  ;;  %v5305_v55 = vld [vmem:[#allocation5 + $0xc8] ss:$16 sps:$4 sm:$0xff]   ;;  %v5311_v32 = vld [vmem:[#allocation5 + $0xec] ss:$16 sps:$4 sm:$0xff]  }
 0x76d   :  { %3446 = vrcp.f32 %v2275_v43 }
 0x774   :  { %v3443_v50 = vpop.eup %3442 }
 0x775   :  { %v2287_v21 = vmul.f32 %v3443_v50, %v3439_v41  ;;  %v3445_v31 = vpop.eup %3444  ;;  %v5308_v41 = vld [vmem:[#allocation5 + $0xe4] ss:$16 sps:$4 sm:$0xff]  }
 0x776   :  { %v2286_v54 = vmul.f32 %v3445_v31, %v2284_v4  ;;  %v5318_v31 = vld [vmem:[#allocation5 + $0xe8] ss:$16 sps:$4 sm:$0xff]  }
 0x777   :  { %v3447_v48 = vpop.eup %3446 }
 0x778   :  { %v5220_v17 = vadd.f32 %v2287_v21, %v2286_v54  ;;  %v5315_v21 = vld [vmem:[#allocation5 + $0xe0] ss:$16 sps:$4 sm:$0xff]   ;;  %v5321_v54 = vld [vmem:[#allocation5 + $0x104] ss:$16 sps:$4 sm:$0xff]  }
 0x77a   :  { %6223 = vst [vmem:[#allocation51_spill] sm:$0xff] %v5220_v17  ;;  %3448 = vtanh.f32 %v5220_v17  ;;  %v5403_v17 = vld [vmem:[#allocation5 + $0x1c0] ss:$16 sps:$4 sm:$0xff]  }
 0x77b   :  { %6229 = vst [vmem:[#allocation58_spill] sm:$0xff] %v5403_v17 }
 0x784   :  { %v3449_v26 = vpop.eup %3448 }
 0x785   :  { %v2290_v0 = vmul.f32 %v3449_v26, %v3447_v48  ;;  %v5324_v48 = vld [vmem:[#allocation5 + $0x10c] ss:$16 sps:$4 sm:$0xff]  }
 0x787   :  { %v2404_v2 = vpack.c.bf16 %v2290_v0, %v2290_v0 }
 0x789   :  { %v5223_v60 = vrot.slane %v2404_v2, 2 }
 0x78b   :  { %2441 = vmatmul.mubr.bf16.vlgmr.msra.gmra.mrb[52].mxu0 %v5223_v60  ;;  %2482 = vmatmul.mubr.bf16.vlgmr.msra.gmra.mrb[60].mxu1 %v5223_v60 }
 0x78c   :  { %2541 = vmatpush1.bf16.msra.mxu0 %v5227_v23  ;;  %2582 = vmatpush1.bf16.msra.mxu1 %v5230_v19 }
 0x78d   :  { %2542 = vmatprep.subr.bf16.mxu0 %v5233_v22  ;;  %2583 = vmatprep.subr.bf16.mxu1 %v5236_v18 }
 0x790   :  { %2543 = vmatpush1.bf16.msra.mxu0 %v5239_v1  ;;  %2584 = vmatpush1.bf16.msra.mxu1 %v5242_v47 }
 0x791   :  { %2544 = vmatprep.subr.bf16.mxu0 %v5245_v49  ;;  %2585 = vmatprep.subr.bf16.mxu1 %v5248_v28 }
 0x794   :  { %2545 = vmatpush1.bf16.msra.mxu0 %v5251_v61  ;;  %2586 = vmatpush1.bf16.msra.mxu1 %v5254_v20 }
 0x795   :  { %2546 = vmatprep.subr.bf16.mxu0 %v5257_v29  ;;  %2587 = vmatprep.subr.bf16.mxu1 %v5260_v36 }
 0x798   :  { %2547 = vmatpush1.bf16.msra.mxu0 %v5263_v33  ;;  %2588 = vmatpush1.bf16.msra.mxu1 %v5266_v16 }
 0x799   :  { %2548 = vmatprep.subr.bf16.mxu0 %v5269_v62  ;;  %2589 = vmatprep.subr.bf16.mxu1 %v5272_v63 }
 0x79b   :  { %v2332_v14 = vpop.f32.mrb[48].mxu0  ;;  %v2373_v40 = vpop.f32.mrb[56].mxu1 }
 0x79c   :  { %v2333_v25 = vadd.f32 %v2332_v14, %v6093_v45  ;;  %v2334_v30 = vpop.f32.mrb[49].mxu0  ;;  %v2375_v15 = vpop.f32.mrb[57].mxu1  ;;  %2549 = vmatpush1.bf16.msra.mxu0 %v5277_v27  ;;  %2590 = vmatpush1.bf16.msra.mxu1 %v5280_v13  ;;  %v2374_v12 = vadd.f32 %v2373_v40, %v6101_v42  ;;  %v5327_v14 = vld [vmem:[#allocation5 + $0x100] ss:$16 sps:$4 sm:$0xff]   ;;  %v5330_v40 = vld [vmem:[#allocation5 + $0x108] ss:$16 sps:$4 sm:$0xff]  }
 0x79d   :  { %v2335_v8 = vadd.f32 %v2334_v30, %v6094_v10  ;;  %v2336_v46 = vpop.f32.mrb[50].mxu0  ;;  %v2377_v38 = vpop.f32.mrb[58].mxu1  ;;  %2550 = vmatprep.subr.bf16.mxu0 %v5283_v44  ;;  %2591 = vmatprep.subr.bf16.mxu1 %v5286_v39  ;;  %v2376_v50 = vadd.f32 %v2375_v15, %v6104_v52  ;;  %v5336_v30 = vld [vmem:[#allocation5 + $0x12c] ss:$16 sps:$4 sm:$0xff]   ;;  %v5339_v15 = vld [vmem:[#allocation5 + $0x120] ss:$16 sps:$4 sm:$0xff]  }
 0x79e   :  { %v3013_v34 = vmul.f32 -1.442695, %v2333_v25  ;;  %v2337_v59 = vpop.f32.mrb[51].mxu0  ;;  %v2378_v57 = vpop.f32.mrb[59].mxu1  ;;  %v3015_v4 = vmul.f32 -1.442695, %v2374_v12 }
 0x79f   :  { %v3014_v11 = vmul.f32 -1.442695, %v2335_v8  ;;  %v5333_v25 = vld [vmem:[#allocation5 + $0x124] ss:$16 sps:$4 sm:$0xff]   ;;  %v5342_v8 = vld [vmem:[#allocation5 + $0x128] ss:$16 sps:$4 sm:$0xff]  }
 0x7a0   :  { %3450 = vpow2.f32 %v3013_v34  ;;  %2551 = vmatpush1.bf16.msra.mxu0 %v5289_v51  ;;  %2592 = vmatpush1.bf16.msra.mxu1 %v5292_v24  ;;  %v5345_v46 = vld [vmem:[#allocation5 + $0x144] ss:$16 sps:$4 sm:$0xff]   ;;  %v5348_v38 = vld [vmem:[#allocation5 + $0x14c] ss:$16 sps:$4 sm:$0xff]   ;;  %v5351_v59 = vld [vmem:[#allocation5 + $0x140] ss:$16 sps:$4 sm:$0xff]  }
 0x7a1   :  { %3452 = vpow2.f32 %v3014_v11  ;;  %2552 = vmatprep.subr.bf16.mxu0 %v5295_v9  ;;  %2593 = vmatprep.subr.bf16.mxu1 %v5298_v7  ;;  %v5354_v57 = vld [vmem:[#allocation5 + $0x148] ss:$16 sps:$4 sm:$0xff]   ;;  %v5357_v12 = vld [vmem:[#allocation5 + $0x164] ss:$16 sps:$4 sm:$0xff]   ;;  %v5373_v45 = vld [vmem:[#allocation5 + $0x18c] ss:$16 sps:$4 sm:$0xff]  }
 0x7a2   :  { %3454 = vtanh.f32 %v2376_v50  ;;  %v5360_v50 = vld [vmem:[#allocation5 + $0x16c] ss:$16 sps:$4 sm:$0xff]   ;;  %v5366_v52 = vld [vmem:[#allocation5 + $0x168] ss:$16 sps:$4 sm:$0xff]   ;;  %v5370_v10 = vld [vmem:[#allocation5 + $0x184] ss:$16 sps:$4 sm:$0xff]  }
 0x7a3   :  { %3456 = vpow2.f32 %v3015_v4 }
 0x7a4   :  { %2553 = vmatpush1.bf16.msra.mxu0 %v5302_v35  ;;  %2594 = vmatpush1.bf16.msra.mxu1 %v5305_v55 }
 0x7a5   :  { %2554 = vmatprep.subr.bf16.mxu0 %v5308_v41  ;;  %2595 = vmatprep.subr.bf16.mxu1 %v5311_v32 }
 0x7a8   :  { %2555 = vmatpush1.bf16.msra.mxu0 %v5315_v21  ;;  %2596 = vmatpush1.bf16.msra.mxu1 %v5318_v31 }
 0x7a9   :  { %2556 = vmatprep.subr.bf16.mxu0 %v5321_v54  ;;  %2597 = vmatprep.subr.bf16.mxu1 %v5324_v48 }
 0x7aa   :  { %v3451_v43 = vpop.eup %3450 }
 0x7ab   :  { %v2389_v26 = vadd.f32 1.0, %v3451_v43  ;;  %v3453_v0 = vpop.eup %3452 }
 0x7ac   :  { %v2390_v2 = vadd.f32 1.0, %v3453_v0  ;;  %2557 = vmatpush1.bf16.msra.mxu0 %v5327_v14  ;;  %2598 = vmatpush1.bf16.msra.mxu1 %v5330_v40  ;;  %v3455_v34 = vpop.eup %3454 }
 0x7ad   :  { %3458 = vrcp.f32 %v2389_v26  ;;  %2558 = vmatprep.subr.bf16.mxu0 %v5333_v25  ;;  %2599 = vmatprep.subr.bf16.mxu1 %v5336_v30  ;;  %v3457_v11 = vpop.eup %3456 }
 0x7ae   :  { %3460 = vrcp.f32 %v2390_v2  ;;  %v2391_v0 = vadd.f32 1.0, %v3457_v11  ;;  %v5363_v2 = vld [vmem:[#allocation5 + $0x160] ss:$16 sps:$4 sm:$0xff]  }
 0x7af   :  { %v5378_v11 = vld [vmem:[#allocation5 + $0x180] ss:$16 sps:$4 sm:$0xff]  }
 0x7b0   :  { %2559 = vmatpush1.bf16.msra.mxu0 %v5339_v15  ;;  %2600 = vmatpush1.bf16.msra.mxu1 %v5342_v8  ;;  %3462 = vrcp.f32 %v2391_v0  ;;  %v5397_v0 = vld [vmem:[#allocation5 + $0x1c4] ss:$16 sps:$4 sm:$0xff]  }
 0x7b1   :  { %2560 = vmatprep.subr.bf16.mxu0 %v5345_v46  ;;  %2601 = vmatprep.subr.bf16.mxu1 %v5348_v38  ;;  %6227 = vst [vmem:[#allocation56_spill] sm:$0xff] %v5397_v0 }
 0x7b4   :  { %2561 = vmatpush1.bf16.msra.mxu0 %v5351_v59  ;;  %2602 = vmatpush1.bf16.msra.mxu1 %v5354_v57 }
 0x7b5   :  { %2562 = vmatprep.subr.bf16.mxu0 %v5357_v12  ;;  %2603 = vmatprep.subr.bf16.mxu1 %v5360_v50 }
 0x7b7   :  { %v3459_v4 = vpop.eup %3458 }
 0x7b8   :  { %v2400_v43 = vmul.f32 %v3459_v4, %v3455_v34  ;;  %v3461_v26 = vpop.eup %3460  ;;  %2563 = vmatpush1.bf16.msra.mxu0 %v5363_v2  ;;  %2604 = vmatpush1.bf16.msra.mxu1 %v5366_v52  ;;  %v5381_v4 = vld [vmem:[#allocation5 + $0x188] ss:$16 sps:$4 sm:$0xff]  }
 0x7b9   :  { %v2399_v42 = vmul.f32 %v3461_v26, %v5157_v3  ;;  %2564 = vmatprep.subr.bf16.mxu0 %v5370_v10  ;;  %2605 = vmatprep.subr.bf16.mxu1 %v5373_v45  ;;  %v5385_v3 = vld [vmem:[#allocation5 + $0x1a4] ss:$16 sps:$4 sm:$0xff]   ;;  %v5388_v26 = vld [vmem:[#allocation5 + $0x1ac] ss:$16 sps:$4 sm:$0xff]  }
 0x7ba   :  { %v3463_v56 = vpop.eup %3462 }
 0x7bb   :  { %v5376_v34 = vadd.f32 %v2400_v43, %v2399_v42  ;;  %v5391_v42 = vld [vmem:[#allocation5 + $0x1a0] ss:$16 sps:$4 sm:$0xff]   ;;  %v5394_v43 = vld [vmem:[#allocation5 + $0x1a8] ss:$16 sps:$4 sm:$0xff]  }
 0x7bc   :  { %2565 = vmatpush1.bf16.msra.mxu0 %v5378_v11  ;;  %2606 = vmatpush1.bf16.msra.mxu1 %v5381_v4  ;;  %6225 = vst [vmem:[#allocation53_spill] sm:$0xff] %v5391_v42  ;;  %6226 = vst [vmem:[#allocation55_spill] sm:$0xff] %v5394_v43 }
 0x7bd   :  { %6224 = vst [vmem:[#allocation52_spill] sm:$0xff] %v5376_v34  ;;  %3464 = vtanh.f32 %v5376_v34  ;;  %2566 = vmatprep.subr.bf16.mxu0 %v5385_v3  ;;  %2607 = vmatprep.subr.bf16.mxu1 %v5388_v26  ;;  %v5400_v34 = vld [vmem:[#allocation5 + $0x1cc] ss:$16 sps:$4 sm:$0xff]  }
 0x7be   :  { %6228 = vst [vmem:[#allocation57_spill] sm:$0xff] %v5400_v34 }
 0x7c0   :  { %2567 = vmatpush1.bf16.msra.mxu0 %v5391_v42  ;;  %2608 = vmatpush1.bf16.msra.mxu1 %v5394_v43  ;;  %v5415_v43 = vld [vmem:[#allocation5 + $0x1e0] ss:$16 sps:$4 sm:$0xff]  }
 0x7c1   :  { %2568 = vmatprep.subr.bf16.mxu0 %v5397_v0  ;;  %2609 = vmatprep.subr.bf16.mxu1 %v5400_v34  ;;  %v5418_v34 = vld [vmem:[#allocation5 + $0x1e8] ss:$16 sps:$4 sm:$0xff]  }
 0x7c4   :  { %2569 = vmatpush1.bf16.msra.mxu0 %v5403_v17  ;;  %2610 = vmatpush1.bf16.msra.mxu1 %v5406_v6 }
 0x7c5   :  { %2570 = vmatprep.subr.bf16.mxu0 %v5409_v37  ;;  %2611 = vmatprep.subr.bf16.mxu1 %v5412_v58 }
 0x7c7   :  { %v3465_v0 = vpop.eup %3464 }
 0x7c8   :  { %2571 = vmatpush1.bf16.msra.mxu0 %v5415_v43  ;;  %2612 = vmatpush1.bf16.msra.mxu1 %v5418_v34  ;;  %v2403_v17 = vmul.f32 %v3465_v0, %v3463_v56  ;;  %v6232_v56 = vld [vmem:[#allocation53_spill] sm:$0xff] }
 0x7c9   :  { %2657 = vmatprep.subr.bf16.mxu0 %v5209_v5  ;;  %2698 = vmatprep.subr.bf16.mxu1 %v5212_v53  ;;  %v6235_v5 = vld [vmem:[#allocation57_spill] sm:$0xff]  ;;  %v6239_v53 = vmov 0.0|0.0  }
 0x7ca   :  { %v2534_v37 = vrot.slane %v2403_v17, 4 }
 0x7cc   :  { %v2536_v6 = vpack.c.bf16 %v2534_v37, %v2534_v37  ;;  %v6233_v37 = vld [vmem:[#allocation55_spill] sm:$0xff] }
 0x7ce   :  { %v2538_v42 = vrot.slane %v2536_v6, 2  ;;  %v6234_v6 = vld [vmem:[#allocation56_spill] sm:$0xff] }
 0x7d0   :  { %2572 = vmatprep.mubr.bf16.mxu0 %v2538_v42  ;;  %2613 = vmatprep.mubr.bf16.mxu1 %v2538_v42 }
 0x7d1   :  { %2573 = vmatmul.mubr.bf16.vlgmr.msra.gmra.mrb[56].mxu0 %v5223_v60  ;;  %2614 = vmatmul.mubr.bf16.vlgmr.msra.gmra.mrb[64].mxu1 %v5223_v60 }
 0x7d2   :  { %2658 = vmatpush1.bf16.msra.mxu0 %v5227_v23  ;;  %2699 = vmatpush1.bf16.msra.mxu1 %v5230_v19 }
 0x7d3   :  { %2659 = vmatprep.subr.bf16.mxu0 %v5233_v22  ;;  %2700 = vmatprep.subr.bf16.mxu1 %v5236_v18 }
 0x7d6   :  { %2660 = vmatpush1.bf16.msra.mxu0 %v5239_v1  ;;  %2701 = vmatpush1.bf16.msra.mxu1 %v5242_v47 }
 0x7d7   :  { %2661 = vmatprep.subr.bf16.mxu0 %v5245_v49  ;;  %2702 = vmatprep.subr.bf16.mxu1 %v5248_v28  ;;  %v6240_v49 = vld [vmem:[#allocation12_spill] sm:$0xff] }
 0x7da   :  { %2662 = vmatpush1.bf16.msra.mxu0 %v5251_v61  ;;  %2703 = vmatpush1.bf16.msra.mxu1 %v5254_v20 }
 0x7db   :  { %2663 = vmatprep.subr.bf16.mxu0 %v5257_v29  ;;  %2704 = vmatprep.subr.bf16.mxu1 %v5260_v36  ;;  %v6241_v29 = vld [vmem:[#allocation13_spill] sm:$0xff] }
 0x7de   :  { %2664 = vmatpush1.bf16.msra.mxu0 %v5263_v33  ;;  %2705 = vmatpush1.bf16.msra.mxu1 %v5266_v16 }
 0x7df   :  { %2665 = vmatprep.subr.bf16.mxu0 %v5269_v62  ;;  %2706 = vmatprep.subr.bf16.mxu1 %v5272_v63  ;;  %v6242_v63 = vld [vmem:[#allocation14_spill] sm:$0xff] }
 0x7e2   :  { %2666 = vmatpush1.bf16.msra.mxu0 %v5277_v27  ;;  %2707 = vmatpush1.bf16.msra.mxu1 %v5280_v13  ;;  %v6243_v13 = vld [vmem:[#allocation15_spill] sm:$0xff] }
 0x7e3   :  { %2667 = vmatprep.subr.bf16.mxu0 %v5283_v44  ;;  %2708 = vmatprep.subr.bf16.mxu1 %v5286_v39 }
 0x7e6   :  { %2668 = vmatpush1.bf16.msra.mxu0 %v5289_v51  ;;  %2709 = vmatpush1.bf16.msra.mxu1 %v5292_v24 }
 0x7e7   :  { %2669 = vmatprep.subr.bf16.mxu0 %v5295_v9  ;;  %2710 = vmatprep.subr.bf16.mxu1 %v5298_v7 }
 0x7ea   :  { %2670 = vmatpush1.bf16.msra.mxu0 %v5302_v35  ;;  %2711 = vmatpush1.bf16.msra.mxu1 %v5305_v55 }
 0x7eb   :  { %2671 = vmatprep.subr.bf16.mxu0 %v5308_v41  ;;  %2712 = vmatprep.subr.bf16.mxu1 %v5311_v32  ;;  %v6244_v32 = vld [vmem:[#allocation51_spill] sm:$0xff] }
 0x7ee   :  { %2672 = vmatpush1.bf16.msra.mxu0 %v5315_v21  ;;  %2713 = vmatpush1.bf16.msra.mxu1 %v5318_v31  ;;  %v2526_v21 = vrot.slane %v6244_v32, 6  ;;  %v2772_v32 = vld [vmem:[#allocation7 + $0x48] sm:$0xff] }
 0x7ef   :  { %2673 = vmatprep.subr.bf16.mxu0 %v5321_v54  ;;  %2714 = vmatprep.subr.bf16.mxu1 %v5324_v48 }
 0x7f2   :  { %2674 = vmatpush1.bf16.msra.mxu0 %v5327_v14  ;;  %2715 = vmatpush1.bf16.msra.mxu1 %v5330_v40 }
 0x7f3   :  { %2675 = vmatprep.subr.bf16.mxu0 %v5333_v25  ;;  %2716 = vmatprep.subr.bf16.mxu1 %v5336_v30 }
 0x7f6   :  { %2676 = vmatpush1.bf16.msra.mxu0 %v5339_v15  ;;  %2717 = vmatpush1.bf16.msra.mxu1 %v5342_v8 }
 0x7f7   :  { %2677 = vmatprep.subr.bf16.mxu0 %v5345_v46  ;;  %2718 = vmatprep.subr.bf16.mxu1 %v5348_v38  ;;  %v6245_v38 = vld [vmem:[#allocation63_spill] sm:$0xff] }
 0x7fa   :  { %2678 = vmatpush1.bf16.msra.mxu0 %v5351_v59  ;;  %2719 = vmatpush1.bf16.msra.mxu1 %v5354_v57 }
 0x7fb   :  { %2679 = vmatprep.subr.bf16.mxu0 %v5357_v12  ;;  %2720 = vmatprep.subr.bf16.mxu1 %v5360_v50  ;;  %v6246_v50 = vld [vmem:[#allocation64_spill] sm:$0xff] }
 0x7fe   :  { %2680 = vmatpush1.bf16.msra.mxu0 %v5363_v2  ;;  %2721 = vmatpush1.bf16.msra.mxu1 %v5366_v52  ;;  %v6236_v52 = vld [vmem:[#allocation58_spill] sm:$0xff] }
 0x7ff   :  { %2681 = vmatprep.subr.bf16.mxu0 %v5370_v10  ;;  %2722 = vmatprep.subr.bf16.mxu1 %v5373_v45  ;;  %v6237_v10 = vld [vmem:[#allocation59_spill] sm:$0xff]  ;;  %v6238_v45 = vld [vmem:[#allocation60_spill] sm:$0xff] }
 0x802   :  { %2682 = vmatpush1.bf16.msra.mxu0 %v5378_v11  ;;  %2723 = vmatpush1.bf16.msra.mxu1 %v5381_v4 }
 0x803   :  { %2683 = vmatprep.subr.bf16.mxu0 %v5385_v3  ;;  %2724 = vmatprep.subr.bf16.mxu1 %v5388_v26 }
 0x806   :  { %2684 = vmatpush1.bf16.msra.mxu0 %v6232_v56  ;;  %2725 = vmatpush1.bf16.msra.mxu1 %v6233_v37  ;;  %v6248_v56 = vld [vmem:[#allocation17_spill] sm:$0xff] }
 0x807   :  { %2685 = vmatprep.subr.bf16.mxu0 %v6234_v6  ;;  %2726 = vmatprep.subr.bf16.mxu1 %v6235_v5 }
 0x80a   :  { %2686 = vmatpush1.bf16.msra.mxu0 %v6236_v52  ;;  %2727 = vmatpush1.bf16.msra.mxu1 %v6237_v10 }
 0x80b   :  { %2687 = vmatprep.subr.bf16.mxu0 %v6238_v45  ;;  %2728 = vmatprep.subr.bf16.mxu1 %v5412_v58 }
 0x80e   :  { %2688 = vmatpush1.bf16.msra.mxu0 %v5415_v43  ;;  %2729 = vmatpush1.bf16.msra.mxu1 %v5418_v34  ;;  %v6247_v43 = vld [vmem:[#allocation16_spill] sm:$0xff] }
 0x80f   :  { %3078 = vmatprep.subr.bf16.mxu0 %v6239_v53 }
 0x85e   :  { %v2442_v17 = vpop.f32.mrb[52].mxu0  ;;  %v2483_v60 = vpop.f32.mrb[60].mxu1 }
 0x85f   :  { %v2494_v23 = vrot.slane %v2442_v17, 2  ;;  %v2444_v19 = vpop.f32.mrb[53].mxu0  ;;  %v2485_v22 = vpop.f32.mrb[61].mxu1  ;;  %v2496_v16 = vrot.slane %v2483_v60, 2 }
 0x860   :  { %v2495_v18 = vrot.slane %v2444_v19, 2  ;;  %v2446_v1 = vpop.f32.mrb[54].mxu0  ;;  %v2487_v47 = vpop.f32.mrb[62].mxu1  ;;  %v2497_v62 = vrot.slane %v2485_v22, 2 }
 0x861   :  { %v2502_v28 = vadd.f32 %v2494_v23, %v6240_v49  ;;  %v2447_v61 = vpop.f32.mrb[55].mxu0  ;;  %v2488_v20 = vpop.f32.mrb[63].mxu1  ;;  %v2504_v27 = vadd.f32 %v2496_v16, %v6242_v63  ;;  %v6249_v1 = vld [vmem:[#allocation52_spill] sm:$0xff] }
 0x862   :  { %v2503_v58 = vadd.f32 %v2495_v18, %v6241_v29  ;;  %v2505_v44 = vadd.f32 %v2497_v62, %v6243_v13  ;;  %v2763_v62 = vld [vmem:[#allocation7] sm:$0xff]  ;;  %v2764_v63 = vld [vmem:[#allocation7 + $0x8] sm:$0xff]  ;;  %v2765_v13 = vld [vmem:[#allocation7 + $0x10] sm:$0xff] }
 0x863   :  { %v3016_v36 = vmul.f32 -1.442695, %v2502_v28  ;;  %v3018_v39 = vmul.f32 -1.442695, %v2504_v27  ;;  %v3079_v27 = vpack.c.bf16 %v2764_v63, %v2763_v62 }
 0x864   :  { %v3017_v33 = vmul.f32 -1.442695, %v2503_v58 }
 0x865   :  { %3466 = vpow2.f32 %v3016_v36 }
 0x866   :  { %3468 = vpow2.f32 %v3017_v33 }
 0x867   :  { %3470 = vtanh.f32 %v2505_v44  ;;  %v2766_v44 = vld [vmem:[#allocation7 + $0x18] sm:$0xff] }
 0x868   :  { %3472 = vpow2.f32 %v3018_v39  ;;  %v3082_v39 = vpack.c.bf16 %v2766_v44, %v2765_v13 }
 0x86f   :  { %v3467_v51 = vpop.eup %3466 }
 0x870   :  { %v2515_v24 = vadd.f32 1.0, %v3467_v51  ;;  %v3469_v9 = vpop.eup %3468  ;;  %v2767_v51 = vld [vmem:[#allocation7 + $0x20] sm:$0xff] }
 0x871   :  { %v2516_v7 = vadd.f32 1.0, %v3469_v9  ;;  %v3471_v35 = vpop.eup %3470 }
 0x872   :  { %3474 = vrcp.f32 %v2515_v24  ;;  %v3473_v55 = vpop.eup %3472  ;;  %v2768_v24 = vld [vmem:[#allocation7 + $0x28] sm:$0xff] }
 0x873   :  { %3476 = vrcp.f32 %v2516_v7  ;;  %v2517_v48 = vadd.f32 1.0, %v3473_v55  ;;  %v3085_v9 = vpack.c.bf16 %v2768_v24, %v2767_v51  ;;  %v2769_v7 = vld [vmem:[#allocation7 + $0x30] sm:$0xff] }
 0x875   :  { %3478 = vrcp.f32 %v2517_v48 }
 0x87c   :  { %v3475_v41 = vpop.eup %3474 }
 0x87d   :  { %v2529_v31 = vmul.f32 %v3475_v41, %v3471_v35  ;;  %v3477_v54 = vpop.eup %3476  ;;  %v2770_v35 = vld [vmem:[#allocation7 + $0x38] sm:$0xff]  ;;  %v2771_v41 = vld [vmem:[#allocation7 + $0x40] sm:$0xff] }
 0x87e   :  { %v2528_v14 = vmul.f32 %v3477_v54, %v2526_v21  ;;  %v3088_v55 = vpack.c.bf16 %v2770_v35, %v2769_v7  ;;  %v3091_v21 = vpack.c.bf16 %v2772_v32, %v2771_v41  ;;  %v2774_v54 = vld [vmem:[#allocation7 + $0x58] sm:$0xff] }
 0x87f   :  { %v3479_v25 = vpop.eup %3478 }
 0x880   :  { %v2530_v40 = vadd.f32 %v2529_v31, %v2528_v14  ;;  %v2773_v31 = vld [vmem:[#allocation7 + $0x50] sm:$0xff]  ;;  %v2775_v14 = vld [vmem:[#allocation7 + $0x60] sm:$0xff] }
 0x881   :  { %v3094_v48 = vpack.c.bf16 %v2774_v54, %v2773_v31 }
 0x882   :  { %3480 = vtanh.f32 %v2530_v40  ;;  %v2776_v40 = vld [vmem:[#allocation7 + $0x68] sm:$0xff] }
 0x88c   :  { %v3481_v30 = vpop.eup %3480 }
 0x88d   :  { %v2532_v15 = vmul.f32 %v3481_v30, %v3479_v25  ;;  %v6250_v25 = vmov 0.0   ;;  %v3097_v30 = vpack.c.bf16 %v2776_v40, %v2775_v14 }
 0x88f   :  { %v2649_v58 = vpack.c.bf16 %v2532_v15, %v2532_v15  ;;  %v2777_v15 = vld [vmem:[#allocation7 + $0x70] sm:$0xff] }
 0x891   :  { %v2653_v16 = vrot.slane %v2649_v58, 3 }
 0x8a4   :  { %v2574_v8 = vpop.f32.mrb[56].mxu0  ;;  %v2615_v46 = vpop.f32.mrb[64].mxu1 }
 0x8a5   :  { %v2575_v59 = vadd.f32 %v2574_v8, %v6245_v38  ;;  %v2576_v57 = vpop.f32.mrb[57].mxu0  ;;  %v2617_v12 = vpop.f32.mrb[65].mxu1  ;;  %v2616_v0 = vadd.f32 %v2615_v46, %v6247_v43  ;;  %v2778_v8 = vld [vmem:[#allocation7 + $0x78] sm:$0xff] }
 0x8a6   :  { %v2577_v2 = vadd.f32 %v2576_v57, %v6246_v50  ;;  %v2578_v34 = vpop.f32.mrb[58].mxu0  ;;  %v2619_v11 = vpop.f32.mrb[66].mxu1  ;;  %v2618_v37 = vadd.f32 %v2617_v12, %v6248_v56  ;;  %v3100_v46 = vpack.c.bf16 %v2778_v8, %v2777_v15 }
 0x8a7   :  { %v3019_v4 = vmul.f32 -1.442695, %v2575_v59  ;;  %v2579_v3 = vpop.f32.mrb[59].mxu0  ;;  %v2620_v26 = vpop.f32.mrb[67].mxu1  ;;  %v3021_v6 = vmul.f32 -1.442695, %v2616_v0 }
 0x8a8   :  { %v3020_v42 = vmul.f32 -1.442695, %v2577_v2 }
 0x8a9   :  { %3482 = vpow2.f32 %v3019_v4 }
 0x8aa   :  { %3484 = vpow2.f32 %v3020_v42 }
 0x8ab   :  { %3486 = vtanh.f32 %v2618_v37 }
 0x8ac   :  { %3488 = vpow2.f32 %v3021_v6 }
 0x8b3   :  { %v3483_v5 = vpop.eup %3482 }
 0x8b4   :  { %v2631_v52 = vadd.f32 1.0, %v3483_v5  ;;  %v3485_v10 = vpop.eup %3484 }
 0x8b5   :  { %v2632_v45 = vadd.f32 1.0, %v3485_v10  ;;  %v3487_v17 = vpop.eup %3486 }
 0x8b6   :  { %3490 = vrcp.f32 %v2631_v52  ;;  %v3489_v60 = vpop.eup %3488 }
 0x8b7   :  { %3492 = vrcp.f32 %v2632_v45  ;;  %v2633_v18 = vadd.f32 1.0, %v3489_v60 }
 0x8b9   :  { %3494 = vrcp.f32 %v2633_v18 }
 0x8c0   :  { %v3491_v23 = vpop.eup %3490 }
 0x8c1   :  { %v2642_v19 = vmul.f32 %v3491_v23, %v3487_v17  ;;  %v3493_v22 = vpop.eup %3492 }
 0x8c2   :  { %v2641_v47 = vmul.f32 %v3493_v22, %v6249_v1 }
 0x8c3   :  { %v3495_v28 = vpop.eup %3494 }
 0x8c4   :  { %v5498_v49 = vadd.f32 %v2642_v19, %v2641_v47 }
 0x8c6   :  { %3496 = vtanh.f32 %v5498_v49 }
 0x8d0   :  { %v3497_v61 = vpop.eup %3496 }
 0x8d1   :  { %v2645_v20 = vmul.f32 %v3497_v61, %v3495_v28  ;;  %v3025_v28 = vld [vmem:[%s5536_s7] ss:$0 sm:$0xff] }
 0x8d3   :  { %v2647_v29 = vrot.slane %v2645_v20, 2 }
 0x8d5   :  { %v2650_v36 = vpack.c.bf16 %v2647_v29, %v2647_v29 }
 0x8d7   :  { %v2654_v33 = vrot.slane %v2650_v36, 3 }
 0x8d9   :  { %2689 = vmatprep.mubr.bf16.mxu0 %v2654_v33  ;;  %2730 = vmatprep.mubr.bf16.mxu1 %v2654_v33 }
 0x8da   :  { %2690 = vmatmul.mubr.bf16.vlgmr.msra.gmra.mrb[60].mxu0 %v2653_v16  ;;  %2731 = vmatmul.mubr.bf16.vlgmr.msra.gmra.mrb[68].mxu1 %v2653_v16 }
 0x8db   :  { %3080 = vmatpush3.bf16.msra.mxu0 %v3079_v27  ;;  %3075 = vmatprep.mubr.msk.f32.mxu0 %vm3810_vm2, %v6250_v25 }
 0x8dc   :  { %3081 = vmatprep.subr.bf16.mxu0 %v6239_v53 }
 0x8df   :  { %3083 = vmatpush3.bf16.msra.mxu0 %v3082_v39 }
 0x8e0   :  { %3084 = vmatprep.subr.bf16.mxu0 %v6239_v53 }
 0x8e3   :  { %3086 = vmatpush3.bf16.msra.mxu0 %v3085_v9 }
 0x8e4   :  { %3087 = vmatprep.subr.bf16.mxu0 %v6239_v53 }
 0x8e7   :  { %3089 = vmatpush3.bf16.msra.mxu0 %v3088_v55 }
 0x8e8   :  { %3090 = vmatprep.subr.bf16.mxu0 %v6239_v53 }
 0x8eb   :  { %3092 = vmatpush3.bf16.msra.mxu0 %v3091_v21 }
 0x8ec   :  { %3093 = vmatprep.subr.bf16.mxu0 %v6239_v53 }
 0x8ef   :  { %3095 = vmatpush3.bf16.msra.mxu0 %v3094_v48 }
 0x8f0   :  { %3096 = vmatprep.subr.bf16.mxu0 %v6239_v53 }
 0x8f3   :  { %3098 = vmatpush3.bf16.msra.mxu0 %v3097_v30 }
 0x8f4   :  { %3099 = vmatprep.subr.bf16.mxu0 %v6239_v53 }
 0x8f7   :  { %3101 = vmatpush3.bf16.msra.mxu0 %v3100_v46 }
 0x9ad   :  { %v2691_v59 = vpop.f32.mrb[60].mxu0  ;;  %v2732_v57 = vpop.f32.mrb[68].mxu1 }
 0x9ae   :  { %v2692_v12 = vadd.f32 %v2691_v59, %v6245_v38  ;;  %v2693_v2 = vpop.f32.mrb[61].mxu0  ;;  %v2734_v34 = vpop.f32.mrb[69].mxu1  ;;  %v2733_v6 = vadd.f32 %v2732_v57, %v6247_v43 }
 0x9af   :  { %v2694_v11 = vadd.f32 %v2693_v2, %v6246_v50  ;;  %v2695_v4 = vpop.f32.mrb[62].mxu0  ;;  %v2736_v3 = vpop.f32.mrb[70].mxu1  ;;  %v2735_v53 = vadd.f32 %v2734_v34, %v6248_v56 }
 0x9b0   :  { %v3022_v26 = vmul.f32 -1.442695, %v2692_v12  ;;  %v2696_v42 = vpop.f32.mrb[63].mxu0  ;;  %v2737_v0 = vpop.f32.mrb[71].mxu1  ;;  %v3024_v5 = vmul.f32 -1.442695, %v2733_v6 }
 0x9b1   :  { %v3023_v37 = vmul.f32 -1.442695, %v2694_v11 }
 0x9b2   :  { %3498 = vpow2.f32 %v3022_v26 }
 0x9b3   :  { %3500 = vpow2.f32 %v3023_v37 }
 0x9b4   :  { %3502 = vtanh.f32 %v2735_v53 }
 0x9b5   :  { %3504 = vpow2.f32 %v3024_v5 }
 0x9bc   :  { %v3499_v52 = vpop.eup %3498 }
 0x9bd   :  { %v2748_v10 = vadd.f32 1.0, %v3499_v52  ;;  %v3501_v38 = vpop.eup %3500 }
 0x9be   :  { %v2749_v50 = vadd.f32 1.0, %v3501_v38  ;;  %v3503_v45 = vpop.eup %3502 }
 0x9bf   :  { %3506 = vrcp.f32 %v2748_v10  ;;  %v3505_v17 = vpop.eup %3504 }
 0x9c0   :  { %3508 = vrcp.f32 %v2749_v50  ;;  %v2750_v22 = vadd.f32 1.0, %v3505_v17 }
 0x9c2   :  { %3510 = vrcp.f32 %v2750_v22 }
 0x9c9   :  { %v3507_v60 = vpop.eup %3506 }
 0x9ca   :  { %v2759_v23 = vmul.f32 %v3507_v60, %v3503_v45  ;;  %v3509_v19 = vpop.eup %3508 }
 0x9cb   :  { %v2758_v18 = vmul.f32 %v3509_v19, %v5498_v49 }
 0x9cc   :  { %v3511_v56 = vpop.eup %3510 }
 0x9cd   :  { %v2760_v43 = vadd.f32 %v2759_v23, %v2758_v18 }
 0x9cf   :  { %3512 = vtanh.f32 %v2760_v43 }
 0x9d9   :  { %v3513_v1 = vpop.eup %3512 }
 0x9da   :  { %v2762_v47 = vmul.f32 %v3513_v1, %v3511_v56 }
 0x9dc   :  { %3076 = vmatmul.mubr.f32.vlgmr.msra.gmra.mrb[64].mxu0 %v2762_v47 }
 0xaaf   :  { %v2852_v61 = vpop.f32.mrb[64].mxu0 }
 0xab0   :  { %v2853_v20 = vadd.f32 %v3025_v28, %v2852_v61  ;;  %v3077_v29 = vpop.f32.mrb[65].mxu0 }
 0xab2   :  { %2856 = vst [vmem:[#allocation8] sm:$0x3] %v2853_v20 }
 0xab3   :  { %3783 = shalt.err (!%p3780_p0)
}
 0xab4   :  { %s3784_s19 = scalar_lea.hbm %s5537_s8, 32 }
 0xab5   :  { %p3785_p1 = scmp.ne.s32.totalorder %s5537_s8, %s3784_s19  ;;  %p3788_p2 = scmp.lt.u32.totalorder %s3784_s19, %s5537_s8 }
 0xab7   :  { %p3790_p3 = pnand %p3788_p2, %p3785_p1 }
 0xab9   :  { %3793 = shalt.err (!%p3790_p3)
}
 0xaba   :  { %2866 = dma.vmem_to_hbm [thread:$0]  %s2864_s13, 32, %s5537_s8, [#allocation4]  }
 0xabb   :  { %3798 = dma.done.wait [#allocation4], 32  }
 0xabc   :  { %3799 = vsyncadd [#allocation4], 4294967264 }
 0xabd   :  { %2870 = vsyncpa [#allocation3], 1 }
 0xabe   :  { %2871 = vsyncpa [#allocation6], 1 }
 0xabf   :  { %2872 = vsyncpa [#allocation4], 1 }

</bundles_post_ra>
